<compile_context>
chip_gen: v5e
topology: v5e:2x2
jax: 0.10.0
libtpu: 0.0.40
codegen_flags: <defaults>
</compile_context>

<pallas_src>
import functools

import numpy as np

import jax
import jax.numpy as jnp
from jax import lax
from jax.experimental import pallas as pl
from jax.experimental.pallas import tpu as pltpu

KS = 7          # spatial-attention conv kernel size
PAD = (KS - 1) // 2


def cbam_kernel(x_ref, w1t_ref, w2t_ref, wmask_ref, o_ref, *, H, W, HW):
    # x_ref:     (Bt, C, HWp)    VMEM (bf16 or f32)
    # w1t_ref:   (C, Cr)         VMEM f32 (fc1 weight, transposed)
    # w2t_ref:   (Cr, C)         VMEM f32 (fc2 weight, transposed)
    # wmask_ref: (2, KS*KS, HWp) VMEM f32 (conv weight * halo mask, per tap)
    # o_ref:     (Bt, C, HWp)    VMEM
    Bt, C, HWp = x_ref.shape

    # ---------------- Channel attention ----------------
    x_f = x_ref[...].astype(jnp.float32)                       # (Bt, C, HWp)
    avg = jnp.sum(x_f, axis=-1) * (1.0 / HW)                   # (Bt, C)
    if HWp != HW:
        lane = lax.broadcasted_iota(jnp.int32, (1, 1, HWp), 2)
        x_f = jnp.where(lane < HW, x_f, jnp.finfo(jnp.float32).min)
    mx = jnp.max(x_f, axis=-1)                                  # (Bt, C)

    # One MXU pass for both pooled vectors.
    pooled = jnp.concatenate([avg, mx], axis=0)                 # (2*Bt, C)
    h = jnp.maximum(
        jnp.dot(pooled, w1t_ref[...], preferred_element_type=jnp.float32), 0.0)
    z = jnp.dot(h, w2t_ref[...], preferred_element_type=jnp.float32)
    ca = jax.nn.sigmoid(z[:Bt] + z[Bt:])                        # (Bt, C)

    # ---------------- Spatial attention ----------------
    y = x_ref[...].astype(jnp.float32) * ca[:, :, None]         # (Bt, C, HWp)
    avg_s = jnp.sum(y, axis=1) * (1.0 / C)                      # (Bt, HWp)
    max_s = jnp.max(y, axis=1)                                  # (Bt, HWp)

    stacked = jnp.stack([avg_s, max_s], axis=0)                 # (2, Bt, HWp)

    zero = jnp.zeros((2, Bt, HWp), jnp.float32)
    acc = [zero, zero, zero, zero]                              # break FMA chain
    t = 0
    for dy in range(KS):
        for dx in range(KS):
            off = (dy - PAD) * W + (dx - PAD)
            shift = (-off) % HWp
            tap = stacked if shift == 0 else pltpu.roll(stacked, shift=shift, axis=2)
            wm = wmask_ref[:, t, :][:, None, :]                 # (2, 1, HWp)
            acc[t % 4] = acc[t % 4] + tap * wm
            t += 1
    total = (acc[0] + acc[1]) + (acc[2] + acc[3])               # (2, Bt, HWp)
    sa = jax.nn.sigmoid(total[0] + total[1])                    # (Bt, HWp)

    # Recompute x*ca at the store instead of keeping `y` live across the conv.
    o_ref[...] = ((x_ref[...].astype(jnp.float32) * ca[:, :, None])
                  * sa[:, None, :]).astype(o_ref.dtype)


def cbam_forward(x, w1, w2, wc, *, io_dtype=jnp.bfloat16,
                 max_block_bytes=6 << 20, vmem_limit_bytes=48 << 20):
    """x: (B, C, H, W); w1: (Cr, C); w2: (C, Cr); wc: (2, KS, KS).

    Returns the CBAM output in `io_dtype` (bf16 by default; in-kernel compute
    stays in f32)."""
    B, C, H, W = x.shape
    Cr = w1.shape[0]
    HW = H * W
    HWp = ((HW + 127) // 128) * 128                      # lane-dense last dim

    # Layout plumbing only: flatten spatial dims onto the lane axis, pad to 128.
    x2 = x.reshape(B, C, HW)
    if HWp != HW:
        x2 = jnp.pad(x2, ((0, 0), (0, 0), (0, HWp - HW)))
    x2 = x2.astype(io_dtype)

    w1t = jnp.asarray(w1, jnp.float32).T                 # (C, Cr)
    w2t = jnp.asarray(w2, jnp.float32).T                 # (Cr, C)

    # Per-tap (conv weight * halo mask), precomputed once: (2, KS*KS, HWp).
    pos = np.arange(HWp)
    hh, ww = pos // W, pos % W
    masks = np.zeros((KS * KS, HWp), np.float32)
    for dy in range(KS):
        for dx in range(KS):
            ok = ((pos < HW)
                  & (hh + dy - PAD >= 0) & (hh + dy - PAD < H)
                  & (ww + dx - PAD >= 0) & (ww + dx - PAD < W))
            masks[dy * KS + dx] = ok.astype(np.float32)
    wflat = jnp.asarray(wc, jnp.float32).reshape(2, KS * KS)
    wmask = wflat[:, :, None] * jnp.asarray(masks)[None]  # (2, KS*KS, HWp)

    # Block sizing: biggest divisor of B under the byte budget, but never so
    # big that the grid collapses below ~4 (>=2) steps: keeps DMA pipelining
    # and v7x 2-TC sharding engaged.
    per_img = C * HWp * jnp.dtype(io_dtype).itemsize
    min_steps = min(B, 4) if B > 1 else 1
    bt = max(1, min(B // min_steps, max_block_bytes // per_img))
    while B % bt:
        bt -= 1
    grid = (B // bt,)

    kernel = functools.partial(cbam_kernel, H=H, W=W, HW=HW)
    io_bytes = jnp.dtype(io_dtype).itemsize

    out = pl.pallas_call(
        kernel,
        out_shape=jax.ShapeDtypeStruct((B, C, HWp), io_dtype),
        grid=grid,
        in_specs=[
            pl.BlockSpec((bt, C, HWp), lambda b: (b, 0, 0)),
            pl.BlockSpec((C, Cr), lambda b: (0, 0)),
            pl.BlockSpec((Cr, C), lambda b: (0, 0)),
            pl.BlockSpec((2, KS * KS, HWp), lambda b: (0, 0, 0)),
        ],
        out_specs=pl.BlockSpec((bt, C, HWp), lambda b: (b, 0, 0)),
        compiler_params=pltpu.CompilerParams(
            dimension_semantics=("parallel",),
            vmem_limit_bytes=int(vmem_limit_bytes)),
        cost_estimate=pl.CostEstimate(
            flops=int(6 * B * C * HWp + 4 * KS * KS * B * HWp + 8 * B * C * Cr),
            transcendentals=int(B * (C + HWp)),
            bytes_accessed=int(2 * B * C * HWp * io_bytes
                               + (2 * C * Cr + 2 * KS * KS * HWp) * 4),
        ),
    )(x2, w1t, w2t, wmask)

    return out[:, :, :HW].reshape(B, C, H, W)


def cbam_reference(x, w1, w2, wc):
    """Pure-JAX reference matching the PyTorch module semantics (f32)."""
    avg = jnp.mean(x, axis=(2, 3), keepdims=True)          # (B, C, 1, 1)
    mx = jnp.max(x, axis=(2, 3), keepdims=True)

    def fc(p):
        h = jnp.maximum(jnp.einsum("rc,bcij->brij", w1, p), 0.0)
        return jnp.einsum("cr,brij->bcij", w2, h)

    ca = jax.nn.sigmoid(fc(avg) + fc(mx))
    y = ca * x

    avg_s = jnp.mean(y, axis=1, keepdims=True)
    max_s = jnp.max(y, axis=1, keepdims=True)
    m = jnp.concatenate([avg_s, max_s], axis=1)             # (B, 2, H, W)
    conv = lax.conv_general_dilated(
        m, wc[None],                                         # OIHW = (1, 2, KS, KS)
        window_strides=(1, 1), padding=((PAD, PAD), (PAD, PAD)),
        dimension_numbers=("NCHW", "OIHW", "NCHW"))
    sa = jax.nn.sigmoid(conv)
    return sa * y


if __name__ == "__main__":
    def run_case(key, B, C, H, W, reduction):
        Cr = max(1, C // reduction)
        kx, k1, k2, kc = jax.random.split(key, 4)
        x = jax.random.normal(kx, (B, C, H, W), dtype=jnp.float32)
        w1 = 0.2 * jax.random.normal(k1, (Cr, C), dtype=jnp.float32)
        w2 = 0.2 * jax.random.normal(k2, (C, Cr), dtype=jnp.float32)
        wc = 0.1 * jax.random.normal(kc, (2, KS, KS), dtype=jnp.float32)

        out = jax.block_until_ready(cbam_forward(x, w1, w2, wc))
        assert out.shape == (B, C, H, W)

        # Kernel I/O is bf16: compare against the f32 reference evaluated on
        # the bf16-quantized input, with tolerance for the bf16 output store.
        x_q = x.astype(jnp.bfloat16).astype(jnp.float32)
        ref = cbam_reference(x_q, w1, w2, wc)
        assert jnp.allclose(out.astype(jnp.float32), ref, rtol=1e-2, atol=1e-2), \
            f"Pallas CBAM mismatch vs reference for shape {(B, C, H, W)}"

    root = jax.random.PRNGKey(0)
    k_a, k_b = jax.random.split(root)
    run_case(k_a, 2, 32, 16, 16, 8)   # HW=256 (lane-aligned), grid=(2,)
    run_case(k_b, 2, 32, 14, 14, 8)   # HW=196 -> padded to 256 (padding path)

    print("KERNEL_OK")
</pallas_src>

<mosaic_0001>
module attributes {stable_mosaic.version = 11 : i64} {
  func.func @cbam_kernel(%arg0: i32, %arg1: memref<1x32x256xbf16, #tpu.memory_space<vmem>>, %arg2: memref<32x4xf32, #tpu.memory_space<vmem>>, %arg3: memref<4x32xf32, #tpu.memory_space<vmem>>, %arg4: memref<2x49x256xf32, #tpu.memory_space<vmem>>, %arg5: memref<1x32x256xbf16, #tpu.memory_space<vmem>>) attributes {dimension_semantics = [#tpu.dimension_semantics<parallel>], iteration_bounds = array<i64: 2>, scalar_prefetch = 0 : i64, scratch_operands = 0 : i64, tpu.core_type = #tpu.core_type<tc>, window_params = [{transform_indices = @transform_0, window_bounds = array<i64: 1, 32, 256>}, {pipeline_mode = #tpu.pipeline_mode<synchronous>, transform_indices = @transform_1, window_bounds = array<i64: 32, 4>}, {pipeline_mode = #tpu.pipeline_mode<synchronous>, transform_indices = @transform_2, window_bounds = array<i64: 4, 32>}, {pipeline_mode = #tpu.pipeline_mode<synchronous>, transform_indices = @transform_3, window_bounds = array<i64: 2, 49, 256>}, {transform_indices = @transform_4, window_bounds = array<i64: 1, 32, 256>}]} {
    %c0 = arith.constant 0 : index
    %c0_0 = arith.constant 0 : index
    %c0_1 = arith.constant 0 : index
    %0 = vector.load %arg1[%c0, %c0_0, %c0_1] : memref<1x32x256xbf16, #tpu.memory_space<vmem>>, vector<1x32x256xbf16>
    %1 = arith.extf %0 : vector<1x32x256xbf16> to vector<1x32x256xf32>
    %cst = arith.constant dense<0.000000e+00> : vector<1x32xf32>
    %2 = vector.multi_reduction <add>, %1, %cst [2] : vector<1x32x256xf32> to vector<1x32xf32>
    %cst_2 = arith.constant 3.906250e-03 : f32
    %3 = vector.broadcast %cst_2 : f32 to vector<1x32xf32>
    %4 = arith.mulf %2, %3 : vector<1x32xf32>
    %cst_3 = arith.constant dense<0xFF800000> : vector<1x32xf32>
    %5 = vector.multi_reduction <maximumf>, %1, %cst_3 [2] : vector<1x32x256xf32> to vector<1x32xf32>
    %6 = tpu.concatenate %4, %5 in 0 : vector<1x32xf32>, vector<1x32xf32> -> vector<2x32xf32>
    %c0_4 = arith.constant 0 : index
    %c0_5 = arith.constant 0 : index
    %7 = vector.load %arg2[%c0_4, %c0_5] : memref<32x4xf32, #tpu.memory_space<vmem>>, vector<32x4xf32>
    %cst_6 = arith.constant dense<0.000000e+00> : vector<2x4xf32>
    %8 = tpu.matmul %6, %7, %cst_6 {dimension_numbers = #tpu.dot_dimension_numbers<[1], [0], [0], [1], [0, 0, 1, 1], [], []>} : vector<2x32xf32>, vector<32x4xf32>, vector<2x4xf32> -> vector<2x4xf32>
    %cst_7 = arith.constant 0.000000e+00 : f32
    %9 = vector.broadcast %cst_7 : f32 to vector<2x4xf32>
    %10 = arith.maximumf %8, %9 : vector<2x4xf32>
    %c0_8 = arith.constant 0 : index
    %c0_9 = arith.constant 0 : index
    %11 = vector.load %arg3[%c0_8, %c0_9] : memref<4x32xf32, #tpu.memory_space<vmem>>, vector<4x32xf32>
    %cst_10 = arith.constant dense<0.000000e+00> : vector<2x32xf32>
    %12 = tpu.matmul %10, %11, %cst_10 {dimension_numbers = #tpu.dot_dimension_numbers<[1], [0], [0], [1], [0, 0, 1, 1], [], []>} : vector<2x4xf32>, vector<4x32xf32>, vector<2x32xf32> -> vector<2x32xf32>
    %13 = vector.extract_strided_slice %12 {offsets = [0, 0], sizes = [1, 32], strides = [1, 1]} : vector<2x32xf32> to vector<1x32xf32>
    %14 = vector.extract_strided_slice %12 {offsets = [1, 0], sizes = [1, 32], strides = [1, 1]} : vector<2x32xf32> to vector<1x32xf32>
    %15 = arith.addf %13, %14 : vector<1x32xf32>
    %16 = arith.negf %15 : vector<1x32xf32>
    %17 = math.exp %16 : vector<1x32xf32>
    %cst_11 = arith.constant 1.000000e+00 : f32
    %18 = vector.broadcast %cst_11 : f32 to vector<1x32xf32>
    %19 = arith.addf %18, %17 : vector<1x32xf32>
    %20 = arith.divf %18, %19 : vector<1x32xf32>
    %c0_12 = arith.constant 0 : index
    %c0_13 = arith.constant 0 : index
    %c0_14 = arith.constant 0 : index
    %21 = vector.load %arg1[%c0_12, %c0_13, %c0_14] : memref<1x32x256xbf16, #tpu.memory_space<vmem>>, vector<1x32x256xbf16>
    %22 = arith.extf %21 : vector<1x32x256xbf16> to vector<1x32x256xf32>
    %23 = vector.shape_cast %20 : vector<1x32xf32> to vector<1x32x1xf32>
    %24 = vector.broadcast %23 : vector<1x32x1xf32> to vector<1x32x256xf32>
    %25 = arith.mulf %22, %24 : vector<1x32x256xf32>
    %cst_15 = arith.constant dense<0.000000e+00> : vector<1x256xf32>
    %26 = vector.multi_reduction <add>, %25, %cst_15 [1] : vector<1x32x256xf32> to vector<1x256xf32>
    %cst_16 = arith.constant 3.125000e-02 : f32
    %27 = vector.broadcast %cst_16 : f32 to vector<1x256xf32>
    %28 = arith.mulf %26, %27 : vector<1x256xf32>
    %cst_17 = arith.constant dense<0xFF800000> : vector<1x256xf32>
    %29 = vector.multi_reduction <maximumf>, %25, %cst_17 [1] : vector<1x32x256xf32> to vector<1x256xf32>
    %30 = vector.shape_cast %28 : vector<1x256xf32> to vector<1x1x256xf32>
    %31 = vector.shape_cast %29 : vector<1x256xf32> to vector<1x1x256xf32>
    %32 = tpu.concatenate %30, %31 in 0 : vector<1x1x256xf32>, vector<1x1x256xf32> -> vector<2x1x256xf32>
    %cst_18 = arith.constant 0.000000e+00 : f32
    %33 = vector.broadcast %cst_18 : f32 to vector<2x1x256xf32>
    %c51_i32 = arith.constant 51 : i32
    %34 = tpu.dynamic_rotate %32 by %c51_i32 dim 2 : vector<2x1x256xf32>, i32 -> vector<2x1x256xf32>
    %c0_19 = arith.constant 0 : index
    %c0_20 = arith.constant 0 : index
    %c0_21 = arith.constant 0 : index
    %35 = vector.load %arg4[%c0_19, %c0_20, %c0_21] : memref<2x49x256xf32, #tpu.memory_space<vmem>>, vector<2x1x256xf32>
    %36 = vector.shape_cast %35 : vector<2x1x256xf32> to vector<2x256xf32>
    %37 = vector.shape_cast %36 : vector<2x256xf32> to vector<2x1x256xf32>
    %38 = arith.mulf %34, %37 : vector<2x1x256xf32>
    %39 = arith.addf %33, %38 : vector<2x1x256xf32>
    %c50_i32 = arith.constant 50 : i32
    %40 = tpu.dynamic_rotate %32 by %c50_i32 dim 2 : vector<2x1x256xf32>, i32 -> vector<2x1x256xf32>
    %c0_22 = arith.constant 0 : index
    %c1 = arith.constant 1 : index
    %c0_23 = arith.constant 0 : index
    %41 = vector.load %arg4[%c0_22, %c1, %c0_23] : memref<2x49x256xf32, #tpu.memory_space<vmem>>, vector<2x1x256xf32>
    %42 = vector.shape_cast %41 : vector<2x1x256xf32> to vector<2x256xf32>
    %43 = vector.shape_cast %42 : vector<2x256xf32> to vector<2x1x256xf32>
    %44 = arith.mulf %40, %43 : vector<2x1x256xf32>
    %45 = arith.addf %33, %44 : vector<2x1x256xf32>
    %c49_i32 = arith.constant 49 : i32
    %46 = tpu.dynamic_rotate %32 by %c49_i32 dim 2 : vector<2x1x256xf32>, i32 -> vector<2x1x256xf32>
    %c0_24 = arith.constant 0 : index
    %c2 = arith.constant 2 : index
    %c0_25 = arith.constant 0 : index
    %47 = vector.load %arg4[%c0_24, %c2, %c0_25] : memref<2x49x256xf32, #tpu.memory_space<vmem>>, vector<2x1x256xf32>
    %48 = vector.shape_cast %47 : vector<2x1x256xf32> to vector<2x256xf32>
    %49 = vector.shape_cast %48 : vector<2x256xf32> to vector<2x1x256xf32>
    %50 = arith.mulf %46, %49 : vector<2x1x256xf32>
    %51 = arith.addf %33, %50 : vector<2x1x256xf32>
    %c48_i32 = arith.constant 48 : i32
    %52 = tpu.dynamic_rotate %32 by %c48_i32 dim 2 : vector<2x1x256xf32>, i32 -> vector<2x1x256xf32>
    %c0_26 = arith.constant 0 : index
    %c3 = arith.constant 3 : index
    %c0_27 = arith.constant 0 : index
    %53 = vector.load %arg4[%c0_26, %c3, %c0_27] : memref<2x49x256xf32, #tpu.memory_space<vmem>>, vector<2x1x256xf32>
    %54 = vector.shape_cast %53 : vector<2x1x256xf32> to vector<2x256xf32>
    %55 = vector.shape_cast %54 : vector<2x256xf32> to vector<2x1x256xf32>
    %56 = arith.mulf %52, %55 : vector<2x1x256xf32>
    %57 = arith.addf %33, %56 : vector<2x1x256xf32>
    %c47_i32 = arith.constant 47 : i32
    %58 = tpu.dynamic_rotate %32 by %c47_i32 dim 2 : vector<2x1x256xf32>, i32 -> vector<2x1x256xf32>
    %c0_28 = arith.constant 0 : index
    %c4 = arith.constant 4 : index
    %c0_29 = arith.constant 0 : index
    %59 = vector.load %arg4[%c0_28, %c4, %c0_29] : memref<2x49x256xf32, #tpu.memory_space<vmem>>, vector<2x1x256xf32>
    %60 = vector.shape_cast %59 : vector<2x1x256xf32> to vector<2x256xf32>
    %61 = vector.shape_cast %60 : vector<2x256xf32> to vector<2x1x256xf32>
    %62 = arith.mulf %58, %61 : vector<2x1x256xf32>
    %63 = arith.addf %39, %62 : vector<2x1x256xf32>
    %c46_i32 = arith.constant 46 : i32
    %64 = tpu.dynamic_rotate %32 by %c46_i32 dim 2 : vector<2x1x256xf32>, i32 -> vector<2x1x256xf32>
    %c0_30 = arith.constant 0 : index
    %c5 = arith.constant 5 : index
    %c0_31 = arith.constant 0 : index
    %65 = vector.load %arg4[%c0_30, %c5, %c0_31] : memref<2x49x256xf32, #tpu.memory_space<vmem>>, vector<2x1x256xf32>
    %66 = vector.shape_cast %65 : vector<2x1x256xf32> to vector<2x256xf32>
    %67 = vector.shape_cast %66 : vector<2x256xf32> to vector<2x1x256xf32>
    %68 = arith.mulf %64, %67 : vector<2x1x256xf32>
    %69 = arith.addf %45, %68 : vector<2x1x256xf32>
    %c45_i32 = arith.constant 45 : i32
    %70 = tpu.dynamic_rotate %32 by %c45_i32 dim 2 : vector<2x1x256xf32>, i32 -> vector<2x1x256xf32>
    %c0_32 = arith.constant 0 : index
    %c6 = arith.constant 6 : index
    %c0_33 = arith.constant 0 : index
    %71 = vector.load %arg4[%c0_32, %c6, %c0_33] : memref<2x49x256xf32, #tpu.memory_space<vmem>>, vector<2x1x256xf32>
    %72 = vector.shape_cast %71 : vector<2x1x256xf32> to vector<2x256xf32>
    %73 = vector.shape_cast %72 : vector<2x256xf32> to vector<2x1x256xf32>
    %74 = arith.mulf %70, %73 : vector<2x1x256xf32>
    %75 = arith.addf %51, %74 : vector<2x1x256xf32>
    %c35_i32 = arith.constant 35 : i32
    %76 = tpu.dynamic_rotate %32 by %c35_i32 dim 2 : vector<2x1x256xf32>, i32 -> vector<2x1x256xf32>
    %c0_34 = arith.constant 0 : index
    %c7 = arith.constant 7 : index
    %c0_35 = arith.constant 0 : index
    %77 = vector.load %arg4[%c0_34, %c7, %c0_35] : memref<2x49x256xf32, #tpu.memory_space<vmem>>, vector<2x1x256xf32>
    %78 = vector.shape_cast %77 : vector<2x1x256xf32> to vector<2x256xf32>
    %79 = vector.shape_cast %78 : vector<2x256xf32> to vector<2x1x256xf32>
    %80 = arith.mulf %76, %79 : vector<2x1x256xf32>
    %81 = arith.addf %57, %80 : vector<2x1x256xf32>
    %c34_i32 = arith.constant 34 : i32
    %82 = tpu.dynamic_rotate %32 by %c34_i32 dim 2 : vector<2x1x256xf32>, i32 -> vector<2x1x256xf32>
    %c0_36 = arith.constant 0 : index
    %c8 = arith.constant 8 : index
    %c0_37 = arith.constant 0 : index
    %83 = vector.load %arg4[%c0_36, %c8, %c0_37] : memref<2x49x256xf32, #tpu.memory_space<vmem>>, vector<2x1x256xf32>
    %84 = vector.shape_cast %83 : vector<2x1x256xf32> to vector<2x256xf32>
    %85 = vector.shape_cast %84 : vector<2x256xf32> to vector<2x1x256xf32>
    %86 = arith.mulf %82, %85 : vector<2x1x256xf32>
    %87 = arith.addf %63, %86 : vector<2x1x256xf32>
    %c33_i32 = arith.constant 33 : i32
    %88 = tpu.dynamic_rotate %32 by %c33_i32 dim 2 : vector<2x1x256xf32>, i32 -> vector<2x1x256xf32>
    %c0_38 = arith.constant 0 : index
    %c9 = arith.constant 9 : index
    %c0_39 = arith.constant 0 : index
    %89 = vector.load %arg4[%c0_38, %c9, %c0_39] : memref<2x49x256xf32, #tpu.memory_space<vmem>>, vector<2x1x256xf32>
    %90 = vector.shape_cast %89 : vector<2x1x256xf32> to vector<2x256xf32>
    %91 = vector.shape_cast %90 : vector<2x256xf32> to vector<2x1x256xf32>
    %92 = arith.mulf %88, %91 : vector<2x1x256xf32>
    %93 = arith.addf %69, %92 : vector<2x1x256xf32>
    %c32_i32 = arith.constant 32 : i32
    %94 = tpu.dynamic_rotate %32 by %c32_i32 dim 2 : vector<2x1x256xf32>, i32 -> vector<2x1x256xf32>
    %c0_40 = arith.constant 0 : index
    %c10 = arith.constant 10 : index
    %c0_41 = arith.constant 0 : index
    %95 = vector.load %arg4[%c0_40, %c10, %c0_41] : memref<2x49x256xf32, #tpu.memory_space<vmem>>, vector<2x1x256xf32>
    %96 = vector.shape_cast %95 : vector<2x1x256xf32> to vector<2x256xf32>
    %97 = vector.shape_cast %96 : vector<2x256xf32> to vector<2x1x256xf32>
    %98 = arith.mulf %94, %97 : vector<2x1x256xf32>
    %99 = arith.addf %75, %98 : vector<2x1x256xf32>
    %c31_i32 = arith.constant 31 : i32
    %100 = tpu.dynamic_rotate %32 by %c31_i32 dim 2 : vector<2x1x256xf32>, i32 -> vector<2x1x256xf32>
    %c0_42 = arith.constant 0 : index
    %c11 = arith.constant 11 : index
    %c0_43 = arith.constant 0 : index
    %101 = vector.load %arg4[%c0_42, %c11, %c0_43] : memref<2x49x256xf32, #tpu.memory_space<vmem>>, vector<2x1x256xf32>
    %102 = vector.shape_cast %101 : vector<2x1x256xf32> to vector<2x256xf32>
    %103 = vector.shape_cast %102 : vector<2x256xf32> to vector<2x1x256xf32>
    %104 = arith.mulf %100, %103 : vector<2x1x256xf32>
    %105 = arith.addf %81, %104 : vector<2x1x256xf32>
    %c30_i32 = arith.constant 30 : i32
    %106 = tpu.dynamic_rotate %32 by %c30_i32 dim 2 : vector<2x1x256xf32>, i32 -> vector<2x1x256xf32>
    %c0_44 = arith.constant 0 : index
    %c12 = arith.constant 12 : index
    %c0_45 = arith.constant 0 : index
    %107 = vector.load %arg4[%c0_44, %c12, %c0_45] : memref<2x49x256xf32, #tpu.memory_space<vmem>>, vector<2x1x256xf32>
    %108 = vector.shape_cast %107 : vector<2x1x256xf32> to vector<2x256xf32>
    %109 = vector.shape_cast %108 : vector<2x256xf32> to vector<2x1x256xf32>
    %110 = arith.mulf %106, %109 : vector<2x1x256xf32>
    %111 = arith.addf %87, %110 : vector<2x1x256xf32>
    %c29_i32 = arith.constant 29 : i32
    %112 = tpu.dynamic_rotate %32 by %c29_i32 dim 2 : vector<2x1x256xf32>, i32 -> vector<2x1x256xf32>
    %c0_46 = arith.constant 0 : index
    %c13 = arith.constant 13 : index
    %c0_47 = arith.constant 0 : index
    %113 = vector.load %arg4[%c0_46, %c13, %c0_47] : memref<2x49x256xf32, #tpu.memory_space<vmem>>, vector<2x1x256xf32>
    %114 = vector.shape_cast %113 : vector<2x1x256xf32> to vector<2x256xf32>
    %115 = vector.shape_cast %114 : vector<2x256xf32> to vector<2x1x256xf32>
    %116 = arith.mulf %112, %115 : vector<2x1x256xf32>
    %117 = arith.addf %93, %116 : vector<2x1x256xf32>
    %c19_i32 = arith.constant 19 : i32
    %118 = tpu.dynamic_rotate %32 by %c19_i32 dim 2 : vector<2x1x256xf32>, i32 -> vector<2x1x256xf32>
    %c0_48 = arith.constant 0 : index
    %c14 = arith.constant 14 : index
    %c0_49 = arith.constant 0 : index
    %119 = vector.load %arg4[%c0_48, %c14, %c0_49] : memref<2x49x256xf32, #tpu.memory_space<vmem>>, vector<2x1x256xf32>
    %120 = vector.shape_cast %119 : vector<2x1x256xf32> to vector<2x256xf32>
    %121 = vector.shape_cast %120 : vector<2x256xf32> to vector<2x1x256xf32>
    %122 = arith.mulf %118, %121 : vector<2x1x256xf32>
    %123 = arith.addf %99, %122 : vector<2x1x256xf32>
    %c18_i32 = arith.constant 18 : i32
    %124 = tpu.dynamic_rotate %32 by %c18_i32 dim 2 : vector<2x1x256xf32>, i32 -> vector<2x1x256xf32>
    %c0_50 = arith.constant 0 : index
    %c15 = arith.constant 15 : index
    %c0_51 = arith.constant 0 : index
    %125 = vector.load %arg4[%c0_50, %c15, %c0_51] : memref<2x49x256xf32, #tpu.memory_space<vmem>>, vector<2x1x256xf32>
    %126 = vector.shape_cast %125 : vector<2x1x256xf32> to vector<2x256xf32>
    %127 = vector.shape_cast %126 : vector<2x256xf32> to vector<2x1x256xf32>
    %128 = arith.mulf %124, %127 : vector<2x1x256xf32>
    %129 = arith.addf %105, %128 : vector<2x1x256xf32>
    %c17_i32 = arith.constant 17 : i32
    %130 = tpu.dynamic_rotate %32 by %c17_i32 dim 2 : vector<2x1x256xf32>, i32 -> vector<2x1x256xf32>
    %c0_52 = arith.constant 0 : index
    %c16 = arith.constant 16 : index
    %c0_53 = arith.constant 0 : index
    %131 = vector.load %arg4[%c0_52, %c16, %c0_53] : memref<2x49x256xf32, #tpu.memory_space<vmem>>, vector<2x1x256xf32>
    %132 = vector.shape_cast %131 : vector<2x1x256xf32> to vector<2x256xf32>
    %133 = vector.shape_cast %132 : vector<2x256xf32> to vector<2x1x256xf32>
    %134 = arith.mulf %130, %133 : vector<2x1x256xf32>
    %135 = arith.addf %111, %134 : vector<2x1x256xf32>
    %c16_i32 = arith.constant 16 : i32
    %136 = tpu.dynamic_rotate %32 by %c16_i32 dim 2 : vector<2x1x256xf32>, i32 -> vector<2x1x256xf32>
    %c0_54 = arith.constant 0 : index
    %c17 = arith.constant 17 : index
    %c0_55 = arith.constant 0 : index
    %137 = vector.load %arg4[%c0_54, %c17, %c0_55] : memref<2x49x256xf32, #tpu.memory_space<vmem>>, vector<2x1x256xf32>
    %138 = vector.shape_cast %137 : vector<2x1x256xf32> to vector<2x256xf32>
    %139 = vector.shape_cast %138 : vector<2x256xf32> to vector<2x1x256xf32>
    %140 = arith.mulf %136, %139 : vector<2x1x256xf32>
    %141 = arith.addf %117, %140 : vector<2x1x256xf32>
    %c15_i32 = arith.constant 15 : i32
    %142 = tpu.dynamic_rotate %32 by %c15_i32 dim 2 : vector<2x1x256xf32>, i32 -> vector<2x1x256xf32>
    %c0_56 = arith.constant 0 : index
    %c18 = arith.constant 18 : index
    %c0_57 = arith.constant 0 : index
    %143 = vector.load %arg4[%c0_56, %c18, %c0_57] : memref<2x49x256xf32, #tpu.memory_space<vmem>>, vector<2x1x256xf32>
    %144 = vector.shape_cast %143 : vector<2x1x256xf32> to vector<2x256xf32>
    %145 = vector.shape_cast %144 : vector<2x256xf32> to vector<2x1x256xf32>
    %146 = arith.mulf %142, %145 : vector<2x1x256xf32>
    %147 = arith.addf %123, %146 : vector<2x1x256xf32>
    %c14_i32 = arith.constant 14 : i32
    %148 = tpu.dynamic_rotate %32 by %c14_i32 dim 2 : vector<2x1x256xf32>, i32 -> vector<2x1x256xf32>
    %c0_58 = arith.constant 0 : index
    %c19 = arith.constant 19 : index
    %c0_59 = arith.constant 0 : index
    %149 = vector.load %arg4[%c0_58, %c19, %c0_59] : memref<2x49x256xf32, #tpu.memory_space<vmem>>, vector<2x1x256xf32>
    %150 = vector.shape_cast %149 : vector<2x1x256xf32> to vector<2x256xf32>
    %151 = vector.shape_cast %150 : vector<2x256xf32> to vector<2x1x256xf32>
    %152 = arith.mulf %148, %151 : vector<2x1x256xf32>
    %153 = arith.addf %129, %152 : vector<2x1x256xf32>
    %c13_i32 = arith.constant 13 : i32
    %154 = tpu.dynamic_rotate %32 by %c13_i32 dim 2 : vector<2x1x256xf32>, i32 -> vector<2x1x256xf32>
    %c0_60 = arith.constant 0 : index
    %c20 = arith.constant 20 : index
    %c0_61 = arith.constant 0 : index
    %155 = vector.load %arg4[%c0_60, %c20, %c0_61] : memref<2x49x256xf32, #tpu.memory_space<vmem>>, vector<2x1x256xf32>
    %156 = vector.shape_cast %155 : vector<2x1x256xf32> to vector<2x256xf32>
    %157 = vector.shape_cast %156 : vector<2x256xf32> to vector<2x1x256xf32>
    %158 = arith.mulf %154, %157 : vector<2x1x256xf32>
    %159 = arith.addf %135, %158 : vector<2x1x256xf32>
    %c3_i32 = arith.constant 3 : i32
    %160 = tpu.dynamic_rotate %32 by %c3_i32 dim 2 : vector<2x1x256xf32>, i32 -> vector<2x1x256xf32>
    %c0_62 = arith.constant 0 : index
    %c21 = arith.constant 21 : index
    %c0_63 = arith.constant 0 : index
    %161 = vector.load %arg4[%c0_62, %c21, %c0_63] : memref<2x49x256xf32, #tpu.memory_space<vmem>>, vector<2x1x256xf32>
    %162 = vector.shape_cast %161 : vector<2x1x256xf32> to vector<2x256xf32>
    %163 = vector.shape_cast %162 : vector<2x256xf32> to vector<2x1x256xf32>
    %164 = arith.mulf %160, %163 : vector<2x1x256xf32>
    %165 = arith.addf %141, %164 : vector<2x1x256xf32>
    %c2_i32 = arith.constant 2 : i32
    %166 = tpu.dynamic_rotate %32 by %c2_i32 dim 2 : vector<2x1x256xf32>, i32 -> vector<2x1x256xf32>
    %c0_64 = arith.constant 0 : index
    %c22 = arith.constant 22 : index
    %c0_65 = arith.constant 0 : index
    %167 = vector.load %arg4[%c0_64, %c22, %c0_65] : memref<2x49x256xf32, #tpu.memory_space<vmem>>, vector<2x1x256xf32>
    %168 = vector.shape_cast %167 : vector<2x1x256xf32> to vector<2x256xf32>
    %169 = vector.shape_cast %168 : vector<2x256xf32> to vector<2x1x256xf32>
    %170 = arith.mulf %166, %169 : vector<2x1x256xf32>
    %171 = arith.addf %147, %170 : vector<2x1x256xf32>
    %c1_i32 = arith.constant 1 : i32
    %172 = tpu.dynamic_rotate %32 by %c1_i32 dim 2 : vector<2x1x256xf32>, i32 -> vector<2x1x256xf32>
    %c0_66 = arith.constant 0 : index
    %c23 = arith.constant 23 : index
    %c0_67 = arith.constant 0 : index
    %173 = vector.load %arg4[%c0_66, %c23, %c0_67] : memref<2x49x256xf32, #tpu.memory_space<vmem>>, vector<2x1x256xf32>
    %174 = vector.shape_cast %173 : vector<2x1x256xf32> to vector<2x256xf32>
    %175 = vector.shape_cast %174 : vector<2x256xf32> to vector<2x1x256xf32>
    %176 = arith.mulf %172, %175 : vector<2x1x256xf32>
    %177 = arith.addf %153, %176 : vector<2x1x256xf32>
    %c0_68 = arith.constant 0 : index
    %c24 = arith.constant 24 : index
    %c0_69 = arith.constant 0 : index
    %178 = vector.load %arg4[%c0_68, %c24, %c0_69] : memref<2x49x256xf32, #tpu.memory_space<vmem>>, vector<2x1x256xf32>
    %179 = vector.shape_cast %178 : vector<2x1x256xf32> to vector<2x256xf32>
    %180 = vector.shape_cast %179 : vector<2x256xf32> to vector<2x1x256xf32>
    %181 = arith.mulf %32, %180 : vector<2x1x256xf32>
    %182 = arith.addf %159, %181 : vector<2x1x256xf32>
    %c255_i32 = arith.constant 255 : i32
    %183 = tpu.dynamic_rotate %32 by %c255_i32 dim 2 : vector<2x1x256xf32>, i32 -> vector<2x1x256xf32>
    %c0_70 = arith.constant 0 : index
    %c25 = arith.constant 25 : index
    %c0_71 = arith.constant 0 : index
    %184 = vector.load %arg4[%c0_70, %c25, %c0_71] : memref<2x49x256xf32, #tpu.memory_space<vmem>>, vector<2x1x256xf32>
    %185 = vector.shape_cast %184 : vector<2x1x256xf32> to vector<2x256xf32>
    %186 = vector.shape_cast %185 : vector<2x256xf32> to vector<2x1x256xf32>
    %187 = arith.mulf %183, %186 : vector<2x1x256xf32>
    %188 = arith.addf %165, %187 : vector<2x1x256xf32>
    %c254_i32 = arith.constant 254 : i32
    %189 = tpu.dynamic_rotate %32 by %c254_i32 dim 2 : vector<2x1x256xf32>, i32 -> vector<2x1x256xf32>
    %c0_72 = arith.constant 0 : index
    %c26 = arith.constant 26 : index
    %c0_73 = arith.constant 0 : index
    %190 = vector.load %arg4[%c0_72, %c26, %c0_73] : memref<2x49x256xf32, #tpu.memory_space<vmem>>, vector<2x1x256xf32>
    %191 = vector.shape_cast %190 : vector<2x1x256xf32> to vector<2x256xf32>
    %192 = vector.shape_cast %191 : vector<2x256xf32> to vector<2x1x256xf32>
    %193 = arith.mulf %189, %192 : vector<2x1x256xf32>
    %194 = arith.addf %171, %193 : vector<2x1x256xf32>
    %c253_i32 = arith.constant 253 : i32
    %195 = tpu.dynamic_rotate %32 by %c253_i32 dim 2 : vector<2x1x256xf32>, i32 -> vector<2x1x256xf32>
    %c0_74 = arith.constant 0 : index
    %c27 = arith.constant 27 : index
    %c0_75 = arith.constant 0 : index
    %196 = vector.load %arg4[%c0_74, %c27, %c0_75] : memref<2x49x256xf32, #tpu.memory_space<vmem>>, vector<2x1x256xf32>
    %197 = vector.shape_cast %196 : vector<2x1x256xf32> to vector<2x256xf32>
    %198 = vector.shape_cast %197 : vector<2x256xf32> to vector<2x1x256xf32>
    %199 = arith.mulf %195, %198 : vector<2x1x256xf32>
    %200 = arith.addf %177, %199 : vector<2x1x256xf32>
    %c243_i32 = arith.constant 243 : i32
    %201 = tpu.dynamic_rotate %32 by %c243_i32 dim 2 : vector<2x1x256xf32>, i32 -> vector<2x1x256xf32>
    %c0_76 = arith.constant 0 : index
    %c28 = arith.constant 28 : index
    %c0_77 = arith.constant 0 : index
    %202 = vector.load %arg4[%c0_76, %c28, %c0_77] : memref<2x49x256xf32, #tpu.memory_space<vmem>>, vector<2x1x256xf32>
    %203 = vector.shape_cast %202 : vector<2x1x256xf32> to vector<2x256xf32>
    %204 = vector.shape_cast %203 : vector<2x256xf32> to vector<2x1x256xf32>
    %205 = arith.mulf %201, %204 : vector<2x1x256xf32>
    %206 = arith.addf %182, %205 : vector<2x1x256xf32>
    %c242_i32 = arith.constant 242 : i32
    %207 = tpu.dynamic_rotate %32 by %c242_i32 dim 2 : vector<2x1x256xf32>, i32 -> vector<2x1x256xf32>
    %c0_78 = arith.constant 0 : index
    %c29 = arith.constant 29 : index
    %c0_79 = arith.constant 0 : index
    %208 = vector.load %arg4[%c0_78, %c29, %c0_79] : memref<2x49x256xf32, #tpu.memory_space<vmem>>, vector<2x1x256xf32>
    %209 = vector.shape_cast %208 : vector<2x1x256xf32> to vector<2x256xf32>
    %210 = vector.shape_cast %209 : vector<2x256xf32> to vector<2x1x256xf32>
    %211 = arith.mulf %207, %210 : vector<2x1x256xf32>
    %212 = arith.addf %188, %211 : vector<2x1x256xf32>
    %c241_i32 = arith.constant 241 : i32
    %213 = tpu.dynamic_rotate %32 by %c241_i32 dim 2 : vector<2x1x256xf32>, i32 -> vector<2x1x256xf32>
    %c0_80 = arith.constant 0 : index
    %c30 = arith.constant 30 : index
    %c0_81 = arith.constant 0 : index
    %214 = vector.load %arg4[%c0_80, %c30, %c0_81] : memref<2x49x256xf32, #tpu.memory_space<vmem>>, vector<2x1x256xf32>
    %215 = vector.shape_cast %214 : vector<2x1x256xf32> to vector<2x256xf32>
    %216 = vector.shape_cast %215 : vector<2x256xf32> to vector<2x1x256xf32>
    %217 = arith.mulf %213, %216 : vector<2x1x256xf32>
    %218 = arith.addf %194, %217 : vector<2x1x256xf32>
    %c240_i32 = arith.constant 240 : i32
    %219 = tpu.dynamic_rotate %32 by %c240_i32 dim 2 : vector<2x1x256xf32>, i32 -> vector<2x1x256xf32>
    %c0_82 = arith.constant 0 : index
    %c31 = arith.constant 31 : index
    %c0_83 = arith.constant 0 : index
    %220 = vector.load %arg4[%c0_82, %c31, %c0_83] : memref<2x49x256xf32, #tpu.memory_space<vmem>>, vector<2x1x256xf32>
    %221 = vector.shape_cast %220 : vector<2x1x256xf32> to vector<2x256xf32>
    %222 = vector.shape_cast %221 : vector<2x256xf32> to vector<2x1x256xf32>
    %223 = arith.mulf %219, %222 : vector<2x1x256xf32>
    %224 = arith.addf %200, %223 : vector<2x1x256xf32>
    %c239_i32 = arith.constant 239 : i32
    %225 = tpu.dynamic_rotate %32 by %c239_i32 dim 2 : vector<2x1x256xf32>, i32 -> vector<2x1x256xf32>
    %c0_84 = arith.constant 0 : index
    %c32 = arith.constant 32 : index
    %c0_85 = arith.constant 0 : index
    %226 = vector.load %arg4[%c0_84, %c32, %c0_85] : memref<2x49x256xf32, #tpu.memory_space<vmem>>, vector<2x1x256xf32>
    %227 = vector.shape_cast %226 : vector<2x1x256xf32> to vector<2x256xf32>
    %228 = vector.shape_cast %227 : vector<2x256xf32> to vector<2x1x256xf32>
    %229 = arith.mulf %225, %228 : vector<2x1x256xf32>
    %230 = arith.addf %206, %229 : vector<2x1x256xf32>
    %c238_i32 = arith.constant 238 : i32
    %231 = tpu.dynamic_rotate %32 by %c238_i32 dim 2 : vector<2x1x256xf32>, i32 -> vector<2x1x256xf32>
    %c0_86 = arith.constant 0 : index
    %c33 = arith.constant 33 : index
    %c0_87 = arith.constant 0 : index
    %232 = vector.load %arg4[%c0_86, %c33, %c0_87] : memref<2x49x256xf32, #tpu.memory_space<vmem>>, vector<2x1x256xf32>
    %233 = vector.shape_cast %232 : vector<2x1x256xf32> to vector<2x256xf32>
    %234 = vector.shape_cast %233 : vector<2x256xf32> to vector<2x1x256xf32>
    %235 = arith.mulf %231, %234 : vector<2x1x256xf32>
    %236 = arith.addf %212, %235 : vector<2x1x256xf32>
    %c237_i32 = arith.constant 237 : i32
    %237 = tpu.dynamic_rotate %32 by %c237_i32 dim 2 : vector<2x1x256xf32>, i32 -> vector<2x1x256xf32>
    %c0_88 = arith.constant 0 : index
    %c34 = arith.constant 34 : index
    %c0_89 = arith.constant 0 : index
    %238 = vector.load %arg4[%c0_88, %c34, %c0_89] : memref<2x49x256xf32, #tpu.memory_space<vmem>>, vector<2x1x256xf32>
    %239 = vector.shape_cast %238 : vector<2x1x256xf32> to vector<2x256xf32>
    %240 = vector.shape_cast %239 : vector<2x256xf32> to vector<2x1x256xf32>
    %241 = arith.mulf %237, %240 : vector<2x1x256xf32>
    %242 = arith.addf %218, %241 : vector<2x1x256xf32>
    %c227_i32 = arith.constant 227 : i32
    %243 = tpu.dynamic_rotate %32 by %c227_i32 dim 2 : vector<2x1x256xf32>, i32 -> vector<2x1x256xf32>
    %c0_90 = arith.constant 0 : index
    %c35 = arith.constant 35 : index
    %c0_91 = arith.constant 0 : index
    %244 = vector.load %arg4[%c0_90, %c35, %c0_91] : memref<2x49x256xf32, #tpu.memory_space<vmem>>, vector<2x1x256xf32>
    %245 = vector.shape_cast %244 : vector<2x1x256xf32> to vector<2x256xf32>
    %246 = vector.shape_cast %245 : vector<2x256xf32> to vector<2x1x256xf32>
    %247 = arith.mulf %243, %246 : vector<2x1x256xf32>
    %248 = arith.addf %224, %247 : vector<2x1x256xf32>
    %c226_i32 = arith.constant 226 : i32
    %249 = tpu.dynamic_rotate %32 by %c226_i32 dim 2 : vector<2x1x256xf32>, i32 -> vector<2x1x256xf32>
    %c0_92 = arith.constant 0 : index
    %c36 = arith.constant 36 : index
    %c0_93 = arith.constant 0 : index
    %250 = vector.load %arg4[%c0_92, %c36, %c0_93] : memref<2x49x256xf32, #tpu.memory_space<vmem>>, vector<2x1x256xf32>
    %251 = vector.shape_cast %250 : vector<2x1x256xf32> to vector<2x256xf32>
    %252 = vector.shape_cast %251 : vector<2x256xf32> to vector<2x1x256xf32>
    %253 = arith.mulf %249, %252 : vector<2x1x256xf32>
    %254 = arith.addf %230, %253 : vector<2x1x256xf32>
    %c225_i32 = arith.constant 225 : i32
    %255 = tpu.dynamic_rotate %32 by %c225_i32 dim 2 : vector<2x1x256xf32>, i32 -> vector<2x1x256xf32>
    %c0_94 = arith.constant 0 : index
    %c37 = arith.constant 37 : index
    %c0_95 = arith.constant 0 : index
    %256 = vector.load %arg4[%c0_94, %c37, %c0_95] : memref<2x49x256xf32, #tpu.memory_space<vmem>>, vector<2x1x256xf32>
    %257 = vector.shape_cast %256 : vector<2x1x256xf32> to vector<2x256xf32>
    %258 = vector.shape_cast %257 : vector<2x256xf32> to vector<2x1x256xf32>
    %259 = arith.mulf %255, %258 : vector<2x1x256xf32>
    %260 = arith.addf %236, %259 : vector<2x1x256xf32>
    %c224_i32 = arith.constant 224 : i32
    %261 = tpu.dynamic_rotate %32 by %c224_i32 dim 2 : vector<2x1x256xf32>, i32 -> vector<2x1x256xf32>
    %c0_96 = arith.constant 0 : index
    %c38 = arith.constant 38 : index
    %c0_97 = arith.constant 0 : index
    %262 = vector.load %arg4[%c0_96, %c38, %c0_97] : memref<2x49x256xf32, #tpu.memory_space<vmem>>, vector<2x1x256xf32>
    %263 = vector.shape_cast %262 : vector<2x1x256xf32> to vector<2x256xf32>
    %264 = vector.shape_cast %263 : vector<2x256xf32> to vector<2x1x256xf32>
    %265 = arith.mulf %261, %264 : vector<2x1x256xf32>
    %266 = arith.addf %242, %265 : vector<2x1x256xf32>
    %c223_i32 = arith.constant 223 : i32
    %267 = tpu.dynamic_rotate %32 by %c223_i32 dim 2 : vector<2x1x256xf32>, i32 -> vector<2x1x256xf32>
    %c0_98 = arith.constant 0 : index
    %c39 = arith.constant 39 : index
    %c0_99 = arith.constant 0 : index
    %268 = vector.load %arg4[%c0_98, %c39, %c0_99] : memref<2x49x256xf32, #tpu.memory_space<vmem>>, vector<2x1x256xf32>
    %269 = vector.shape_cast %268 : vector<2x1x256xf32> to vector<2x256xf32>
    %270 = vector.shape_cast %269 : vector<2x256xf32> to vector<2x1x256xf32>
    %271 = arith.mulf %267, %270 : vector<2x1x256xf32>
    %272 = arith.addf %248, %271 : vector<2x1x256xf32>
    %c222_i32 = arith.constant 222 : i32
    %273 = tpu.dynamic_rotate %32 by %c222_i32 dim 2 : vector<2x1x256xf32>, i32 -> vector<2x1x256xf32>
    %c0_100 = arith.constant 0 : index
    %c40 = arith.constant 40 : index
    %c0_101 = arith.constant 0 : index
    %274 = vector.load %arg4[%c0_100, %c40, %c0_101] : memref<2x49x256xf32, #tpu.memory_space<vmem>>, vector<2x1x256xf32>
    %275 = vector.shape_cast %274 : vector<2x1x256xf32> to vector<2x256xf32>
    %276 = vector.shape_cast %275 : vector<2x256xf32> to vector<2x1x256xf32>
    %277 = arith.mulf %273, %276 : vector<2x1x256xf32>
    %278 = arith.addf %254, %277 : vector<2x1x256xf32>
    %c221_i32 = arith.constant 221 : i32
    %279 = tpu.dynamic_rotate %32 by %c221_i32 dim 2 : vector<2x1x256xf32>, i32 -> vector<2x1x256xf32>
    %c0_102 = arith.constant 0 : index
    %c41 = arith.constant 41 : index
    %c0_103 = arith.constant 0 : index
    %280 = vector.load %arg4[%c0_102, %c41, %c0_103] : memref<2x49x256xf32, #tpu.memory_space<vmem>>, vector<2x1x256xf32>
    %281 = vector.shape_cast %280 : vector<2x1x256xf32> to vector<2x256xf32>
    %282 = vector.shape_cast %281 : vector<2x256xf32> to vector<2x1x256xf32>
    %283 = arith.mulf %279, %282 : vector<2x1x256xf32>
    %284 = arith.addf %260, %283 : vector<2x1x256xf32>
    %c211_i32 = arith.constant 211 : i32
    %285 = tpu.dynamic_rotate %32 by %c211_i32 dim 2 : vector<2x1x256xf32>, i32 -> vector<2x1x256xf32>
    %c0_104 = arith.constant 0 : index
    %c42 = arith.constant 42 : index
    %c0_105 = arith.constant 0 : index
    %286 = vector.load %arg4[%c0_104, %c42, %c0_105] : memref<2x49x256xf32, #tpu.memory_space<vmem>>, vector<2x1x256xf32>
    %287 = vector.shape_cast %286 : vector<2x1x256xf32> to vector<2x256xf32>
    %288 = vector.shape_cast %287 : vector<2x256xf32> to vector<2x1x256xf32>
    %289 = arith.mulf %285, %288 : vector<2x1x256xf32>
    %290 = arith.addf %266, %289 : vector<2x1x256xf32>
    %c210_i32 = arith.constant 210 : i32
    %291 = tpu.dynamic_rotate %32 by %c210_i32 dim 2 : vector<2x1x256xf32>, i32 -> vector<2x1x256xf32>
    %c0_106 = arith.constant 0 : index
    %c43 = arith.constant 43 : index
    %c0_107 = arith.constant 0 : index
    %292 = vector.load %arg4[%c0_106, %c43, %c0_107] : memref<2x49x256xf32, #tpu.memory_space<vmem>>, vector<2x1x256xf32>
    %293 = vector.shape_cast %292 : vector<2x1x256xf32> to vector<2x256xf32>
    %294 = vector.shape_cast %293 : vector<2x256xf32> to vector<2x1x256xf32>
    %295 = arith.mulf %291, %294 : vector<2x1x256xf32>
    %296 = arith.addf %272, %295 : vector<2x1x256xf32>
    %c209_i32 = arith.constant 209 : i32
    %297 = tpu.dynamic_rotate %32 by %c209_i32 dim 2 : vector<2x1x256xf32>, i32 -> vector<2x1x256xf32>
    %c0_108 = arith.constant 0 : index
    %c44 = arith.constant 44 : index
    %c0_109 = arith.constant 0 : index
    %298 = vector.load %arg4[%c0_108, %c44, %c0_109] : memref<2x49x256xf32, #tpu.memory_space<vmem>>, vector<2x1x256xf32>
    %299 = vector.shape_cast %298 : vector<2x1x256xf32> to vector<2x256xf32>
    %300 = vector.shape_cast %299 : vector<2x256xf32> to vector<2x1x256xf32>
    %301 = arith.mulf %297, %300 : vector<2x1x256xf32>
    %302 = arith.addf %278, %301 : vector<2x1x256xf32>
    %c208_i32 = arith.constant 208 : i32
    %303 = tpu.dynamic_rotate %32 by %c208_i32 dim 2 : vector<2x1x256xf32>, i32 -> vector<2x1x256xf32>
    %c0_110 = arith.constant 0 : index
    %c45 = arith.constant 45 : index
    %c0_111 = arith.constant 0 : index
    %304 = vector.load %arg4[%c0_110, %c45, %c0_111] : memref<2x49x256xf32, #tpu.memory_space<vmem>>, vector<2x1x256xf32>
    %305 = vector.shape_cast %304 : vector<2x1x256xf32> to vector<2x256xf32>
    %306 = vector.shape_cast %305 : vector<2x256xf32> to vector<2x1x256xf32>
    %307 = arith.mulf %303, %306 : vector<2x1x256xf32>
    %308 = arith.addf %284, %307 : vector<2x1x256xf32>
    %c207_i32 = arith.constant 207 : i32
    %309 = tpu.dynamic_rotate %32 by %c207_i32 dim 2 : vector<2x1x256xf32>, i32 -> vector<2x1x256xf32>
    %c0_112 = arith.constant 0 : index
    %c46 = arith.constant 46 : index
    %c0_113 = arith.constant 0 : index
    %310 = vector.load %arg4[%c0_112, %c46, %c0_113] : memref<2x49x256xf32, #tpu.memory_space<vmem>>, vector<2x1x256xf32>
    %311 = vector.shape_cast %310 : vector<2x1x256xf32> to vector<2x256xf32>
    %312 = vector.shape_cast %311 : vector<2x256xf32> to vector<2x1x256xf32>
    %313 = arith.mulf %309, %312 : vector<2x1x256xf32>
    %314 = arith.addf %290, %313 : vector<2x1x256xf32>
    %c206_i32 = arith.constant 206 : i32
    %315 = tpu.dynamic_rotate %32 by %c206_i32 dim 2 : vector<2x1x256xf32>, i32 -> vector<2x1x256xf32>
    %c0_114 = arith.constant 0 : index
    %c47 = arith.constant 47 : index
    %c0_115 = arith.constant 0 : index
    %316 = vector.load %arg4[%c0_114, %c47, %c0_115] : memref<2x49x256xf32, #tpu.memory_space<vmem>>, vector<2x1x256xf32>
    %317 = vector.shape_cast %316 : vector<2x1x256xf32> to vector<2x256xf32>
    %318 = vector.shape_cast %317 : vector<2x256xf32> to vector<2x1x256xf32>
    %319 = arith.mulf %315, %318 : vector<2x1x256xf32>
    %320 = arith.addf %296, %319 : vector<2x1x256xf32>
    %c205_i32 = arith.constant 205 : i32
    %321 = tpu.dynamic_rotate %32 by %c205_i32 dim 2 : vector<2x1x256xf32>, i32 -> vector<2x1x256xf32>
    %c0_116 = arith.constant 0 : index
    %c48 = arith.constant 48 : index
    %c0_117 = arith.constant 0 : index
    %322 = vector.load %arg4[%c0_116, %c48, %c0_117] : memref<2x49x256xf32, #tpu.memory_space<vmem>>, vector<2x1x256xf32>
    %323 = vector.shape_cast %322 : vector<2x1x256xf32> to vector<2x256xf32>
    %324 = vector.shape_cast %323 : vector<2x256xf32> to vector<2x1x256xf32>
    %325 = arith.mulf %321, %324 : vector<2x1x256xf32>
    %326 = arith.addf %302, %325 : vector<2x1x256xf32>
    %327 = arith.addf %326, %308 : vector<2x1x256xf32>
    %328 = arith.addf %314, %320 : vector<2x1x256xf32>
    %329 = arith.addf %327, %328 : vector<2x1x256xf32>
    %330 = vector.extract_strided_slice %329 {offsets = [0, 0, 0], sizes = [1, 1, 256], strides = [1, 1, 1]} : vector<2x1x256xf32> to vector<1x1x256xf32>
    %331 = vector.shape_cast %330 : vector<1x1x256xf32> to vector<1x256xf32>
    %332 = vector.extract_strided_slice %329 {offsets = [1, 0, 0], sizes = [1, 1, 256], strides = [1, 1, 1]} : vector<2x1x256xf32> to vector<1x1x256xf32>
    %333 = vector.shape_cast %332 : vector<1x1x256xf32> to vector<1x256xf32>
    %334 = arith.addf %331, %333 : vector<1x256xf32>
    %335 = arith.negf %334 : vector<1x256xf32>
    %336 = math.exp %335 : vector<1x256xf32>
    %cst_118 = arith.constant 1.000000e+00 : f32
    %337 = vector.broadcast %cst_118 : f32 to vector<1x256xf32>
    %338 = arith.addf %337, %336 : vector<1x256xf32>
    %339 = arith.divf %337, %338 : vector<1x256xf32>
    %c0_119 = arith.constant 0 : index
    %c0_120 = arith.constant 0 : index
    %c0_121 = arith.constant 0 : index
    %340 = vector.load %arg1[%c0_119, %c0_120, %c0_121] : memref<1x32x256xbf16, #tpu.memory_space<vmem>>, vector<1x32x256xbf16>
    %341 = arith.extf %340 : vector<1x32x256xbf16> to vector<1x32x256xf32>
    %342 = vector.shape_cast %20 : vector<1x32xf32> to vector<1x32x1xf32>
    %343 = vector.broadcast %342 : vector<1x32x1xf32> to vector<1x32x256xf32>
    %344 = arith.mulf %341, %343 : vector<1x32x256xf32>
    %345 = vector.shape_cast %339 : vector<1x256xf32> to vector<1x1x256xf32>
    %346 = vector.broadcast %345 : vector<1x1x256xf32> to vector<1x32x256xf32>
    %347 = arith.mulf %344, %346 : vector<1x32x256xf32>
    %348 = arith.truncf %347 : vector<1x32x256xf32> to vector<1x32x256xbf16>
    %c0_122 = arith.constant 0 : index
    %c0_123 = arith.constant 0 : index
    %c0_124 = arith.constant 0 : index
    %349 = vector.load %arg5[%c0_122, %c0_123, %c0_124] : memref<1x32x256xbf16, #tpu.memory_space<vmem>>, vector<1x32x256xbf16>
    tpu.vector_store %arg5[%c0_122, %c0_123, %c0_124], %348 {strides = array<i32>} : memref<1x32x256xbf16, #tpu.memory_space<vmem>>, vector<1x32x256xbf16>,
    return
  }
  func.func @transform_0(%arg0: i32) -> (i32, i32, i32) {
    %c0_i32 = arith.constant 0 : i32
    %c0_i32_0 = arith.constant 0 : i32
    %c0_i32_1 = arith.constant 0 : i32
    return %arg0, %c0_i32, %c0_i32_0 : i32, i32, i32
  }
  func.func @transform_1(%arg0: i32) -> (i32, i32) {
    %c0_i32 = arith.constant 0 : i32
    %c0_i32_0 = arith.constant 0 : i32
    %c0_i32_1 = arith.constant 0 : i32
    return %c0_i32, %c0_i32_0 : i32, i32
  }
  func.func @transform_2(%arg0: i32) -> (i32, i32) {
    %c0_i32 = arith.constant 0 : i32
    %c0_i32_0 = arith.constant 0 : i32
    %c0_i32_1 = arith.constant 0 : i32
    return %c0_i32, %c0_i32_0 : i32, i32
  }
  func.func @transform_3(%arg0: i32) -> (i32, i32, i32) {
    %c0_i32 = arith.constant 0 : i32
    %c0_i32_0 = arith.constant 0 : i32
    %c0_i32_1 = arith.constant 0 : i32
    %c0_i32_2 = arith.constant 0 : i32
    return %c0_i32, %c0_i32_0, %c0_i32_1 : i32, i32, i32
  }
  func.func @transform_4(%arg0: i32) -> (i32, i32, i32) {
    %c0_i32 = arith.constant 0 : i32
    %c0_i32_0 = arith.constant 0 : i32
    %c0_i32_1 = arith.constant 0 : i32
    return %arg0, %c0_i32, %c0_i32_0 : i32, i32, i32
  }
}

</mosaic_0001>

<bundles_post_ra>
// kernel: tpu_custom_call.1
= control target key start
LH: loop header
LB: loop body
LE: loop exit
PB: predicated region body
PF: predicated region fallthrough
CT: control target
= control target key end

     0   :  { %9 = vsyncpa [#allocation3], 0  ;;  %s4462_s0 = inlined_call_operand.vmem [shape: bf16[2,32,256], index: 0, kind: input, shape index: {}]   ;;  %s4463_s1 = inlined_call_operand.vmem [shape: f32[32,4], index: 1, kind: input, shape index: {}]   ;;  %s4464_s2 = inlined_call_operand.vmem [shape: f32[4,32], index: 2, kind: input, shape index: {}]   ;;  %s4465_s3 = inlined_call_operand.vmem [shape: f32[2,49,256], index: 3, kind: input, shape index: {}]   ;;  %s4466_s4 = inlined_call_operand.hbm [shape: bf16[2,32,256], index: 4, kind: output, shape index: {}]  }
   0x1   :  { %11 = vsyncpa [#allocation3 + $0x1], 0  ;;  %s2633_s15 = smov 0   ;;  %s2635_s16 = smov 0  }
   0x2   :  { %s2637_s17 = smov 0   ;;  %s2639_s18 = smov 0  }
   0x3 LB: > { %s2654_s19 = sadd.s32 4294967295, %s2556_s18   ;;  %s2271_s20 = sadd.s32 4294967294, %s2556_s18   ;;  %s2556_s18 = sphi %s2639_s18, %s4713_s18   ;;  %s2552_s17 = sphi %s2637_s17, %s4712_s17   ;;  %s2548_s16 = sphi %s2635_s16, %s4711_s16   ;;  %s2544_s15 = sphi %s2633_s15, %s4710_s15  }
   0x4   : > { %s2658_s21 = sadd.s32 1, %s2556_s18   ;;  %s113_s22 = sadd.s32 1, %s2552_s17 }
   0x5   : > { %s110_s23 = ssub.s32 %s2556_s18, %s2658_s21  ;;  %p123_p0 = scmp.ne.s32.totalorder %s2552_s17, %s2548_s16 }
   0x6   : > { %p111_p1 = scmp.eq.s32.totalorder %s110_s23, 0  ;;  %p124_p2 = scmp.eq.s32.totalorder %s2654_s19, 1 }
   0x7   : > { %p129_p3 = scmp.ne.s32.totalorder %s2548_s16, %s2544_s15  ;;  %p130_p4 = scmp.eq.s32.totalorder %s2271_s20, 1 }
   0x8   : > { %s2669_s24 = scalar_select %p111_p1, %s2552_s17, %s113_s22  }
   0x9   : > { %p2671_p5 = por %p124_p2, %p123_p0  ;;  %p2675_p6 = por %p130_p4, %p129_p3 }
   0xa   : > { %p2274_p7 = scmp.ge.s32.totalorder %s2556_s18, 1  ;;  %p165_p8 = scmp.lt.s32.totalorder %s2556_s18, 3 }
   0xc   : > { %p166_p9 = pnand %p2274_p7, %p165_p8 }
   0xe   : > { %169 = sbr.rel (%p166_p9) target bundleno = 1261 (0x4ed), region = 36 }
  0x13   : > { %p191_p10 = scmp.lt.s32.totalorder %s2654_s19, 1  ;;  %v273_v20 = vld [vmem:[%s4463_s1 + $0x18] sm:$0xff]  ;;  %v272_v21 = vld [vmem:[%s4463_s1 + $0x10] sm:$0xff]  ;;  %v271_v22 = vld [vmem:[%s4463_s1 + $0x8] sm:$0xff]  ;;  %v240_v27 = vlaneseq  ;;  %vm245_vm0 = vcmask 130112   ;;  %vm249_vm1 = vcmask 195712  }
  0x14   : > { %290 = vmatpush.msra.mxu0 %v273_v20  ;;  %v270_v23 = vld [vmem:[%s4463_s1] sm:$0xff]  ;;  %vm253_vm2 = vcmask 261312   ;;  %vm268_vm3 = vcmask 1040384   ;;  %vm274_vm4 = vcmask 261120   ;;  %vm304_vm5 = vcmask 1043456   ;;  %s2558_s22 = smov 50  }
  0x15   : > { %s192_s27 = scalar_select %p191_p10, %s2654_s19, 1  ;;  %v2730_v28 = vand.u32 127, %v240_v27  ;;  %v299_v56 = vld [vmem:[%s4464_s2] sm:$0xf]  ;;  %vm300_vm6 = vcmask 31744   ;;  %v353_v59 = vshrl.u32 %v240_v27, 7 }
  0x16   : > { %291 = vmatpush.msra.mxu0 %v272_v21  ;;  %2279 = vmatpush.msk.msra.mxu1 %vm304_vm5, %v299_v56  ;;  %s2559_s23 = smov 51   ;;  %s2562_s29 = smov 47  }
  0x17   : > { %s2386_s28 = sshll.u32 %s192_s27, 5  ;;  %v243_v31 = vadd.s32 4294967288, %v2730_v28  ;;  %v247_v34 = vadd.s32 4294967280, %v2730_v28  ;;  %v251_v39 = vadd.s32 4294967272, %v2730_v28  ;;  %2477 = vset.pattern.permute.xlu2 %v353_v59  ;;  %v366_v60 = vadd.s32 16, %v353_v59  ;;  %s2560_s27 = smov 48  }
  0x18   : > { %s195_s5 = scalar_lea.vmem %s4462_s0, %s2386_s28  ;;  %292 = vmatpush.msra.mxu0 %v271_v22  ;;  %v360_v61 = vadd.s32 8, %v353_v59  ;;  %s2561_s28 = smov 49   ;;  %vm464_vm11 = vcmp.lt.s32.totalorder %v2730_v28, 50  ;;  %vm430_vm12 = vcmp.lt.s32.totalorder %v2730_v28, 51  ;;  %vm569_vm13 = vcmp.lt.s32.totalorder %v2730_v28, 47 }
  0x19   : > { %v196_v0 = vld [vmem:[%s195_s5] sm:$0xff]  ;;  %v198_v1 = vld [vmem:[%s195_s5 + $0x10] sm:$0xff]  ;;  %v197_v6 = vld [vmem:[%s195_s5 + $0x8] sm:$0xff]  ;;  %2479 = vset.pattern.permute.xlu1 %v366_v60  ;;  %s4527_s30 = smov 45   ;;  %s2565_s6 = smov 35   ;;  %vm499_vm14 = vcmp.lt.s32.totalorder %v2730_v28, 49 }
  0x1a   : > { %v2686_v2 = vunpack.c.l.bf16 %v196_v0  ;;  %v2688_v3 = vunpack.c.h.bf16 %v196_v0  ;;  %v2690_v4 = vunpack.c.l.bf16 %v198_v1  ;;  %v2692_v5 = vunpack.c.h.bf16 %v198_v1  ;;  %v199_v10 = vld [vmem:[%s195_s5 + $0x18] sm:$0xff]  ;;  %293 = vmatpush.msra.mxu0 %v270_v23  ;;  %2478 = vset.pattern.permute.xlu0 %v360_v61  ;;  %s2564_s5 = smov 46   ;;  %s4519_s7 = smov 33  }
  0x1b   : > { %v2700_v11 = vunpack.c.l.bf16 %v197_v6  ;;  %v2702_v12 = vunpack.c.h.bf16 %v197_v6  ;;  %v2704_v13 = vunpack.c.l.bf16 %v199_v10  ;;  %v2706_v14 = vunpack.c.h.bf16 %v199_v10  ;;  %s4525_s8 = smov 34   ;;  %s4523_s9 = smov 32  }
  0x1c   : > { %v224_v7 = vmax.f32 %v2686_v2, %v2688_v3  ;;  %v208_v8 = vadd.f32 %v2688_v3, %v2686_v2  ;;  %v214_v9 = vadd.f32 %v2692_v5, %v2690_v4  ;;  %v230_v18 = vmax.f32 %v2690_v4, %v2692_v5  ;;  %s4471_s10 = smov 30   ;;  %s4469_s11 = smov 31  }
  0x1d   : > { %v227_v15 = vmax.f32 %v2700_v11, %v2702_v12  ;;  %v211_v16 = vadd.f32 %v2702_v12, %v2700_v11  ;;  %v217_v17 = vadd.f32 %v2706_v14, %v2704_v13  ;;  %v233_v19 = vmax.f32 %v2704_v13, %v2706_v14  ;;  %s4467_s12 = smov 29   ;;  %s4477_s13 = smov 18  }
  0x1e   : > { %225 = vmax.xlane.f32.xlu2 %v224_v7  ;;  %209 = vadd.xlane.f32.xlu0 %v208_v8  ;;  %v372_v23 = vadd.s32 24, %v353_v59  ;;  %s4475_s14 = smov 19   ;;  %s4473_s20 = smov 17   ;;  %vm534_vm15 = vcmp.lt.s32.totalorder %v2730_v28, 48  ;;  %vm4549_vm5 = vcmp.lt.s32.totalorder %v2730_v28, 33 }
  0x1f   : > { %215 = vadd.xlane.f32.xlu1 %v214_v9 }
  0x26   : > { %228 = vmax.xlane.f32.xlu2 %v227_v15  ;;  %212 = vadd.xlane.f32.xlu0 %v211_v16 }
  0x27   : > { %218 = vadd.xlane.f32.xlu1 %v217_v17 }
  0x2e   : > { %231 = vmax.xlane.f32.xlu0 %v230_v18 }
  0x2f   : > { %234 = vmax.xlane.f32.xlu1 %v233_v19 }
  0x91   : > { %v210_v24 = vpop.xlane.xlu0 %209  ;;  %v226_v25 = vpop.xlane.xlu2 %225 }
  0x92   : > { %v216_v26 = vpop.xlane.xlu1 %215  ;;  %v220_v29 = vmul.f32 0.00390625, %v210_v24  ;;  %v260_v41 = vperm.slane %v226_v25, %v2730_v28 }
  0x93   : > { %v222_v35 = vmul.f32 0.00390625, %v216_v26 }
  0x94   : > { %v242_v38 = vperm.slane %v220_v29, %v2730_v28 }
  0x95   : > { %v248_v44 = vperm.slane %v222_v35, %v247_v34 }
  0x99   : > { %v213_v30 = vpop.xlane.xlu0 %212  ;;  %v229_v36 = vpop.xlane.xlu2 %228 }
  0x9a   : > { %v221_v32 = vmul.f32 0.00390625, %v213_v30  ;;  %v219_v33 = vpop.xlane.xlu1 %218  ;;  %v261_v42 = vperm.slane %v229_v36, %v243_v31 }
  0x9b   : > { %v223_v40 = vmul.f32 0.00390625, %v219_v33 }
  0x9c   : > { %v244_v37 = vperm.slane %v221_v32, %v243_v31  ;;  %v262_v50 = vsel %vm245_vm0, %v261_v42, %v260_v41 }
  0x9d   : > { %v252_v45 = vperm.slane %v223_v40, %v251_v39 }
  0x9e   : > { %v246_v43 = vsel %vm245_vm0, %v244_v37, %v242_v38  ;;  %vm674_vm0 = vcmp.lt.s32.totalorder %v2730_v28, 35 }
  0x9f   : > { %v250_v49 = vsel %vm249_vm1, %v248_v44, %v246_v43 }
  0xa0   : > { %v254_v53 = vsel %vm253_vm2, %v252_v45, %v250_v49 }
  0xa1   : > { %v232_v46 = vpop.xlane.xlu0 %231 }
  0xa2   : > { %v263_v47 = vperm.slane %v232_v46, %v247_v34  ;;  %v235_v48 = vpop.xlane.xlu1 %234 }
  0xa3   : > { %v265_v51 = vperm.slane %v235_v48, %v251_v39 }
  0xa4   : > { %v264_v52 = vsel %vm249_vm1, %v263_v47, %v262_v50  ;;  %vm604_vm1 = vcmp.lt.s32.totalorder %v2730_v28, 46 }
  0xa5   : > { %v266_v54 = vsel %vm253_vm2, %v265_v51, %v264_v52  ;;  %vm639_vm2 = vcmp.lt.s32.totalorder %v2730_v28, 45 }
  0xa6   : > { %v269_v55 = vsel %vm268_vm3, %v254_v53, %v266_v54  ;;  %vm4547_vm3 = vcmp.lt.s32.totalorder %v2730_v28, 32 }
  0xa7   : > { %2278 = vmatmul.msk.f32.vlgmr.msra.gmra.mxu0 %vm274_vm4, %v269_v55  ;;  %vm709_vm4 = vcmp.lt.s32.totalorder %v2730_v28, 34 }
 0x124   : > { %v295_v57 = vpop.f32.mrf.mxu0 }
 0x125   : > { %v298_v58 = vmax.f32 %v295_v57, 0.0 }
 0x127   : > { %2280 = vmatmul.msk.f32.vlgmr.msra.gmra.mxu1 %vm300_vm6, %v298_v58  ;;  %vm4544_vm6 = vcmp.lt.s32.totalorder %v2730_v28, 29 }
 0x1a4   : > { %v325_v62 = vpop.f32.mrf.mxu1 }
 0x1a5   : > { %v329_v63 = vrot.slane %v325_v62, 1 }
 0x1a7   : > { %v331_v0 = vadd.f32 %v329_v63, %v325_v62 }
 0x1a9   : > { %v2281_v1 = vmul.f32 -1.442695, %v331_v0 }
 0x1ab   : > { %2482 = vpow2.f32 %v2281_v1 }
 0x1b1   : > { %v2483_v6 = vpop.eup %2482 }
 0x1b2   : > { %v335_v7 = vadd.f32 1.0, %v2483_v6 }
 0x1b4   : > { %2484 = vrcp.f32 %v335_v7  ;;  %v347_v15 = vand.u32 2147483648, %v335_v7  ;;  %v345_v17 = vand.u32 2147483647, %v335_v7  ;;  %vm341_vm8 = vweird.f32 %v335_v7 }
 0x1b6   : > { %v348_v19 = vor.u32 1.1754944e-38, %v347_v15  ;;  %vm346_vm10 = vcmp.eq.f32.partialorder %v345_v17, 8.507059e+37 }
 0x1ba   : > { %v2485_v8 = vpop.eup %2484 }
 0x1bb   : > { %v337_v9 = vmul.f32 %v2485_v8, %v335_v7  ;;  %vm342_vm7 = vweird.f32 %v2485_v8 }
 0x1bc   : > { %vm343_vm9 = vmor %vm341_vm8, %vm342_vm7  ;;  %vm4548_vm7 = vcmp.lt.s32.totalorder %v2730_v28, 31  ;;  %vm4545_vm8 = vcmp.lt.s32.totalorder %v2730_v28, 19 }
 0x1bd   : > { %v338_v10 = vsub.f32 1.0, %v337_v9 }
 0x1bf   : > { %v339_v16 = vmul.f32 %v2485_v8, %v338_v10 }
 0x1c1   : > { %v340_v18 = vadd.f32 %v2485_v8, %v339_v16 }
 0x1c3   : > { %v344_v20 = vsel %vm343_vm9, %v2485_v8, %v340_v18  ;;  %vm4546_vm9 = vcmp.lt.s32.totalorder %v2730_v28, 15 }
 0x1c4   : > { %v349_v21 = vsel %vm346_vm10, %v348_v19, %v344_v20  ;;  %vm849_vm10 = vcmp.lt.s32.totalorder %v2730_v28, 30 }
 0x1c5   : > { %v351_v22 = vperm.slane %v349_v21, 0 }
 0x1c7   : > { %368 = vperm.xlu1 %2479, %v351_v22   ;;  %362 = vperm.xlu0 %2478, %v351_v22  }
 0x1c8   : > { %356 = vperm.xlu2 %2477, %v351_v22  }
 0x1cf   : > { %2481 = vset.pattern.permute.xlu0 %v372_v23 }
 0x1d0   : > { %2480 = vset.pattern.permute.xlu2 %v372_v23 }
 0x1d8   : > { %374 = vperm.xlu2 %2480, %v351_v22  }
 0x222   : > { %v357_v24 = vpop.permute.xlu2 %356 }
 0x223   : > { %v2741_v26 = vmul.f32 %v357_v24, %v2686_v2  ;;  %v2744_v27 = vmul.f32 %v357_v24, %v2688_v3 }
 0x225   : > { %4582 = vst [vmem:[#allocation5_spill] sm:$0xff] %v2741_v26 }
 0x226   : > { %4583 = vst [vmem:[#allocation6_spill] sm:$0xff] %v2744_v27 }
 0x232   : > { %v375_v25 = vpop.permute.xlu2 %374 }
 0x233   : > { %v2759_v2 = vmul.f32 %v375_v25, %v2704_v13  ;;  %v2762_v3 = vmul.f32 %v375_v25, %v2706_v14 }
 0x235   : > { %4588 = vst [vmem:[#allocation11_spill] sm:$0xff] %v2759_v2 }
 0x236   : > { %4589 = vst [vmem:[#allocation12_spill] sm:$0xff] %v2762_v3 }
 0x239   : > { %v369_v29 = vpop.permute.xlu1 %368  ;;  %v363_v30 = vpop.permute.xlu0 %362 }
 0x23a   : > { %v2747_v31 = vmul.f32 %v369_v29, %v2690_v4  ;;  %v2750_v32 = vmul.f32 %v369_v29, %v2692_v5  ;;  %v2753_v33 = vmul.f32 %v363_v30, %v2700_v11  ;;  %v2756_v34 = vmul.f32 %v363_v30, %v2702_v12 }
 0x23c   : > { %4584 = vst [vmem:[#allocation7_spill] sm:$0xff] %v2747_v31  ;;  %v404_v35 = vmax.f32 %v2741_v26, %v2747_v31  ;;  %v413_v4 = vmax.f32 %v2744_v27, %v2750_v32  ;;  %v405_v5 = vmax.f32 %v2753_v33, %v2759_v2  ;;  %v414_v11 = vmax.f32 %v2756_v34, %v2762_v3 }
 0x23d   : > { %4585 = vst [vmem:[#allocation8_spill] sm:$0xff] %v2750_v32  ;;  %v384_v15 = vadd.f32 %v2753_v33, %v2741_v26  ;;  %v393_v16 = vadd.f32 %v2756_v34, %v2744_v27 }
 0x23e   : > { %4586 = vst [vmem:[#allocation9_spill] sm:$0xff] %v2753_v33  ;;  %v406_v12 = vmax.f32 %v404_v35, %v405_v5  ;;  %v415_v36 = vmax.f32 %v413_v4, %v414_v11 }
 0x23f   : > { %4587 = vst [vmem:[#allocation10_spill] sm:$0xff] %v2756_v34  ;;  %v385_v17 = vadd.f32 %v384_v15, %v2747_v31  ;;  %v394_v20 = vadd.f32 %v393_v16, %v2750_v32  ;;  %v3065_v32 = vld [vmem:[%s4465_s3 + $0x76] ss:$8 sm:$0x3] }
 0x240   : > { %v407_v37 = vrot.slane %v406_v12, 4  ;;  %v416_v13 = vrot.slane %v415_v36, 4 }
 0x241   : > { %v386_v22 = vadd.f32 %v385_v17, %v2759_v2  ;;  %v395_v23 = vadd.f32 %v394_v20, %v2762_v3  ;;  %v2284_v17 = vld [vmem:[%s4465_s3 + $0x71] ss:$8 sm:$0x3] }
 0x242   : > { %v408_v38 = vmax.f32 %v406_v12, %v407_v37  ;;  %v417_v39 = vmax.f32 %v415_v36, %v416_v13 }
 0x243   : > { %v387_v24 = vrot.slane %v386_v22, 4  ;;  %v396_v30 = vrot.slane %v395_v23, 4 }
 0x244   : > { %v409_v14 = vrot.slane %v408_v38, 2  ;;  %v418_v40 = vrot.slane %v417_v39, 2 }
 0x245   : > { %v388_v4 = vadd.f32 %v387_v24, %v386_v22  ;;  %v397_v5 = vadd.f32 %v396_v30, %v395_v23  ;;  %v2282_v24 = vld [vmem:[%s4465_s3 + $0x70] ss:$8 sm:$0x3] }
 0x246   : > { %v410_v41 = vmax.f32 %v408_v38, %v409_v14  ;;  %v419_v42 = vmax.f32 %v417_v39, %v418_v40 }
 0x247   : > { %v389_v11 = vrot.slane %v388_v4, 2  ;;  %v398_v37 = vrot.slane %v397_v5, 2 }
 0x248   : > { %v411_v43 = vrot.slane %v410_v41, 1  ;;  %v420_v44 = vrot.slane %v419_v42, 1 }
 0x249   : > { %v390_v38 = vadd.f32 %v389_v11, %v388_v4  ;;  %v399_v39 = vadd.f32 %v398_v37, %v397_v5  ;;  %v2290_v4 = vld [vmem:[%s4465_s3 + $0x74] ss:$8 sm:$0x3]  ;;  %v2286_v5 = vld [vmem:[%s4465_s3 + $0x72] ss:$8 sm:$0x3] }
 0x24a   : > { %v2772_v45 = vmax.f32 %v410_v41, %v411_v43  ;;  %v2774_v46 = vmax.f32 %v419_v42, %v420_v44  ;;  %v477_v11 = vperm.slane %v2284_v17, 0  ;;  %v478_v37 = vperm.slane %v2284_v17, 1 }
 0x24b   : > { %v391_v14 = vrot.slane %v390_v38, 1  ;;  %v400_v42 = vrot.slane %v399_v39, 1  ;;  %v512_v17 = vperm.slane %v2286_v5, 0  ;;  %v513_v3 = vperm.slane %v2286_v5, 1 }
 0x24c   : > { %462 = vrot.lane.b32.xlu0 %v2774_v46, %s2558_s22  ;;  %458 = vrot.lane.b32.xlu2 %v2772_v45, %s2558_s22 }
 0x24d   : > { %424 = vrot.lane.b32.xlu1 %v2772_v45, %s2559_s23  ;;  %v392_v44 = vadd.f32 %v391_v14, %v390_v38  ;;  %v401_v15 = vadd.f32 %v400_v42, %v399_v39  ;;  %v3039_v38 = vld [vmem:[%s4465_s3 + $0x73] ss:$8 sm:$0x3]  ;;  %v442_v39 = vperm.slane %v2282_v24, 0  ;;  %v443_v14 = vperm.slane %v2282_v24, 1 }
 0x24e   : > { %v3045_v42 = vld [vmem:[%s4465_s3 + $0x77] ss:$8 sm:$0x3]  ;;  %v3053_v24 = vld [vmem:[%s4465_s3 + $0x75] ss:$8 sm:$0x3] }
 0x24f   : > { %v3012_v16 = vmul.f32 0.03125, %v392_v44  ;;  %v3021_v23 = vmul.f32 0.03125, %v401_v15  ;;  %v582_v44 = vperm.slane %v2290_v4, 0  ;;  %v583_v15 = vperm.slane %v2290_v4, 1 }
 0x250   : > { %v548_v4 = vperm.slane %v3039_v38, 1  ;;  %v687_v5 = vperm.slane %v3045_v42, 0  ;;  %v688_v2 = vperm.slane %v3045_v42, 1 }
 0x251   : > { %4593 = vst [vmem:[#allocation16_spill] sm:$0xff] %v3012_v16  ;;  %v3112_v16 = vld [vmem:[%s4465_s3 + $0x82] ss:$8 sm:$0x3] }
 0x252   : > { %4594 = vst [vmem:[#allocation17_spill] sm:$0xff] %v3021_v23  ;;  %v618_v23 = vperm.slane %v3053_v24, 1 }
 0x254   : > { %528 = vrot.lane.b32.xlu0 %v2772_v45, %s2560_s27  ;;  %497 = vrot.lane.b32.xlu2 %v2774_v46, %s2561_s28 }
 0x255   : > { %428 = vrot.lane.b32.xlu1 %v2774_v46, %s2559_s23 }
 0x25c   : > { %567 = vrot.lane.b32.xlu0 %v2774_v46, %s2562_s29  ;;  %563 = vrot.lane.b32.xlu2 %v2772_v45, %s2562_s29 }
 0x25d   : > { %493 = vrot.lane.b32.xlu1 %v2772_v45, %s2561_s28 }
 0x264   : > { %633 = vrot.lane.b32.xlu0 %v2772_v45, %s4527_s30  ;;  %602 = vrot.lane.b32.xlu2 %v2774_v46, %s2564_s5 }
 0x265   : > { %532 = vrot.lane.b32.xlu1 %v2774_v46, %s2560_s27 }
 0x26c   : > { %672 = vrot.lane.b32.xlu0 %v2774_v46, %s2565_s6  ;;  %668 = vrot.lane.b32.xlu2 %v2772_v45, %s2565_s6 }
 0x26d   : > { %598 = vrot.lane.b32.xlu1 %v2772_v45, %s2564_s5 }
 0x274   : > { %738 = vrot.lane.b32.xlu0 %v2772_v45, %s4519_s7  ;;  %707 = vrot.lane.b32.xlu2 %v2774_v46, %s4525_s8 }
 0x275   : > { %637 = vrot.lane.b32.xlu1 %v2774_v46, %s4527_s30  ;;  %s4609_s30 = smov 34  }
 0x27c   : > { %777 = vrot.lane.b32.xlu0 %v2774_v46, %s4523_s9  ;;  %773 = vrot.lane.b32.xlu2 %v2772_v45, %s4523_s9  ;;  %s2601_s9 = smov 81  }
 0x27d   : > { %703 = vrot.lane.b32.xlu1 %v2772_v45, %s4525_s8  ;;  %s4550_s8 = smov 82  }
 0x284   : > { %843 = vrot.lane.b32.xlu0 %v2772_v45, %s4471_s10  ;;  %812 = vrot.lane.b32.xlu2 %v2774_v46, %s4469_s11 }
 0x285   : > { %742 = vrot.lane.b32.xlu1 %v2774_v46, %s4519_s7  ;;  %s2603_s7 = smov 80  }
 0x28c   : > { %882 = vrot.lane.b32.xlu0 %v2774_v46, %s4467_s12  ;;  %878 = vrot.lane.b32.xlu2 %v2772_v45, %s4467_s12  ;;  %s4481_s12 = smov 15  }
 0x28d   : > { %808 = vrot.lane.b32.xlu1 %v2772_v45, %s4469_s11  ;;  %s4517_s11 = smov 16  }
 0x294   : > { %948 = vrot.lane.b32.xlu0 %v2772_v45, %s4477_s13  ;;  %917 = vrot.lane.b32.xlu2 %v2774_v46, %s4475_s14 }
 0x295   : > { %847 = vrot.lane.b32.xlu1 %v2774_v46, %s4471_s10  ;;  %s4479_s10 = smov 14  }
 0x29c   : > { %987 = vrot.lane.b32.xlu0 %v2774_v46, %s4473_s20  ;;  %983 = vrot.lane.b32.xlu2 %v2772_v45, %s4473_s20  ;;  %s4485_s20 = smov 3  }
 0x29d   : > { %913 = vrot.lane.b32.xlu1 %v2772_v45, %s4475_s14  ;;  %s4487_s14 = smov 13  }
 0x2a4   : > { %1053 = vrot.lane.b32.xlu0 %v2772_v45, %s4481_s12  ;;  %1022 = vrot.lane.b32.xlu2 %v2774_v46, %s4517_s11 }
 0x2a5   : > { %952 = vrot.lane.b32.xlu1 %v2774_v46, %s4477_s13  ;;  %s4483_s13 = smov 2  }
 0x2a6   : > { %v2848_v47 = vpop.permute.xlu2 %458 }
 0x2ac   : > { %1092 = vrot.lane.b32.xlu0 %v2774_v46, %s4479_s10  ;;  %1088 = vrot.lane.b32.xlu2 %v2772_v45, %s4479_s10  ;;  %s4491_s10 = smov 127  }
 0x2ad   : > { %1018 = vrot.lane.b32.xlu1 %v2772_v45, %s4517_s11  ;;  %s2600_s11 = smov 83  }
 0x2ae   : > { %v2856_v48 = vpop.permute.xlu2 %497 }
 0x2b4   : > { %1158 = vrot.lane.b32.xlu0 %v2772_v45, %s4485_s20  ;;  %1127 = vrot.lane.b32.xlu2 %v2774_v46, %s4487_s14 }
 0x2b5   : > { %1057 = vrot.lane.b32.xlu1 %v2774_v46, %s4481_s12  ;;  %s4493_s12 = smov 1  }
 0x2b6   : > { %v2864_v49 = vpop.permute.xlu2 %563 }
 0x2bc   : > { %1197 = vrot.lane.b32.xlu0 %v2774_v46, %s4483_s13  ;;  %1193 = vrot.lane.b32.xlu2 %v2772_v45, %s4483_s13  ;;  %s4489_s13 = smov 126  }
 0x2bd   : > { %1123 = vrot.lane.b32.xlu1 %v2772_v45, %s4487_s14  ;;  %s4505_s14 = smov 125  }
 0x2be   : > { %v2872_v50 = vpop.permute.xlu0 %462  ;;  %v2874_v51 = vpop.permute.xlu2 %602 }
 0x2bf   : > { %v2876_v52 = vpop.permute.xlu1 %424  ;;  %v466_v34 = vsel %vm464_vm11, %v2848_v47, %v2872_v50  ;;  %v468_v27 = vsel %vm464_vm11, %v2872_v50, %v2848_v47 }
 0x2c4   : > { %1285 = vrot.lane.b32.xlu0 %v2772_v45, %s4491_s10  ;;  %1232 = vrot.lane.b32.xlu2 %v2774_v46, %s4493_s12 }
 0x2c5   : > { %1162 = vrot.lane.b32.xlu1 %v2774_v46, %s4485_s20  ;;  %s4497_s20 = smov 115  }
 0x2c6   : > { %v2884_v53 = vpop.permute.xlu0 %528  ;;  %v2886_v54 = vpop.permute.xlu2 %668 }
 0x2c7   : > { %v2888_v55 = vpop.permute.xlu1 %428 }
 0x2c8   : > { %v432_v50 = vsel %vm430_vm12, %v2876_v52, %v2888_v55  ;;  %v434_v42 = vsel %vm430_vm12, %v2888_v55, %v2876_v52  ;;  %v3117_v52 = vld [vmem:[%s4465_s3 + $0x80] ss:$8 sm:$0x3] }
 0x2cc   : > { %1324 = vrot.lane.b32.xlu0 %v2774_v46, %s4489_s13  ;;  %1320 = vrot.lane.b32.xlu2 %v2772_v45, %s4489_s13  ;;  %s4495_s13 = smov 114  }
 0x2cd   : > { %1228 = vrot.lane.b32.xlu1 %v2772_v45, %s4493_s12  ;;  %s4501_s12 = smov 113  }
 0x2ce   : > { %v2896_v56 = vpop.permute.xlu0 %567  ;;  %v2898_v57 = vpop.permute.xlu2 %707 }
 0x2cf   : > { %v2900_v58 = vpop.permute.xlu1 %493  ;;  %v573_v26 = vsel %vm569_vm13, %v2896_v56, %v2864_v49 }
 0x2d0   : > { %v590_v55 = vmul.f32 %v582_v44, %v573_v26  ;;  %v793_v26 = vperm.slane %v3112_v16, 1 }
 0x2d4   : > { %1390 = vrot.lane.b32.xlu0 %v2772_v45, %s4497_s20  ;;  %1359 = vrot.lane.b32.xlu2 %v2774_v46, %s4505_s14 }
 0x2d5   : > { %1289 = vrot.lane.b32.xlu1 %v2774_v46, %s4491_s10  ;;  %s4503_s10 = smov 112  }
 0x2d6   : > { %v2908_v59 = vpop.permute.xlu0 %633  ;;  %v2910_v60 = vpop.permute.xlu2 %773 }
 0x2d7   : > { %v2912_v61 = vpop.permute.xlu1 %532 }
 0x2dc   : > { %1429 = vrot.lane.b32.xlu0 %v2774_v46, %s4495_s13  ;;  %1425 = vrot.lane.b32.xlu2 %v2772_v45, %s4495_s13  ;;  %s4499_s13 = smov 111  }
 0x2dd   : > { %1355 = vrot.lane.b32.xlu1 %v2772_v45, %s4505_s14  ;;  %s4515_s14 = smov 98  }
 0x2de   : > { %v2920_v62 = vpop.permute.xlu0 %672  ;;  %v2922_v63 = vpop.permute.xlu2 %812 }
 0x2df   : > { %v2924_v0 = vpop.permute.xlu1 %598 }
 0x2e4   : > { %1495 = vrot.lane.b32.xlu0 %v2772_v45, %s4503_s10  ;;  %1464 = vrot.lane.b32.xlu2 %v2774_v46, %s4501_s12 }
 0x2e5   : > { %1394 = vrot.lane.b32.xlu1 %v2774_v46, %s4497_s20  ;;  %s4509_s20 = smov 109  }
 0x2e6   : > { %v2932_v1 = vpop.permute.xlu0 %738  ;;  %v2934_v6 = vpop.permute.xlu2 %878 }
 0x2e7   : > { %v2936_v7 = vpop.permute.xlu1 %637 }
 0x2e8   : > { %v641_v44 = vsel %vm639_vm2, %v2908_v59, %v2936_v7 }
 0x2ec   : > { %1534 = vrot.lane.b32.xlu0 %v2774_v46, %s4499_s13  ;;  %1530 = vrot.lane.b32.xlu2 %v2772_v45, %s4499_s13  ;;  %s4511_s13 = smov 110  }
 0x2ed   : > { %1460 = vrot.lane.b32.xlu1 %v2772_v45, %s4501_s12  ;;  %s4507_s12 = smov 99  }
 0x2ee   : > { %v2944_v8 = vpop.permute.xlu0 %777  ;;  %v2946_v9 = vpop.permute.xlu2 %917 }
 0x2ef   : > { %v2948_v10 = vpop.permute.xlu1 %703 }
 0x2f4   : > { %1600 = vrot.lane.b32.xlu0 %v2772_v45, %s4509_s20  ;;  %1569 = vrot.lane.b32.xlu2 %v2774_v46, %s4511_s13 }
 0x2f5   : > { %1499 = vrot.lane.b32.xlu1 %v2774_v46, %s4503_s10  ;;  %s4521_s10 = smov 97  }
 0x2f6   : > { %v2961_v18 = vpop.permute.xlu0 %843  ;;  %v2963_v19 = vpop.permute.xlu2 %983 }
 0x2f7   : > { %4590 = vst [vmem:[#allocation13_spill] sm:$0xff] %v2963_v19  ;;  %v2966_v21 = vpop.permute.xlu1 %742  ;;  %v792_v19 = vperm.slane %v3112_v16, 0  ;;  %v2300_v16 = vld [vmem:[%s4465_s3 + $0x81] ss:$8 sm:$0x3] }
 0x2fc   : > { %1639 = vrot.lane.b32.xlu0 %v2774_v46, %s4507_s12  ;;  %1635 = vrot.lane.b32.xlu2 %v2772_v45, %s4507_s12  ;;  %s4513_s12 = smov 96  }
 0x2fd   : > { %1565 = vrot.lane.b32.xlu1 %v2772_v45, %s4511_s13  ;;  %s2597_s13 = smov 95  }
 0x2fe   : > { %v2976_v25 = vpop.permute.xlu0 %882  ;;  %v2978_v29 = vpop.permute.xlu2 %1022 }
 0x2ff   : > { %v2980_v35 = vpop.permute.xlu1 %808 }
 0x304   : > { %1705 = vrot.lane.b32.xlu0 %v2772_v45, %s4521_s10  ;;  %1674 = vrot.lane.b32.xlu2 %v2774_v46, %s4515_s14 }
 0x305   : > { %1604 = vrot.lane.b32.xlu1 %v2774_v46, %s4509_s20  ;;  %s2596_s20 = smov 94  }
 0x306   : > { %v2988_v12 = vpop.permute.xlu0 %948  ;;  %v2990_v36 = vpop.permute.xlu2 %1088 }
 0x307   : > { %4591 = vst [vmem:[#allocation14_spill] sm:$0xff] %v2990_v36  ;;  %v2992_v13 = vpop.permute.xlu1 %847  ;;  %v3105_v36 = vmul.f32 %v477_v11, %v468_v27  ;;  %v503_v27 = vsel %vm499_vm14, %v2856_v48, %v2900_v58  ;;  %v451_v11 = vmul.f32 %v443_v14, %v432_v50  ;;  %v676_v14 = vsel %vm674_vm0, %v2886_v54, %v2920_v62 }
 0x30c   : > { %1744 = vrot.lane.b32.xlu0 %v2774_v46, %s4513_s12  ;;  %1740 = vrot.lane.b32.xlu2 %v2772_v45, %s4513_s12  ;;  %s4614_s12 = smov 30  }
 0x30d   : > { %1670 = vrot.lane.b32.xlu1 %v2772_v45, %s4515_s14  ;;  %s4556_s14 = smov 79  }
 0x30e   : > { %v3000_v40 = vpop.permute.xlu0 %987  ;;  %v3002_v41 = vpop.permute.xlu2 %1127 }
 0x30f   : > { %4592 = vst [vmem:[#allocation15_spill] sm:$0xff] %v3002_v41  ;;  %v3004_v43 = vpop.permute.xlu1 %913  ;;  %v617_v41 = vperm.slane %v3053_v24, 0  ;;  %v652_v24 = vperm.slane %v3065_v32, 0 }
 0x314   : > { %1810 = vrot.lane.b32.xlu0 %v2772_v45, %s2596_s20  ;;  %1779 = vrot.lane.b32.xlu2 %v2774_v46, %s2597_s13 }
 0x315   : > { %1709 = vrot.lane.b32.xlu1 %v2774_v46, %s4521_s10  ;;  %s2598_s10 = smov 93  }
 0x316   : > { %v3017_v20 = vpop.permute.xlu0 %1053  ;;  %v3019_v22 = vpop.permute.xlu2 %1193 }
 0x317   : > { %v3027_v30 = vpop.permute.xlu1 %952 }
 0x31c   : > { %1849 = vrot.lane.b32.xlu0 %v2774_v46, %s2598_s10  ;;  %1845 = vrot.lane.b32.xlu2 %v2772_v45, %s2598_s10 }
 0x31d   : > { %1775 = vrot.lane.b32.xlu1 %v2772_v45, %s2597_s13 }
 0x31e   : > { %v3079_v31 = vpop.permute.xlu0 %1092  ;;  %v3081_v33 = vpop.permute.xlu2 %1232 }
 0x31f   : > { %4595 = vst [vmem:[#allocation18_spill] sm:$0xff] %v3079_v31  ;;  %v3090_v47 = vpop.permute.xlu1 %1018  ;;  %v3107_v31 = vmul.f32 %v478_v37, %v466_v34  ;;  %v653_v34 = vperm.slane %v3065_v32, 1  ;;  %v520_v32 = vmul.f32 %v512_v17, %v503_v27  ;;  %v643_v27 = vsel %vm639_vm2, %v2936_v7, %v2908_v59 }
 0x320   : > { %4596 = vst [vmem:[#allocation19_spill] sm:$0xff] %v3081_v33  ;;  %v571_v33 = vsel %vm569_vm13, %v2864_v49, %v2896_v56  ;;  %v501_v49 = vsel %vm499_vm14, %v2900_v58, %v2856_v48  ;;  %v450_v56 = vmul.f32 %v442_v39, %v434_v42  ;;  %v538_v48 = vsel %vm534_vm15, %v2912_v61, %v2884_v53 }
 0x321   : > { %v591_v37 = vmul.f32 %v583_v15, %v571_v33  ;;  %v521_v33 = vmul.f32 %v513_v3, %v501_v49  ;;  %v723_v58 = vperm.slane %v3117_v52, 1  ;;  %v536_v3 = vsel %vm534_vm15, %v2884_v53, %v2912_v61 }
 0x322   : > { %v3147_v39 = vadd.f32 %v590_v55, %v450_v56  ;;  %v678_v15 = vsel %vm674_vm0, %v2920_v62, %v2886_v54  ;;  %v606_v53 = vsel %vm604_vm1, %v2924_v0, %v2874_v51  ;;  %v608_v61 = vsel %vm604_vm1, %v2874_v51, %v2924_v0  ;;  %v3179_v54 = vld [vmem:[%s4465_s3 + $0x85] ss:$8 sm:$0x3] }
 0x323   : > { %v3165_v42 = vadd.f32 %v591_v37, %v451_v11  ;;  %v4598_v55 = vperm.slane %v3039_v38, 0  ;;  %v757_v56 = vperm.slane %v2300_v16, 0  ;;  %v758_v11 = vperm.slane %v2300_v16, 1  ;;  %v3196_v38 = vld [vmem:[%s4465_s3 + $0x83] ss:$8 sm:$0x3] }
 0x324   : > { %1915 = vrot.lane.b32.xlu0 %v2772_v45, %s4550_s8  ;;  %1884 = vrot.lane.b32.xlu2 %v2774_v46, %s2600_s11  ;;  %4597 = vst [vmem:[#allocation20_spill] sm:$0xff] %v3147_v39  ;;  %v556_v51 = vmul.f32 %v548_v4, %v536_v3  ;;  %v695_v0 = vmul.f32 %v687_v5, %v678_v15  ;;  %v897_v39 = vperm.slane %v3179_v54, 0  ;;  %v898_v4 = vperm.slane %v3179_v54, 1  ;;  %v3222_v16 = vld [vmem:[%s4465_s3 + $0x84] ss:$8 sm:$0x3] }
 0x325   : > { %1814 = vrot.lane.b32.xlu1 %v2774_v46, %s2596_s20  ;;  %v555_v49 = vmul.f32 %v4598_v55, %v538_v48  ;;  %v696_v37 = vmul.f32 %v688_v2, %v676_v14  ;;  %v625_v48 = vmul.f32 %v617_v41, %v608_v61  ;;  %v626_v55 = vmul.f32 %v618_v23, %v606_v53  ;;  %v3244_v61 = vld [vmem:[%s4465_s3 + $0x90] ss:$8 sm:$0x3]  ;;  %v2334_v54 = vld [vmem:[%s4465_s3 + $0xa2] ss:$8 sm:$0x3] }
 0x326   : > { %v3161_v17 = vpop.permute.xlu0 %1158  ;;  %v3163_v50 = vpop.permute.xlu2 %1320  ;;  %v660_v5 = vmul.f32 %v652_v24, %v643_v27  ;;  %v781_v2 = vsel %vm4547_vm3, %v2910_v60, %v2944_v8  ;;  %v783_v59 = vsel %vm4547_vm3, %v2944_v8, %v2910_v60  ;;  %v661_v7 = vmul.f32 %v653_v34, %v641_v44 }
 0x327   : > { %v3181_v62 = vpop.permute.xlu1 %1057  ;;  %v711_v41 = vsel %vm709_vm4, %v2948_v10, %v2898_v57  ;;  %v748_v23 = vsel %vm4549_vm5, %v2966_v21, %v2932_v1  ;;  %v827_v24 = vperm.slane %v3196_v38, 0  ;;  %v3228_v60 = vadd.f32 %v695_v0, %v555_v49 }
 0x328   : > { %v3230_v8 = vadd.f32 %v696_v37, %v556_v51  ;;  %v746_v34 = vsel %vm4549_vm5, %v2932_v1, %v2966_v21  ;;  %v828_v44 = vperm.slane %v3196_v38, 1  ;;  %v629_v3 = vadd.f32 %v625_v48, %v3105_v36  ;;  %v2310_v1 = vld [vmem:[%s4465_s3 + $0x86] ss:$8 sm:$0x3] }
 0x329   : > { %v630_v14 = vadd.f32 %v626_v55, %v3107_v31  ;;  %v800_v15 = vmul.f32 %v792_v19, %v783_v59  ;;  %v801_v53 = vmul.f32 %v793_v26, %v781_v2  ;;  %v713_v31 = vsel %vm709_vm4, %v2898_v57, %v2948_v10  ;;  %v3264_v55 = vld [vmem:[%s4465_s3 + $0x87] ss:$8 sm:$0x3] }
 0x32a   : > { %v731_v19 = vmul.f32 %v723_v58, %v711_v41  ;;  %v765_v36 = vmul.f32 %v757_v56, %v748_v23  ;;  %v862_v26 = vperm.slane %v3222_v16, 0  ;;  %v664_v51 = vadd.f32 %v660_v5, %v520_v32  ;;  %v3276_v5 = vld [vmem:[%s4465_s3 + $0x93] ss:$8 sm:$0x3] }
 0x32b   : > { %v665_v0 = vadd.f32 %v661_v7, %v521_v33  ;;  %v766_v37 = vmul.f32 %v758_v11, %v746_v34  ;;  %v863_v48 = vperm.slane %v3222_v16, 1  ;;  %v1002_v2 = vperm.slane %v3244_v61, 0  ;;  %v2328_v16 = vld [vmem:[%s4465_s3 + $0x97] ss:$8 sm:$0x3] }
 0x32c   : > { %1954 = vrot.lane.b32.xlu0 %v2774_v46, %s2601_s9  ;;  %1950 = vrot.lane.b32.xlu2 %v2772_v45, %s2601_s9  ;;  %v1003_v57 = vperm.slane %v3244_v61, 1  ;;  %v932_v10 = vperm.slane %v2310_v1, 0  ;;  %v804_v58 = vadd.f32 %v800_v15, %v664_v51  ;;  %v4599_v32 = vperm.slane %v3117_v52, 0  ;;  %v2318_v52 = vld [vmem:[%s4465_s3 + $0x92] ss:$8 sm:$0x3] }
 0x32d   : > { %1880 = vrot.lane.b32.xlu1 %v2772_v45, %s2600_s11  ;;  %v805_v56 = vadd.f32 %v801_v53, %v665_v0  ;;  %v933_v11 = vperm.slane %v2310_v1, 1  ;;  %v3279_v59 = vadd.f32 %v731_v19, %v3165_v42  ;;  %v769_v7 = vadd.f32 %v765_v36, %v629_v3  ;;  %v2326_v53 = vld [vmem:[%s4465_s3 + $0x96] ss:$8 sm:$0x3] }
 0x32e   : > { %v3249_v21 = vpop.permute.xlu0 %1197  ;;  %v3251_v49 = vpop.permute.xlu2 %1359  ;;  %v3271_v33 = vmul.f32 %v4599_v32, %v713_v31  ;;  %v967_v41 = vperm.slane %v3264_v55, 0  ;;  %v968_v23 = vperm.slane %v3264_v55, 1  ;;  %v770_v34 = vadd.f32 %v766_v37, %v630_v14  ;;  %v2338_v61 = vld [vmem:[%s4465_s3 + $0xa4] ss:$8 sm:$0x3] }
 0x32f   : > { %v3258_v27 = vpop.permute.xlu1 %1123  ;;  %v921_v15 = vsel %vm4545_vm8, %v3004_v43, %v2946_v9  ;;  %v923_v42 = vsel %vm4545_vm8, %v2946_v9, %v3004_v43  ;;  %v886_v3 = vsel %vm4544_vm6, %v2934_v6, %v2976_v25  ;;  %v888_v9 = vsel %vm4544_vm6, %v2976_v25, %v2934_v6 }
 0x330   : > { %v816_v43 = vsel %vm4548_vm7, %v2980_v35, %v2922_v63  ;;  %v1107_v14 = vperm.slane %v3276_v5, 0  ;;  %v818_v1 = vsel %vm4548_vm7, %v2922_v63, %v2980_v35  ;;  %v1072_v6 = vperm.slane %v2318_v52, 0 }
 0x331   : > { %v1073_v25 = vperm.slane %v2318_v52, 1  ;;  %vm4552_vm6 = vcmp.lt.s32.totalorder %v2730_v28, 2  ;;  %v940_v36 = vmul.f32 %v932_v10, %v923_v42  ;;  %v941_v51 = vmul.f32 %v933_v11, %v921_v15  ;;  %v2316_v10 = vld [vmem:[%s4465_s3 + $0x91] ss:$8 sm:$0x3] }
 0x332   : > { %v1061_v0 = vsel %vm4546_vm9, %v3017_v20, %v3181_v62  ;;  %v1063_v63 = vsel %vm4546_vm9, %v3181_v62, %v3017_v20  ;;  %v905_v37 = vmul.f32 %v897_v39, %v888_v9  ;;  %vm954_vm8 = vcmp.lt.s32.totalorder %v2730_v28, 18 }
 0x333   : > { %v1108_v32 = vperm.slane %v3276_v5, 1  ;;  %v1212_v11 = vperm.slane %v2326_v53, 0  ;;  %v1213_v52 = vperm.slane %v2326_v53, 1  ;;  %v906_v15 = vmul.f32 %v898_v4, %v886_v3 }
 0x334   : > { %2020 = vrot.lane.b32.xlu0 %v2772_v45, %s4556_s14  ;;  %1989 = vrot.lane.b32.xlu2 %v2774_v46, %s2603_s7  ;;  %v835_v20 = vmul.f32 %v827_v24, %v818_v1  ;;  %vm989_vm9 = vcmp.lt.s32.totalorder %v2730_v28, 17  ;;  %v1201_v39 = vsel %vm4552_vm6, %v3019_v22, %v3249_v21  ;;  %v1203_v62 = vsel %vm4552_vm6, %v3249_v21, %v3019_v22 }
 0x335   : > { %1919 = vrot.lane.b32.xlu1 %v2774_v46, %s4550_s8  ;;  %v836_v4 = vmul.f32 %v828_v44, %v816_v43  ;;  %vm4555_vm3 = vcmp.lt.s32.totalorder %v2730_v28, 16  ;;  %v1080_v24 = vmul.f32 %v1072_v6, %v1063_v63  ;;  %v1081_v42 = vmul.f32 %v1073_v25, %v1061_v0  ;;  %s4558_s8 = smov 78  }
 0x336   : > { %v3323_v31 = vpop.permute.xlu0 %1285  ;;  %v3325_v19 = vpop.permute.xlu2 %1425  ;;  %v944_v3 = vadd.f32 %v940_v36, %v804_v58  ;;  %v945_v9 = vadd.f32 %v941_v51, %v805_v56  ;;  %vm1094_vm7 = vcmp.lt.s32.totalorder %v2730_v28, 14  ;;  %v1037_v53 = vperm.slane %v2316_v10, 0  ;;  %v2324_v51 = vld [vmem:[%s4465_s3 + $0x95] ss:$8 sm:$0x3] }
 0x337   : > { %v1163_v35 = vpop.permute.xlu1 %1162  ;;  %vm4553_vm5 = vcmp.lt.s32.totalorder %v2730_v28, 126  ;;  %v1220_v1 = vmul.f32 %v1212_v11, %v1203_v62  ;;  %v1221_v22 = vmul.f32 %v1213_v52, %v1201_v39  ;;  %v1339_v38 = vperm.slane %v2334_v54, 0 }
 0x338   : > { %v1340_v44 = vperm.slane %v2334_v54, 1  ;;  %v909_v21 = vadd.f32 %v905_v37, %v769_v7  ;;  %v910_v43 = vadd.f32 %v906_v15, %v770_v34  ;;  %v3368_v58 = vadd.f32 %v835_v20, %v3228_v60 }
 0x339   : > { %v1038_v56 = vperm.slane %v2316_v10, 1  ;;  %v3373_v6 = vadd.f32 %v836_v4, %v3230_v8  ;;  %v1084_v25 = vadd.f32 %v1080_v24, %v944_v3  ;;  %v1085_v36 = vadd.f32 %v1081_v42, %v945_v9  ;;  %v2332_v24 = vld [vmem:[%s4465_s3 + $0xa1] ss:$8 sm:$0x3] }
 0x33a   : > { %vm4554_vm6 = vcmp.lt.s32.totalorder %v2730_v28, 3  ;;  %v1026_v60 = vsel %vm4555_vm3, %v3090_v47, %v2978_v29  ;;  %v1028_v8 = vsel %vm4555_vm3, %v2978_v29, %v3090_v47  ;;  %v851_v20 = vsel %vm849_vm10, %v2961_v18, %v2992_v13  ;;  %v4600_v9 = vld [vmem:[#allocation13_spill] sm:$0xff] }
 0x33b   : > { %v1224_v10 = vadd.f32 %v1220_v1, %v1084_v25  ;;  %v1225_v11 = vadd.f32 %v1221_v22, %v1085_v36  ;;  %v853_v29 = vsel %vm849_vm10, %v2992_v13, %v2961_v18  ;;  %v1177_v47 = vperm.slane %v2324_v51, 0  ;;  %v4601_v22 = vld [vmem:[#allocation16_spill] sm:$0xff] }
 0x33c   : > { %2059 = vrot.lane.b32.xlu0 %v2774_v46, %s4558_s8  ;;  %2055 = vrot.lane.b32.xlu2 %v2772_v45, %s4558_s8  ;;  %v1178_v39 = vperm.slane %v2324_v51, 1  ;;  %v1168_v62 = vsel %vm4554_vm6, %v1163_v35, %v3161_v17  ;;  %v956_v18 = vsel %vm954_vm8, %v2988_v12, %v3027_v30  ;;  %v958_v13 = vsel %vm954_vm8, %v3027_v30, %v2988_v12  ;;  %s4619_s8 = smov 14  }
 0x33d   : > { %1985 = vrot.lane.b32.xlu1 %v2772_v45, %s2603_s7  ;;  %v1045_v42 = vmul.f32 %v1037_v53, %v1028_v8  ;;  %v3430_v3 = vmul.f32 %v863_v48, %v851_v20  ;;  %v3436_v1 = vsel %vm989_vm9, %v4600_v9, %v3000_v40  ;;  %v1185_v12 = vmul.f32 %v1177_v47, %v1168_v62 }
 0x33e   : > { %v1325_v7 = vpop.permute.xlu0 %1324  ;;  %v3379_v34 = vpop.permute.xlu2 %1464  ;;  %v1305_v48 = vperm.slane %v2332_v24, 1  ;;  %v975_v53 = vmul.f32 %v967_v41, %v958_v13  ;;  %vm4561_vm3 = vcmp.lt.s32.totalorder %v2730_v28, 1  ;;  %v1248_v8 = vperm.slane %v2328_v16, 1 }
 0x33f   : > { %v1328_v0 = vsel %vm4553_vm5, %v3163_v50, %v1325_v7  ;;  %v1330_v63 = vsel %vm4553_vm5, %v1325_v7, %v3163_v50  ;;  %v1229_v37 = vpop.permute.xlu1 %1228  ;;  %v1166_v50 = vsel %vm4554_vm6, %v3161_v17, %v1163_v35  ;;  %v1046_v17 = vmul.f32 %v1038_v56, %v1026_v60  ;;  %v4603_v56 = vld [vmem:[#allocation14_spill] sm:$0xff] }
 0x340   : > { %v1347_v52 = vmul.f32 %v1339_v38, %v1328_v0  ;;  %v1348_v15 = vmul.f32 %v1340_v44, %v1330_v63  ;;  %v3426_v35 = vmul.f32 %v862_v26, %v853_v29  ;;  %vm4560_vm5 = vcmp.lt.s32.totalorder %v2730_v28, 127  ;;  %v4602_v44 = vld [vmem:[#allocation18_spill] sm:$0xff]  ;;  %v4604_v29 = vld [vmem:[#allocation19_spill] sm:$0xff] }
 0x341   : > { %v1186_v30 = vmul.f32 %v1178_v39, %v1166_v50  ;;  %v1304_v26 = vperm.slane %v2332_v24, 0  ;;  %v976_v38 = vmul.f32 %v968_v23, %v956_v18  ;;  %v1096_v25 = vsel %vm1094_vm7, %v4603_v56, %v4602_v44  ;;  %v2336_v39 = vld [vmem:[%s4465_s3 + $0xa3] ss:$8 sm:$0x3] }
 0x342   : > { %v3409_v54 = vadd.f32 %v1347_v52, %v1224_v10  ;;  %v3411_v4 = vadd.f32 %v1348_v15, %v1225_v11  ;;  %vm1129_vm6 = vcmp.lt.s32.totalorder %v2730_v28, 13  ;;  %v1098_v7 = vsel %vm1094_vm7, %v4602_v44, %v4603_v56  ;;  %v4605_v18 = vld [vmem:[#allocation17_spill] sm:$0xff] }
 0x343   : > { %v1049_v41 = vadd.f32 %v1045_v42, %v909_v21  ;;  %v1050_v60 = vadd.f32 %v1046_v17, %v910_v43  ;;  %v1247_v23 = vperm.slane %v2328_v16, 0  ;;  %v2340_v21 = vld [vmem:[%s4465_s3 + $0xa5] ss:$8 sm:$0x3]  ;;  %v979_v43 = vadd.f32 %v975_v53, %v3368_v58 }
 0x344   : > { %456 = vrot.lane.b32.xlu0 %v4601_v22, %s2558_s22  ;;  %422 = vrot.lane.b32.xlu2 %v4601_v22, %s2559_s23  ;;  %v1115_v20 = vmul.f32 %v1107_v14, %v1098_v7  ;;  %v1236_v47 = vsel %vm4561_vm3, %v1229_v37, %v4604_v29  ;;  %v980_v50 = vadd.f32 %v976_v38, %v3373_v6  ;;  %v2322_v14 = vld [vmem:[%s4465_s3 + $0x94] ss:$8 sm:$0x3]  ;;  %v1445_v13 = vperm.slane %v2340_v21, 1 }
 0x345   : > { %2024 = vrot.lane.b32.xlu1 %v2774_v46, %s4556_s14  ;;  %v1189_v10 = vadd.f32 %v1185_v12, %v1049_v41  ;;  %v1190_v11 = vadd.f32 %v1186_v30, %v1050_v60  ;;  %v1116_v58 = vmul.f32 %v1108_v32, %v1096_v25  ;;  %v1256_v32 = vmul.f32 %v1248_v8, %v1236_v47  ;;  %v4606_v38 = vld [vmem:[#allocation15_spill] sm:$0xff]  ;;  %s4612_s14 = smov 31  }
 0x346   : > { %v3457_v36 = vpop.permute.xlu0 %1390  ;;  %v3459_v51 = vpop.permute.xlu2 %1530  ;;  %v1374_v6 = vperm.slane %v2336_v39, 0  ;;  %v1375_v42 = vperm.slane %v2336_v39, 1  ;;  %v993_v17 = vsel %vm989_vm9, %v3000_v40, %v4600_v9  ;;  %v1119_v12 = vadd.f32 %v1115_v20, %v979_v43 }
 0x347   : > { %v1290_v55 = vpop.permute.xlu1 %1289  ;;  %v1142_v30 = vperm.slane %v2322_v14, 0  ;;  %v1143_v16 = vperm.slane %v2322_v14, 1  ;;  %v1120_v53 = vadd.f32 %v1116_v58, %v980_v50  ;;  %v1131_v44 = vsel %vm1129_vm6, %v3258_v27, %v4606_v38 }
 0x348   : > { %v1293_v0 = vsel %vm4560_vm5, %v3323_v31, %v1290_v55  ;;  %v1295_v63 = vsel %vm4560_vm5, %v1290_v55, %v3323_v31  ;;  %v1238_v31 = vsel %vm4561_vm3, %v4604_v29, %v1229_v37  ;;  %vm4562_vm5 = vcmp.lt.s32.totalorder %v2730_v28, 114 }
 0x349   : > { %v1312_v52 = vmul.f32 %v1304_v26, %v1293_v0  ;;  %v1313_v15 = vmul.f32 %v1305_v48, %v1295_v63  ;;  %v1444_v37 = vperm.slane %v2340_v21, 0  ;;  %vm4564_vm3 = vcmp.lt.s32.totalorder %v2730_v28, 125 }
 0x34a   : > { %v1255_v5 = vmul.f32 %v1247_v23, %v1238_v31  ;;  %v1260_v23 = vadd.f32 %v1256_v32, %v1120_v53  ;;  %v1011_v63 = vmul.f32 %v1003_v57, %v3436_v1  ;;  %v2330_v57 = vld [vmem:[%s4465_s3 + $0xa0] ss:$8 sm:$0x3]  ;;  %v1151_v1 = vmul.f32 %v1143_v16, %v1131_v44 }
 0x34b   : > { %v1316_v62 = vadd.f32 %v1312_v52, %v1189_v10  ;;  %v1317_v24 = vadd.f32 %v1313_v15, %v1190_v11  ;;  %v4607_v52 = vld [vmem:[#allocation20_spill] sm:$0xff]  ;;  %v1010_v15 = vmul.f32 %v1002_v2, %v993_v17  ;;  %v1270_v29 = vperm.slane %v2330_v57, 1 }
 0x34c   : > { %495 = vrot.lane.b32.xlu0 %v4605_v18, %s2561_s28  ;;  %426 = vrot.lane.b32.xlu2 %v4605_v18, %s2559_s23  ;;  %v1259_v55 = vadd.f32 %v1255_v5, %v1119_v12  ;;  %v1269_v31 = vperm.slane %v2330_v57, 0  ;;  %v1409_v39 = vperm.slane %v2338_v61, 0  ;;  %v1410_v50 = vperm.slane %v2338_v61, 1  ;;  %v2342_v5 = vld [vmem:[%s4465_s3 + $0xa6] ss:$8 sm:$0x3] }
 0x34d   : > { %460 = vrot.lane.b32.xlu1 %v4605_v18, %s2558_s22  ;;  %v1479_v16 = vperm.slane %v2342_v5, 0  ;;  %s4608_s23 = smov 45   ;;  %s4610_s22 = smov 32  }
 0x34e   : > { %v1430_v26 = vpop.permute.xlu0 %1429  ;;  %v3505_v48 = vpop.permute.xlu2 %1569  ;;  %v1277_v32 = vmul.f32 %v1269_v31, %v2772_v45 }
 0x34f   : > { %v1433_v56 = vsel %vm4562_vm5, %v3325_v19, %v1430_v26  ;;  %v1435_v40 = vsel %vm4562_vm5, %v1430_v26, %v3325_v19  ;;  %v1356_v9 = vpop.permute.xlu1 %1355  ;;  %v1133_v19 = vsel %vm1129_vm6, %v4606_v38, %v3258_v27  ;;  %v875_v27 = vadd.f32 %v3430_v3, %v3279_v59 }
 0x350   : > { %v1452_v25 = vmul.f32 %v1444_v37, %v1433_v56  ;;  %v1453_v7 = vmul.f32 %v1445_v13, %v1435_v40  ;;  %v1363_v41 = vsel %vm4564_vm3, %v1356_v9, %v3251_v49  ;;  %v1365_v60 = vsel %vm4564_vm3, %v3251_v49, %v1356_v9  ;;  %v2346_v37 = vld [vmem:[%s4465_s3 + $0xb0] ss:$8 sm:$0x3] }
 0x351   : > { %v1382_v8 = vmul.f32 %v1374_v6, %v1363_v41  ;;  %v1383_v0 = vmul.f32 %v1375_v42, %v1365_v60  ;;  %v734_v49 = vadd.f32 %v3271_v33, %v4607_v52  ;;  %v1150_v33 = vmul.f32 %v1142_v30, %v1133_v19 }
 0x352   : > { %v3530_v10 = vadd.f32 %v1452_v25, %v1316_v62  ;;  %v3532_v11 = vadd.f32 %v1453_v7, %v1317_v24  ;;  %vm4563_vm5 = vcmp.lt.s32.totalorder %v2730_v28, 115  ;;  %v1015_v59 = vadd.f32 %v1011_v63, %v875_v27 }
 0x353   : > { %v3538_v21 = vadd.f32 %v1382_v8, %v1259_v55  ;;  %v3540_v43 = vadd.f32 %v1383_v0, %v1260_v23  ;;  %v874_v2 = vadd.f32 %v3426_v35, %v734_v49  ;;  %v1278_v13 = vmul.f32 %v1270_v29, %v2774_v46 }
 0x354   : > { %561 = vrot.lane.b32.xlu0 %v4601_v22, %s2562_s29  ;;  %491 = vrot.lane.b32.xlu2 %v4601_v22, %s2561_s28  ;;  %v1155_v14 = vadd.f32 %v1151_v1, %v1015_v59  ;;  %v1550_v12 = vperm.slane %v2346_v37, 1  ;;  %vm4567_vm3 = vcmp.lt.s32.totalorder %v2730_v28, 113  ;;  %v1480_v26 = vperm.slane %v2342_v5, 1  ;;  %s4616_s28 = smov 17  }
 0x355   : > { %526 = vrot.lane.b32.xlu1 %v4601_v22, %s2560_s27  ;;  %v1014_v47 = vadd.f32 %v1010_v15, %v874_v2  ;;  %v2352_v2 = vld [vmem:[%s4465_s3 + $0xb3] ss:$8 sm:$0x3] }
 0x356   : > { %v1496_v3 = vpop.permute.xlu0 %1495  ;;  %v3558_v20 = vpop.permute.xlu2 %1635  ;;  %v1282_v17 = vadd.f32 %v1278_v13, %v1155_v14 }
 0x357   : > { %v1395_v58 = vpop.permute.xlu1 %1394  ;;  %v1154_v24 = vadd.f32 %v1150_v33, %v1014_v47  ;;  %v2348_v33 = vld [vmem:[%s4465_s3 + $0xb1] ss:$8 sm:$0x3]  ;;  %v1655_v47 = vperm.slane %v2352_v2, 1 }
 0x358   : > { %v1398_v35 = vsel %vm4563_vm5, %v3457_v36, %v1395_v58  ;;  %v1400_v62 = vsel %vm4563_vm5, %v1395_v58, %v3457_v36  ;;  %vm4565_vm5 = vcmp.lt.s32.totalorder %v2730_v28, 111  ;;  %v1549_v36 = vperm.slane %v2346_v37, 0 }
 0x359   : > { %v1417_v6 = vmul.f32 %v1409_v39, %v1398_v35  ;;  %v1418_v42 = vmul.f32 %v1410_v50, %v1400_v62  ;;  %v1281_v30 = vadd.f32 %v1277_v32, %v1154_v24  ;;  %v1584_v31 = vperm.slane %v2348_v33, 0 }
 0x35a   : > { %v1585_v39 = vperm.slane %v2348_v33, 1 }
 0x35b   : > { %v1421_v44 = vadd.f32 %v1417_v6, %v1281_v30  ;;  %v1422_v56 = vadd.f32 %v1418_v42, %v1282_v17 }
 0x35c   : > { %600 = vrot.lane.b32.xlu0 %v4605_v18, %s2564_s5  ;;  %530 = vrot.lane.b32.xlu2 %v4605_v18, %s2560_s27  ;;  %s4611_s27 = smov 33  }
 0x35d   : > { %565 = vrot.lane.b32.xlu1 %v4605_v18, %s2562_s29  ;;  %s4618_s29 = smov 16  }
 0x35e   : > { %v1535_v53 = vpop.permute.xlu0 %1534  ;;  %v3582_v38 = vpop.permute.xlu2 %1674 }
 0x35f   : > { %v1538_v40 = vsel %vm4565_vm5, %v3459_v51, %v1535_v53  ;;  %v1540_v9 = vsel %vm4565_vm5, %v1535_v53, %v3459_v51  ;;  %v1461_v25 = vpop.permute.xlu1 %1460  ;;  %v2344_v51 = vld [vmem:[%s4465_s3 + $0xa7] ss:$8 sm:$0x3]  ;;  %vm4566_vm5 = vcmp.lt.s32.totalorder %v2730_v28, 112 }
 0x360   : > { %v1557_v7 = vmul.f32 %v1549_v36, %v1538_v40  ;;  %v1558_v41 = vmul.f32 %v1550_v12, %v1540_v9  ;;  %v1468_v60 = vsel %vm4567_vm3, %v1461_v25, %v3379_v34  ;;  %v1470_v55 = vsel %vm4567_vm3, %v3379_v34, %v1461_v25 }
 0x361   : > { %v1487_v23 = vmul.f32 %v1479_v16, %v1468_v60  ;;  %v1488_v8 = vmul.f32 %v1480_v26, %v1470_v55  ;;  %v1514_v34 = vperm.slane %v2344_v51, 0  ;;  %v1515_v49 = vperm.slane %v2344_v51, 1 }
 0x362   : > { %v3596_v0 = vadd.f32 %v1557_v7, %v1421_v44  ;;  %v3598_v63 = vadd.f32 %v1558_v41, %v1422_v56  ;;  %vm4570_vm3 = vcmp.lt.s32.totalorder %v2730_v28, 110  ;;  %v2358_v44 = vld [vmem:[%s4465_s3 + $0xb6] ss:$8 sm:$0x3] }
 0x363   : > { %v1491_v19 = vadd.f32 %v1487_v23, %v3409_v54  ;;  %v1492_v52 = vadd.f32 %v1488_v8, %v3411_v4  ;;  %v2354_v56 = vld [vmem:[%s4465_s3 + $0xb4] ss:$8 sm:$0x3]  ;;  %v1759_v25 = vperm.slane %v2358_v44, 0  ;;  %v1760_v7 = vperm.slane %v2358_v44, 1 }
 0x364   : > { %666 = vrot.lane.b32.xlu0 %v4601_v22, %s2565_s6  ;;  %596 = vrot.lane.b32.xlu2 %v4601_v22, %s2564_s5  ;;  %v1689_v41 = vperm.slane %v2354_v56, 0  ;;  %v1690_v60 = vperm.slane %v2354_v56, 1  ;;  %s4615_s5 = smov 19  }
 0x365   : > { %631 = vrot.lane.b32.xlu1 %v4601_v22, %s4608_s23 }
 0x366   : > { %v1601_v15 = vpop.permute.xlu0 %1600  ;;  %v3612_v57 = vpop.permute.xlu2 %1740 }
 0x367   : > { %v1500_v27 = vpop.permute.xlu1 %1499 }
 0x368   : > { %v1503_v54 = vsel %vm4566_vm5, %v1496_v3, %v1500_v27  ;;  %v1505_v4 = vsel %vm4566_vm5, %v1500_v27, %v1496_v3  ;;  %vm4568_vm5 = vcmp.lt.s32.totalorder %v2730_v28, 99  ;;  %v1654_v3 = vperm.slane %v2352_v2, 0 }
 0x369   : > { %v1522_v1 = vmul.f32 %v1514_v34, %v1503_v54  ;;  %v1523_v61 = vmul.f32 %v1515_v49, %v1505_v4 }
 0x36b   : > { %v1526_v59 = vadd.f32 %v1522_v1, %v3538_v21  ;;  %v1527_v29 = vadd.f32 %v1523_v61, %v3540_v43 }
 0x36c   : > { %705 = vrot.lane.b32.xlu0 %v4605_v18, %s4609_s30  ;;  %635 = vrot.lane.b32.xlu2 %v4605_v18, %s4608_s23  ;;  %s4622_s23 = smov 2  }
 0x36d   : > { %670 = vrot.lane.b32.xlu1 %v4605_v18, %s2565_s6  ;;  %s4613_s6 = smov 29  }
 0x36e   : > { %v1640_v21 = vpop.permute.xlu0 %1639  ;;  %v3634_v50 = vpop.permute.xlu2 %1779 }
 0x36f   : > { %v1643_v43 = vsel %vm4568_vm5, %v3558_v20, %v1640_v21  ;;  %v1645_v58 = vsel %vm4568_vm5, %v1640_v21, %v3558_v20  ;;  %v1566_v14 = vpop.permute.xlu1 %1565  ;;  %v2350_v20 = vld [vmem:[%s4465_s3 + $0xb2] ss:$8 sm:$0x3]  ;;  %vm4569_vm5 = vcmp.lt.s32.totalorder %v2730_v28, 109 }
 0x370   : > { %v1662_v35 = vmul.f32 %v1654_v3, %v1643_v43  ;;  %v1663_v62 = vmul.f32 %v1655_v47, %v1645_v58  ;;  %v1573_v24 = vsel %vm4570_vm3, %v1566_v14, %v3505_v48  ;;  %v1575_v37 = vsel %vm4570_vm3, %v3505_v48, %v1566_v14  ;;  %v2360_v21 = vld [vmem:[%s4465_s3 + $0xb7] ss:$8 sm:$0x3] }
 0x371   : > { %v1592_v13 = vmul.f32 %v1584_v31, %v1573_v24  ;;  %v1593_v5 = vmul.f32 %v1585_v39, %v1575_v37  ;;  %v1619_v48 = vperm.slane %v2350_v20, 0  ;;  %v1620_v36 = vperm.slane %v2350_v20, 1  ;;  %v2364_v39 = vld [vmem:[%s4465_s3 + $0xc1] ss:$8 sm:$0x3] }
 0x372   : > { %v3648_v32 = vadd.f32 %v1662_v35, %v1526_v59  ;;  %v3650_v6 = vadd.f32 %v1663_v62, %v1527_v29  ;;  %vm4573_vm3 = vcmp.lt.s32.totalorder %v2730_v28, 98  ;;  %v1864_v14 = vperm.slane %v2364_v39, 0 }
 0x373   : > { %v1596_v42 = vadd.f32 %v1592_v13, %v3530_v10  ;;  %v1597_v17 = vadd.f32 %v1593_v5, %v3532_v11  ;;  %v1865_v35 = vperm.slane %v2364_v39, 1  ;;  %v1794_v62 = vperm.slane %v2360_v21, 0 }
 0x374   : > { %771 = vrot.lane.b32.xlu0 %v4601_v22, %s4610_s22  ;;  %701 = vrot.lane.b32.xlu2 %v4601_v22, %s4609_s30  ;;  %v1795_v24 = vperm.slane %v2360_v21, 1  ;;  %s4617_s30 = smov 18  }
 0x375   : > { %736 = vrot.lane.b32.xlu1 %v4601_v22, %s4611_s27 }
 0x376   : > { %v1706_v12 = vpop.permute.xlu0 %1705  ;;  %v3664_v30 = vpop.permute.xlu2 %1845 }
 0x377   : > { %v1605_v16 = vpop.permute.xlu1 %1604 }
 0x378   : > { %v1608_v10 = vsel %vm4569_vm5, %v1601_v15, %v1605_v16  ;;  %v1610_v11 = vsel %vm4569_vm5, %v1605_v16, %v1601_v15  ;;  %vm4571_vm5 = vcmp.lt.s32.totalorder %v2730_v28, 96 }
 0x379   : > { %v1627_v26 = vmul.f32 %v1619_v48, %v1608_v10  ;;  %v1628_v53 = vmul.f32 %v1620_v36, %v1610_v11 }
 0x37b   : > { %v1631_v40 = vadd.f32 %v1627_v26, %v1491_v19  ;;  %v1632_v9 = vadd.f32 %v1628_v53, %v1492_v52 }
 0x37c   : > { %810 = vrot.lane.b32.xlu0 %v4605_v18, %s4612_s14  ;;  %740 = vrot.lane.b32.xlu2 %v4605_v18, %s4611_s27  ;;  %s4661_s27 = smov 79  }
 0x37d   : > { %775 = vrot.lane.b32.xlu1 %v4605_v18, %s4610_s22  ;;  %s4621_s22 = smov 13  }
 0x37e   : > { %v1745_v55 = vpop.permute.xlu0 %1744  ;;  %v3684_v23 = vpop.permute.xlu2 %1884 }
 0x37f   : > { %v1748_v8 = vsel %vm4571_vm5, %v3612_v57, %v1745_v55  ;;  %v1750_v51 = vsel %vm4571_vm5, %v1745_v55, %v3612_v57  ;;  %v1671_v19 = vpop.permute.xlu1 %1670  ;;  %v2356_v57 = vld [vmem:[%s4465_s3 + $0xb5] ss:$8 sm:$0x3]  ;;  %vm4572_vm5 = vcmp.lt.s32.totalorder %v2730_v28, 97 }
 0x380   : > { %v1767_v52 = vmul.f32 %v1759_v25, %v1748_v8  ;;  %v1768_v34 = vmul.f32 %v1760_v7, %v1750_v51  ;;  %v1678_v49 = vsel %vm4573_vm3, %v1671_v19, %v3582_v38  ;;  %v1680_v15 = vsel %vm4573_vm3, %v3582_v38, %v1671_v19  ;;  %v2366_v55 = vld [vmem:[%s4465_s3 + $0xc2] ss:$8 sm:$0x3] }
 0x381   : > { %v1697_v27 = vmul.f32 %v1689_v41, %v1678_v49  ;;  %v1698_v54 = vmul.f32 %v1690_v60, %v1680_v15  ;;  %v1724_v38 = vperm.slane %v2356_v57, 0  ;;  %v1725_v33 = vperm.slane %v2356_v57, 1  ;;  %v2370_v60 = vld [vmem:[%s4465_s3 + $0xc4] ss:$8 sm:$0x3] }
 0x382   : > { %v3698_v4 = vadd.f32 %v1767_v52, %v1631_v40  ;;  %v3700_v1 = vadd.f32 %v1768_v34, %v1632_v9  ;;  %vm4576_vm3 = vcmp.lt.s32.totalorder %v2730_v28, 95  ;;  %v1969_v19 = vperm.slane %v2370_v60, 0 }
 0x383   : > { %v1701_v61 = vadd.f32 %v1697_v27, %v3596_v0  ;;  %v1702_v2 = vadd.f32 %v1698_v54, %v3598_v63  ;;  %v1970_v52 = vperm.slane %v2370_v60, 1  ;;  %v1899_v34 = vperm.slane %v2366_v55, 0 }
 0x384   : > { %876 = vrot.lane.b32.xlu0 %v4601_v22, %s4613_s6  ;;  %806 = vrot.lane.b32.xlu2 %v4601_v22, %s4612_s14  ;;  %v1900_v49 = vperm.slane %v2366_v55, 1  ;;  %s4620_s14 = smov 15   ;;  %v2374_v55 = vld [vmem:[%s4465_s3 + $0xc6] ss:$8 sm:$0x3] }
 0x385   : > { %841 = vrot.lane.b32.xlu1 %v4601_v22, %s4614_s12 }
 0x386   : > { %v1811_v59 = vpop.permute.xlu0 %1810  ;;  %v3714_v29 = vpop.permute.xlu2 %1950 }
 0x387   : > { %v1710_v3 = vpop.permute.xlu1 %1709 }
 0x388   : > { %v1713_v0 = vsel %vm4572_vm5, %v1706_v12, %v1710_v3  ;;  %v1715_v63 = vsel %vm4572_vm5, %v1710_v3, %v1706_v12  ;;  %vm4574_vm5 = vcmp.lt.s32.totalorder %v2730_v28, 93 }
 0x389   : > { %v1732_v47 = vmul.f32 %v1724_v38, %v1713_v0  ;;  %v1733_v31 = vmul.f32 %v1725_v33, %v1715_v63 }
 0x38b   : > { %v1736_v43 = vadd.f32 %v1732_v47, %v1596_v42  ;;  %v1737_v58 = vadd.f32 %v1733_v31, %v1597_v17 }
 0x38c   : > { %915 = vrot.lane.b32.xlu0 %v4605_v18, %s4615_s5  ;;  %845 = vrot.lane.b32.xlu2 %v4605_v18, %s4614_s12  ;;  %s4628_s12 = smov 114  }
 0x38d   : > { %880 = vrot.lane.b32.xlu1 %v4605_v18, %s4613_s6  ;;  %s4641_s6 = smov 109  }
 0x38e   : > { %v1850_v37 = vpop.permute.xlu0 %1849  ;;  %v3734_v13 = vpop.permute.xlu2 %1989 }
 0x38f   : > { %v1853_v5 = vsel %vm4574_vm5, %v3664_v30, %v1850_v37  ;;  %v1855_v20 = vsel %vm4574_vm5, %v1850_v37, %v3664_v30  ;;  %v1776_v42 = vpop.permute.xlu1 %1775  ;;  %v2362_v30 = vld [vmem:[%s4465_s3 + $0xc0] ss:$8 sm:$0x3]  ;;  %vm4575_vm5 = vcmp.lt.s32.totalorder %v2730_v28, 94 }
 0x390   : > { %v1872_v17 = vmul.f32 %v1864_v14, %v1853_v5  ;;  %v1873_v48 = vmul.f32 %v1865_v35, %v1855_v20  ;;  %v1783_v36 = vsel %vm4576_vm3, %v1776_v42, %v3634_v50  ;;  %v1785_v12 = vsel %vm4576_vm3, %v3634_v50, %v1776_v42  ;;  %v2376_v5 = vld [vmem:[%s4465_s3 + $0xc7] ss:$8 sm:$0x3]  ;;  %v2372_v20 = vld [vmem:[%s4465_s3 + $0xc5] ss:$8 sm:$0x3] }
 0x391   : > { %v1802_v16 = vmul.f32 %v1794_v62, %v1783_v36  ;;  %v1803_v10 = vmul.f32 %v1795_v24, %v1785_v12  ;;  %v1829_v50 = vperm.slane %v2362_v30, 0  ;;  %v1830_v56 = vperm.slane %v2362_v30, 1 }
 0x392   : > { %v3748_v11 = vadd.f32 %v1872_v17, %v1736_v43  ;;  %v3750_v26 = vadd.f32 %v1873_v48, %v1737_v58  ;;  %vm1886_vm3 = vcmp.lt.s32.totalorder %v2730_v28, 83  ;;  %v2074_v48 = vperm.slane %v2376_v5, 0 }
 0x393   : > { %v1806_v53 = vadd.f32 %v1802_v16, %v3648_v32  ;;  %v1807_v44 = vadd.f32 %v1803_v10, %v3650_v6  ;;  %v2075_v36 = vperm.slane %v2376_v5, 1  ;;  %v2004_v12 = vperm.slane %v2372_v20, 0 }
 0x394   : > { %981 = vrot.lane.b32.xlu0 %v4601_v22, %s4616_s28  ;;  %911 = vrot.lane.b32.xlu2 %v4601_v22, %s4615_s5  ;;  %v2005_v16 = vperm.slane %v2372_v20, 1  ;;  %s4623_s5 = smov 3  }
 0x395   : > { %946 = vrot.lane.b32.xlu1 %v4601_v22, %s4617_s30 }
 0x396   : > { %v1916_v40 = vpop.permute.xlu0 %1915  ;;  %v3764_v9 = vpop.permute.xlu2 %2055 }
 0x397   : > { %v1815_v25 = vpop.permute.xlu1 %1814 }
 0x398   : > { %v1818_v32 = vsel %vm4575_vm5, %v1811_v59, %v1815_v25  ;;  %v1820_v6 = vsel %vm4575_vm5, %v1815_v25, %v1811_v59  ;;  %vm4577_vm5 = vcmp.lt.s32.totalorder %v2730_v28, 81 }
 0x399   : > { %v1837_v7 = vmul.f32 %v1829_v50, %v1818_v32  ;;  %v1838_v41 = vmul.f32 %v1830_v56, %v1820_v6 }
 0x39b   : > { %v1841_v8 = vadd.f32 %v1837_v7, %v1701_v61  ;;  %v1842_v51 = vadd.f32 %v1838_v41, %v1702_v2 }
 0x39c   : > { %1020 = vrot.lane.b32.xlu0 %v4605_v18, %s4618_s29  ;;  %950 = vrot.lane.b32.xlu2 %v4605_v18, %s4617_s30  ;;  %s4640_s30 = smov 99  }
 0x39d   : > { %985 = vrot.lane.b32.xlu1 %v4605_v18, %s4616_s28  ;;  %s4626_s28 = smov 127  }
 0x39e   : > { %v1955_v15 = vpop.permute.xlu0 %1954  ;;  %v423_v27 = vpop.permute.xlu2 %422 }
 0x39f   : > { %v1958_v54 = vsel %vm4577_vm5, %v3714_v29, %v1955_v15  ;;  %v1960_v57 = vsel %vm4577_vm5, %v1955_v15, %v3714_v29  ;;  %v1881_v61 = vpop.permute.xlu1 %1880  ;;  %v2368_v29 = vld [vmem:[%s4465_s3 + $0xc3] ss:$8 sm:$0x3]  ;;  %vm4578_vm5 = vcmp.lt.s32.totalorder %v2730_v28, 82 }
 0x3a0   : > { %v1977_v2 = vmul.f32 %v1969_v19, %v1958_v54  ;;  %v1978_v38 = vmul.f32 %v1970_v52, %v1960_v57  ;;  %v1888_v33 = vsel %vm1886_vm3, %v1881_v61, %v3684_v23  ;;  %v1890_v59 = vsel %vm1886_vm3, %v3684_v23, %v1881_v61 }
 0x3a1   : > { %v1907_v3 = vmul.f32 %v1899_v34, %v1888_v33  ;;  %v1908_v0 = vmul.f32 %v1900_v49, %v1890_v59  ;;  %v1934_v23 = vperm.slane %v2368_v29, 0  ;;  %v1935_v21 = vperm.slane %v2368_v29, 1 }
 0x3a2   : > { %v3796_v63 = vadd.f32 %v1977_v2, %v1841_v8  ;;  %v3798_v47 = vadd.f32 %v1978_v38, %v1842_v51  ;;  %v2040_v51 = vperm.slane %v2374_v55, 1 }
 0x3a3   : > { %v1911_v31 = vadd.f32 %v1907_v3, %v3698_v4  ;;  %v1912_v39 = vadd.f32 %v1908_v0, %v3700_v1 }
 0x3a4   : > { %1086 = vrot.lane.b32.xlu0 %v4601_v22, %s4619_s8  ;;  %1016 = vrot.lane.b32.xlu2 %v4601_v22, %s4618_s29  ;;  %s188_s29 = sand.u32 1, %s2548_s16  }
 0x3a5   : > { %1051 = vrot.lane.b32.xlu1 %v4601_v22, %s4620_s14 }
 0x3a6   : > { %v2021_v43 = vpop.permute.xlu0 %2020  ;;  %v427_v58 = vpop.permute.xlu2 %426 }
 0x3a7   : > { %v1920_v14 = vpop.permute.xlu1 %1919  ;;  %v3814_v4 = vsel %vm430_vm12, %v423_v27, %v427_v58  ;;  %v3818_v1 = vsel %vm430_vm12, %v427_v58, %v423_v27  ;;  %vm4579_vm12 = vcmp.lt.s32.totalorder %v2730_v28, 78 }
 0x3a8   : > { %v1923_v35 = vsel %vm4578_vm5, %v1916_v40, %v1920_v14  ;;  %v1925_v62 = vsel %vm4578_vm5, %v1920_v14, %v1916_v40  ;;  %vm1991_vm5 = vcmp.lt.s32.totalorder %v2730_v28, 80  ;;  %v2291_v14 = vld [vmem:[%s4465_s3 + $0x5] ss:$8 sm:$0x3] }
 0x3a9   : > { %v1942_v24 = vmul.f32 %v1934_v23, %v1923_v35  ;;  %v1943_v37 = vmul.f32 %v1935_v21, %v1925_v62  ;;  %v2283_v21 = vld [vmem:[%s4465_s3 + $0x1] ss:$8 sm:$0x3]  ;;  %v435_v35 = vld [vmem:[%s4465_s3] ss:$8 sm:$0x3] }
 0x3aa   : > { %v2289_v62 = vld [vmem:[%s4465_s3 + $0x4] ss:$8 sm:$0x3]  ;;  %v615_v5 = vperm.slane %v2291_v14, 0  ;;  %v616_v20 = vperm.slane %v2291_v14, 1 }
 0x3ab   : > { %v1946_v42 = vadd.f32 %v1942_v24, %v1806_v53  ;;  %v1947_v17 = vadd.f32 %v1943_v37, %v1807_v44  ;;  %v475_v24 = vperm.slane %v2283_v21, 0  ;;  %v476_v37 = vperm.slane %v2283_v21, 1  ;;  %v2295_v21 = vld [vmem:[%s4465_s3 + $0x7] ss:$8 sm:$0x3] }
 0x3ac   : > { %1125 = vrot.lane.b32.xlu0 %v4605_v18, %s4621_s22  ;;  %1055 = vrot.lane.b32.xlu2 %v4605_v18, %s4620_s14  ;;  %s4625_s14 = smov 126  }
 0x3ad   : > { %1090 = vrot.lane.b32.xlu1 %v4605_v18, %s4619_s8  ;;  %s4624_s8 = smov 1  }
 0x3ae   : > { %v2060_v10 = vpop.permute.xlu0 %2059  ;;  %v492_v30 = vpop.permute.xlu2 %491 }
 0x3af   : > { %v2063_v53 = vsel %vm4579_vm12, %v3764_v9, %v2060_v10  ;;  %v2065_v44 = vsel %vm4579_vm12, %v2060_v10, %v3764_v9  ;;  %v1986_v50 = vpop.permute.xlu1 %1985  ;;  %vm2026_vm12 = vcmp.lt.s32.totalorder %v2730_v28, 79 }
 0x3b0   : > { %v2082_v56 = vmul.f32 %v2074_v48, %v2063_v53  ;;  %v2083_v40 = vmul.f32 %v2075_v36, %v2065_v44  ;;  %v1993_v25 = vsel %vm1991_vm5, %v1986_v50, %v3734_v13  ;;  %v1995_v32 = vsel %vm1991_vm5, %v3734_v13, %v1986_v50 }
 0x3b1   : > { %v2012_v6 = vmul.f32 %v2004_v12, %v1993_v25  ;;  %v2013_v7 = vmul.f32 %v2005_v16, %v1995_v32  ;;  %v2039_v13 = vperm.slane %v2374_v55, 0  ;;  %v580_v48 = vperm.slane %v2289_v62, 0  ;;  %v2285_v55 = vld [vmem:[%s4465_s3 + $0x2] ss:$8 sm:$0x3] }
 0x3b2   : > { %v2086_v41 = vadd.f32 %v2082_v56, %v1946_v42  ;;  %v2087_v60 = vadd.f32 %v2083_v40, %v1947_v17  ;;  %v440_v42 = vperm.slane %v435_v35, 0  ;;  %v441_v17 = vperm.slane %v435_v35, 1 }
 0x3b3   : > { %v3854_v9 = vadd.f32 %v2012_v6, %v3748_v11  ;;  %v3857_v8 = vadd.f32 %v2013_v7, %v3750_v26  ;;  %v581_v36 = vperm.slane %v2289_v62, 1 }
 0x3b4   : > { %1191 = vrot.lane.b32.xlu0 %v4601_v22, %s4622_s23  ;;  %1121 = vrot.lane.b32.xlu2 %v4601_v22, %s4621_s22  ;;  %v448_v6 = vmul.f32 %v440_v42, %v3818_v1  ;;  %v449_v7 = vmul.f32 %v441_v17, %v3814_v4  ;;  %v510_v4 = vperm.slane %v2285_v55, 0  ;;  %v511_v1 = vperm.slane %v2285_v55, 1  ;;  %s4629_s22 = smov 115  }
 0x3b5   : > { %1156 = vrot.lane.b32.xlu1 %v4601_v22, %s4623_s5 }
 0x3b6   : > { %v457_v19 = vpop.permute.xlu0 %456  ;;  %v531_v52 = vpop.permute.xlu2 %530 }
 0x3b7   : > { %v2025_v11 = vpop.permute.xlu1 %2024 }
 0x3b8   : > { %v2028_v26 = vsel %vm2026_vm12, %v2021_v43, %v2025_v11  ;;  %v2030_v34 = vsel %vm2026_vm12, %v2025_v11, %v2021_v43 }
 0x3b9   : > { %v2047_v49 = vmul.f32 %v2039_v13, %v2028_v26  ;;  %v2048_v15 = vmul.f32 %v2040_v51, %v2030_v34 }
 0x3bb   : > { %v2051_v27 = vadd.f32 %v2047_v49, %v1911_v31  ;;  %v2052_v54 = vadd.f32 %v2048_v15, %v1912_v39 }
 0x3bc   : > { %1230 = vrot.lane.b32.xlu0 %v4605_v18, %s4624_s8  ;;  %1160 = vrot.lane.b32.xlu2 %v4605_v18, %s4623_s5 }
 0x3bd   : > { %v3874_v57 = vadd.f32 %v2086_v41, %v2051_v27  ;;  %v3876_v61 = vadd.f32 %v2087_v60, %v2052_v54  ;;  %1195 = vrot.lane.b32.xlu1 %v4605_v18, %s4622_s23  ;;  %s4642_s23 = smov 98  }
 0x3be   : > { %v496_v2 = vpop.permute.xlu0 %495  ;;  %v597_v38 = vpop.permute.xlu2 %596 }
 0x3bf   : > { %v461_v33 = vpop.permute.xlu1 %460  ;;  %v500_v59 = vsel %vm499_vm14, %v492_v30, %v496_v2  ;;  %v502_v3 = vsel %vm499_vm14, %v496_v2, %v492_v30  ;;  %vm4636_vm14 = vcmp.lt.s32.totalorder %v2730_v28, 31 }
 0x3c0   : > { %v465_v0 = vsel %vm464_vm11, %v457_v19, %v461_v33  ;;  %v467_v29 = vsel %vm464_vm11, %v461_v33, %v457_v19  ;;  %v2293_v19 = vld [vmem:[%s4465_s3 + $0x6] ss:$8 sm:$0x3]  ;;  %v519_v33 = vmul.f32 %v511_v1, %v500_v59  ;;  %vm4633_vm11 = vcmp.lt.s32.totalorder %v2730_v28, 33 }
 0x3c1   : > { %v483_v10 = vmul.f32 %v475_v24, %v467_v29  ;;  %v484_v30 = vmul.f32 %v476_v37, %v465_v0  ;;  %v650_v26 = vperm.slane %v2293_v19, 0  ;;  %v651_v34 = vperm.slane %v2293_v19, 1  ;;  %v2301_v1 = vld [vmem:[%s4465_s3 + $0x12] ss:$8 sm:$0x3] }
 0x3c2   : > { %v685_v24 = vperm.slane %v2295_v21, 0  ;;  %v686_v37 = vperm.slane %v2295_v21, 1 }
 0x3c4   : > { %1318 = vrot.lane.b32.xlu0 %v4601_v22, %s4625_s14  ;;  %1226 = vrot.lane.b32.xlu2 %v4601_v22, %s4624_s8  ;;  %s4627_s8 = smov 125  }
 0x3c5   : > { %1283 = vrot.lane.b32.xlu1 %v4601_v22, %s4626_s28 }
 0x3c6   : > { %v562_v31 = vpop.permute.xlu0 %561  ;;  %v636_v39 = vpop.permute.xlu2 %635 }
 0x3c7   : > { %v527_v23 = vpop.permute.xlu1 %526 }
 0x3c8   : > { %v3899_v43 = vsel %vm534_vm15, %v527_v23, %v531_v52  ;;  %v3903_v58 = vsel %vm534_vm15, %v531_v52, %v527_v23  ;;  %v2287_v23 = vld [vmem:[%s4465_s3 + $0x3] ss:$8 sm:$0x3]  ;;  %vm4637_vm15 = vmmov %vm4636_vm14 }
 0x3c9   : > { %v546_v62 = vperm.slane %v2287_v23, 1 }
 0x3cc   : > { %1357 = vrot.lane.b32.xlu0 %v4605_v18, %s4627_s8  ;;  %1287 = vrot.lane.b32.xlu2 %v4605_v18, %s4626_s28  ;;  %s4630_s28 = smov 113  }
 0x3cd   : > { %1322 = vrot.lane.b32.xlu1 %v4605_v18, %s4625_s14  ;;  %s4647_s14 = smov 96  }
 0x3ce   : > { %v601_v12 = vpop.permute.xlu0 %600  ;;  %v702_v16 = vpop.permute.xlu2 %701 }
 0x3cf   : > { %v566_v53 = vpop.permute.xlu1 %565  ;;  %v605_v44 = vsel %vm604_vm1, %v597_v38, %v601_v12  ;;  %v607_v50 = vsel %vm604_vm1, %v601_v12, %v597_v38  ;;  %v518_v38 = vmul.f32 %v510_v4, %v502_v3  ;;  %v2303_v4 = vld [vmem:[%s4465_s3 + $0x13] ss:$8 sm:$0x3] }
 0x3d0   : > { %v570_v56 = vsel %vm569_vm13, %v562_v31, %v566_v53  ;;  %v572_v40 = vsel %vm569_vm13, %v566_v53, %v562_v31  ;;  %v623_v25 = vmul.f32 %v615_v5, %v607_v50  ;;  %v624_v32 = vmul.f32 %v616_v20, %v605_v44  ;;  %v2297_v31 = vld [vmem:[%s4465_s3 + $0x10] ss:$8 sm:$0x3]  ;;  %vm4634_vm13 = vmmov %vm4633_vm11 }
 0x3d1   : > { %v588_v41 = vmul.f32 %v580_v48, %v572_v40  ;;  %v589_v60 = vmul.f32 %v581_v36, %v570_v56  ;;  %v720_v59 = vperm.slane %v2297_v31, 0  ;;  %v721_v3 = vperm.slane %v2297_v31, 1 }
 0x3d2   : > { %v3933_v13 = vadd.f32 %v623_v25, %v483_v10  ;;  %v3935_v51 = vadd.f32 %v624_v32, %v484_v30  ;;  %v554_v44 = vmul.f32 %v546_v62, %v3899_v43  ;;  %v2305_v62 = vld [vmem:[%s4465_s3 + $0x14] ss:$8 sm:$0x3] }
 0x3d3   : > { %v592_v52 = vadd.f32 %v588_v41, %v448_v6  ;;  %v593_v11 = vadd.f32 %v589_v60, %v449_v7 }
 0x3d4   : > { %1423 = vrot.lane.b32.xlu0 %v4601_v22, %s4628_s12  ;;  %1353 = vrot.lane.b32.xlu2 %v4601_v22, %s4627_s8  ;;  %s4635_s8 = smov 110  }
 0x3d5   : > { %1388 = vrot.lane.b32.xlu1 %v4601_v22, %s4629_s22 }
 0x3d6   : > { %v667_v49 = vpop.permute.xlu0 %666  ;;  %v741_v15 = vpop.permute.xlu2 %740 }
 0x3d7   : > { %v632_v27 = vpop.permute.xlu1 %631 }
 0x3d8   : > { %v640_v54 = vsel %vm639_vm2, %v632_v27, %v636_v39  ;;  %v642_v2 = vsel %vm639_vm2, %v636_v39, %v632_v27  ;;  %v545_v39 = vperm.slane %v2287_v23, 0  ;;  %v790_v27 = vperm.slane %v2301_v1, 0 }
 0x3d9   : > { %v658_v0 = vmul.f32 %v650_v26, %v642_v2  ;;  %v659_v29 = vmul.f32 %v651_v34, %v640_v54  ;;  %v791_v54 = vperm.slane %v2301_v1, 1  ;;  %vm4643_vm2 = vcmp.lt.s32.totalorder %v2730_v28, 19  ;;  %v2311_v1 = vld [vmem:[%s4465_s3 + $0x17] ss:$8 sm:$0x3] }
 0x3da   : > { %v553_v53 = vmul.f32 %v545_v39, %v3903_v58 }
 0x3db   : > { %v3959_v14 = vadd.f32 %v658_v0, %v518_v38  ;;  %v3961_v35 = vadd.f32 %v659_v29, %v519_v33 }
 0x3dc   : > { %1462 = vrot.lane.b32.xlu0 %v4605_v18, %s4630_s28  ;;  %1392 = vrot.lane.b32.xlu2 %v4605_v18, %s4629_s22  ;;  %s4632_s22 = smov 112  }
 0x3dd   : > { %1427 = vrot.lane.b32.xlu1 %v4605_v18, %s4628_s12  ;;  %s4631_s12 = smov 111  }
 0x3de   : > { %v706_v5 = vpop.permute.xlu0 %705  ;;  %v807_v20 = vpop.permute.xlu2 %806 }
 0x3df   : > { %v671_v42 = vpop.permute.xlu1 %670  ;;  %v710_v17 = vsel %vm709_vm4, %v702_v16, %v706_v5  ;;  %v712_v48 = vsel %vm709_vm4, %v706_v5, %v702_v16  ;;  %v2299_v16 = vld [vmem:[%s4465_s3 + $0x11] ss:$8 sm:$0x3]  ;;  %v860_v5 = vperm.slane %v2305_v62, 0  ;;  %vm4644_vm4 = vmmov %vm4643_vm2 }
 0x3e0   : > { %v675_v36 = vsel %vm674_vm0, %v667_v49, %v671_v42  ;;  %v677_v12 = vsel %vm674_vm0, %v671_v42, %v667_v49  ;;  %v728_v10 = vmul.f32 %v720_v59, %v712_v48  ;;  %v729_v30 = vmul.f32 %v721_v3, %v710_v17 }
 0x3e1   : > { %v693_v50 = vmul.f32 %v685_v24, %v677_v12  ;;  %v694_v56 = vmul.f32 %v686_v37, %v675_v36  ;;  %v755_v43 = vperm.slane %v2299_v16, 0  ;;  %v756_v58 = vperm.slane %v2299_v16, 1 }
 0x3e2   : > { %v732_v40 = vadd.f32 %v728_v10, %v592_v52  ;;  %v733_v25 = vadd.f32 %v729_v30, %v593_v11  ;;  %v825_v49 = vperm.slane %v2303_v4, 0  ;;  %vm4638_vm0 = vcmp.lt.s32.totalorder %v2730_v28, 32  ;;  %v2309_v10 = vld [vmem:[%s4465_s3 + $0x16] ss:$8 sm:$0x3] }
 0x3e3   : > { %v697_v32 = vadd.f32 %v693_v50, %v553_v53  ;;  %v698_v6 = vadd.f32 %v694_v56, %v554_v44  ;;  %vm4639_vm1 = vmmov %vm4638_vm0  ;;  %v2307_v30 = vld [vmem:[%s4465_s3 + $0x15] ss:$8 sm:$0x3]  ;;  %v930_v50 = vperm.slane %v2309_v10, 0  ;;  %v931_v56 = vperm.slane %v2309_v10, 1 }
 0x3e4   : > { %1528 = vrot.lane.b32.xlu0 %v4601_v22, %s4631_s12  ;;  %1458 = vrot.lane.b32.xlu2 %v4601_v22, %s4630_s28  ;;  %v895_v16 = vperm.slane %v2307_v30, 0  ;;  %s4648_s28 = smov 97  }
 0x3e5   : > { %1493 = vrot.lane.b32.xlu1 %v4601_v22, %s4632_s22 }
 0x3e6   : > { %v772_v7 = vpop.permute.xlu0 %771  ;;  %v846_v41 = vpop.permute.xlu2 %845 }
 0x3e7   : > { %v737_v60 = vpop.permute.xlu1 %736 }
 0x3e8   : > { %v745_v55 = vsel %vm4633_vm11, %v737_v60, %v741_v15  ;;  %v747_v19 = vsel %vm4634_vm13, %v741_v15, %v737_v60  ;;  %v826_v15 = vperm.slane %v2303_v4, 1 }
 0x3e9   : > { %v763_v52 = vmul.f32 %v755_v43, %v747_v19  ;;  %v764_v11 = vmul.f32 %v756_v58, %v745_v55 }
 0x3eb   : > { %v767_v26 = vadd.f32 %v763_v52, %v3933_v13  ;;  %v768_v34 = vadd.f32 %v764_v11, %v3935_v51 }
 0x3ec   : > { %1567 = vrot.lane.b32.xlu0 %v4605_v18, %s4635_s8  ;;  %1497 = vrot.lane.b32.xlu2 %v4605_v18, %s4632_s22  ;;  %s4660_s22 = smov 78  }
 0x3ed   : > { %1532 = vrot.lane.b32.xlu1 %v4605_v18, %s4631_s12 }
 0x3ee   : > { %v811_v2 = vpop.permute.xlu0 %810  ;;  %v912_v38 = vpop.permute.xlu2 %911 }
 0x3ef   : > { %v776_v33 = vpop.permute.xlu1 %775  ;;  %v815_v13 = vsel %vm4636_vm14, %v807_v20, %v811_v2  ;;  %v817_v51 = vsel %vm4637_vm15, %v811_v2, %v807_v20  ;;  %v861_v20 = vperm.slane %v2305_v62, 1  ;;  %vm4656_vm15 = vcmp.lt.s32.totalorder %v2730_v28, 1 }
 0x3f0   : > { %v780_v0 = vsel %vm4638_vm0, %v772_v7, %v776_v33  ;;  %v782_v29 = vsel %vm4639_vm1, %v776_v33, %v772_v7  ;;  %v833_v31 = vmul.f32 %v825_v49, %v817_v51  ;;  %v834_v23 = vmul.f32 %v826_v15, %v815_v13  ;;  %vm4657_vm0 = vmmov %vm4656_vm15 }
 0x3f1   : > { %v798_v21 = vmul.f32 %v790_v27, %v782_v29  ;;  %v799_v59 = vmul.f32 %v791_v54, %v780_v0  ;;  %v965_v27 = vperm.slane %v2311_v1, 0  ;;  %v966_v54 = vperm.slane %v2311_v1, 1  ;;  %v2315_v0 = vld [vmem:[%s4465_s3 + $0x21] ss:$8 sm:$0x3] }
 0x3f2   : > { %v837_v3 = vadd.f32 %v833_v31, %v697_v32  ;;  %v838_v39 = vadd.f32 %v834_v23, %v698_v6  ;;  %v896_v32 = vperm.slane %v2307_v30, 1  ;;  %v2313_v29 = vld [vmem:[%s4465_s3 + $0x20] ss:$8 sm:$0x3]  ;;  %vm4658_vm1 = vcmp.lt.s32.totalorder %v2730_v28, 2 }
 0x3f3   : > { %v802_v24 = vadd.f32 %v798_v21, %v3959_v14  ;;  %v803_v37 = vadd.f32 %v799_v59, %v3961_v35  ;;  %v1035_v21 = vperm.slane %v2315_v0, 0  ;;  %v1036_v59 = vperm.slane %v2315_v0, 1  ;;  %v2317_v30 = vld [vmem:[%s4465_s3 + $0x22] ss:$8 sm:$0x3] }
 0x3f4   : > { %1633 = vrot.lane.b32.xlu0 %v4601_v22, %s4640_s30  ;;  %1563 = vrot.lane.b32.xlu2 %v4601_v22, %s4635_s8  ;;  %v1000_v62 = vperm.slane %v2313_v29, 0 }
 0x3f5   : > { %1598 = vrot.lane.b32.xlu1 %v4601_v22, %s4641_s6 }
 0x3f6   : > { %v877_v42 = vpop.permute.xlu0 %876  ;;  %v951_v17 = vpop.permute.xlu2 %950 }
 0x3f7   : > { %v842_v48 = vpop.permute.xlu1 %841 }
 0x3f8   : > { %v850_v36 = vsel %vm849_vm10, %v842_v48, %v846_v41  ;;  %v852_v14 = vsel %vm849_vm10, %v846_v41, %v842_v48  ;;  %vm4645_vm10 = vcmp.lt.s32.totalorder %v2730_v28, 29 }
 0x3f9   : > { %v868_v35 = vmul.f32 %v860_v5, %v852_v14  ;;  %v869_v12 = vmul.f32 %v861_v20, %v850_v36  ;;  %vm4646_vm11 = vmmov %vm4645_vm10 }
 0x3fb   : > { %v872_v53 = vadd.f32 %v868_v35, %v732_v40  ;;  %v873_v44 = vadd.f32 %v869_v12, %v733_v25 }
 0x3fc   : > { %1672 = vrot.lane.b32.xlu0 %v4605_v18, %s4642_s23  ;;  %1602 = vrot.lane.b32.xlu2 %v4605_v18, %s4641_s6 }
 0x3fd   : > { %1637 = vrot.lane.b32.xlu1 %v4605_v18, %s4640_s30 }
 0x3fe   : > { %v916_v6 = vpop.permute.xlu0 %915  ;;  %v1017_v43 = vpop.permute.xlu2 %1016 }
 0x3ff   : > { %v881_v58 = vpop.permute.xlu1 %880  ;;  %v920_v40 = vsel %vm4643_vm2, %v912_v38, %v916_v6  ;;  %v922_v25 = vsel %vm4644_vm4, %v916_v6, %v912_v38  ;;  %vm4659_vm2 = vmmov %vm4658_vm1  ;;  %vm4662_vm4 = vcmp.lt.s32.totalorder %v2730_v28, 127 }
 0x400   : > { %v885_v7 = vsel %vm4645_vm10, %v877_v42, %v881_v58  ;;  %v887_v41 = vsel %vm4646_vm11, %v881_v58, %v877_v42  ;;  %v938_v60 = vmul.f32 %v930_v50, %v922_v25  ;;  %v939_v55 = vmul.f32 %v931_v56, %v920_v40  ;;  %vm4663_vm10 = vmmov %vm4662_vm4 }
 0x401   : > { %v903_v19 = vmul.f32 %v895_v16, %v887_v41  ;;  %v904_v52 = vmul.f32 %v896_v32, %v885_v7  ;;  %v1070_v16 = vperm.slane %v2317_v30, 0  ;;  %v1071_v32 = vperm.slane %v2317_v30, 1  ;;  %v2321_v7 = vld [vmem:[%s4465_s3 + $0x24] ss:$8 sm:$0x3] }
 0x402   : > { %v942_v11 = vadd.f32 %v938_v60, %v802_v24  ;;  %v943_v4 = vadd.f32 %v939_v55, %v803_v37  ;;  %v1001_v24 = vperm.slane %v2313_v29, 1  ;;  %v2319_v41 = vld [vmem:[%s4465_s3 + $0x23] ss:$8 sm:$0x3]  ;;  %vm4664_vm11 = vcmp.lt.s32.totalorder %v2730_v28, 125 }
 0x403   : > { %v907_v49 = vadd.f32 %v903_v19, %v767_v26  ;;  %v908_v15 = vadd.f32 %v904_v52, %v768_v34  ;;  %v1140_v19 = vperm.slane %v2321_v7, 0  ;;  %v1141_v52 = vperm.slane %v2321_v7, 1  ;;  %v2323_v29 = vld [vmem:[%s4465_s3 + $0x25] ss:$8 sm:$0x3] }
 0x404   : > { %1738 = vrot.lane.b32.xlu0 %v4601_v22, %s4647_s14  ;;  %1668 = vrot.lane.b32.xlu2 %v4601_v22, %s4642_s23  ;;  %v1105_v1 = vperm.slane %v2319_v41, 0  ;;  %s2275_s23 = sshll.u32 %s188_s29, 5 }
 0x405   : > { %1703 = vrot.lane.b32.xlu1 %v4601_v22, %s4648_s28 }
 0x406   : > { %v982_v2 = vpop.permute.xlu0 %981  ;;  %v1056_v38 = vpop.permute.xlu2 %1055 }
 0x407   : > { %v947_v33 = vpop.permute.xlu1 %946 }
 0x408   : > { %v955_v13 = vsel %vm954_vm8, %v947_v33, %v951_v17  ;;  %v957_v26 = vsel %vm954_vm8, %v951_v17, %v947_v33  ;;  %vm4649_vm8 = vcmp.lt.s32.totalorder %v2730_v28, 16 }
 0x409   : > { %v973_v34 = vmul.f32 %v965_v27, %v957_v26  ;;  %v974_v51 = vmul.f32 %v966_v54, %v955_v13  ;;  %vm4650_vm13 = vmmov %vm4649_vm8 }
 0x40b   : > { %v977_v31 = vadd.f32 %v973_v34, %v837_v3  ;;  %v978_v23 = vadd.f32 %v974_v51, %v838_v39 }
 0x40c   : > { %1777 = vrot.lane.b32.xlu0 %v4605_v18, %s2597_s13  ;;  %1707 = vrot.lane.b32.xlu2 %v4605_v18, %s4648_s28 }
 0x40d   : > { %1742 = vrot.lane.b32.xlu1 %v4605_v18, %s4647_s14  ;;  %s4653_s14 = smov 82  }
 0x40e   : > { %v1021_v37 = vpop.permute.xlu0 %1020  ;;  %v1122_v5 = vpop.permute.xlu2 %1121 }
 0x40f   : > { %v986_v20 = vpop.permute.xlu1 %985  ;;  %v1025_v3 = vsel %vm4649_vm8, %v1017_v43, %v1021_v37  ;;  %v1027_v39 = vsel %vm4650_vm13, %v1021_v37, %v1017_v43  ;;  %vm4665_vm8 = vmmov %vm4664_vm11  ;;  %vm4666_vm13 = vcmp.lt.s32.totalorder %v2730_v28, 126 }
 0x410   : > { %v990_v42 = vsel %vm989_vm9, %v982_v2, %v986_v20  ;;  %v992_v17 = vsel %vm989_vm9, %v986_v20, %v982_v2  ;;  %v1043_v48 = vmul.f32 %v1035_v21, %v1027_v39  ;;  %v1044_v36 = vmul.f32 %v1036_v59, %v1025_v3 }
 0x411   : > { %v1008_v14 = vmul.f32 %v1000_v62, %v992_v17  ;;  %v1009_v35 = vmul.f32 %v1001_v24, %v990_v42  ;;  %vm4651_vm9 = vcmp.lt.s32.totalorder %v2730_v28, 15  ;;  %v1175_v62 = vperm.slane %v2323_v29, 0  ;;  %v2327_v42 = vld [vmem:[%s4465_s3 + $0x27] ss:$8 sm:$0x3] }
 0x412   : > { %v1047_v12 = vadd.f32 %v1043_v48, %v907_v49  ;;  %v1048_v10 = vadd.f32 %v1044_v36, %v908_v15  ;;  %vm4652_vm14 = vmmov %vm4651_vm9  ;;  %v1106_v49 = vperm.slane %v2319_v41, 1  ;;  %v1176_v24 = vperm.slane %v2323_v29, 1  ;;  %v2325_v17 = vld [vmem:[%s4465_s3 + $0x26] ss:$8 sm:$0x3] }
 0x413   : > { %v1012_v50 = vadd.f32 %v1008_v14, %v872_v53  ;;  %v1013_v56 = vadd.f32 %v1009_v35, %v873_v44  ;;  %v1245_v14 = vperm.slane %v2327_v42, 0  ;;  %v1246_v35 = vperm.slane %v2327_v42, 1  ;;  %v2331_v41 = vld [vmem:[%s4465_s3 + $0x31] ss:$8 sm:$0x3] }
 0x414   : > { %1843 = vrot.lane.b32.xlu0 %v4601_v22, %s2598_s10  ;;  %1773 = vrot.lane.b32.xlu2 %v4601_v22, %s2597_s13  ;;  %v1210_v30 = vperm.slane %v2325_v17, 0  ;;  %s2605_s13 = smov 77  }
 0x415   : > { %1808 = vrot.lane.b32.xlu1 %v4601_v22, %s2596_s20 }
 0x416   : > { %v1087_v6 = vpop.permute.xlu0 %1086  ;;  %v1161_v43 = vpop.permute.xlu2 %1160 }
 0x417   : > { %v1052_v58 = vpop.permute.xlu1 %1051 }
 0x418   : > { %v1060_v40 = vsel %vm4651_vm9, %v1052_v58, %v1056_v38  ;;  %v1062_v53 = vsel %vm4652_vm14, %v1056_v38, %v1052_v58  ;;  %vm4667_vm9 = vmmov %vm4666_vm13  ;;  %vm4668_vm14 = vcmp.lt.s32.totalorder %v2730_v28, 115 }
 0x419   : > { %v1078_v44 = vmul.f32 %v1070_v16, %v1062_v53  ;;  %v1079_v25 = vmul.f32 %v1071_v32, %v1060_v40 }
 0x41b   : > { %v1082_v60 = vadd.f32 %v1078_v44, %v942_v11  ;;  %v1083_v55 = vadd.f32 %v1079_v25, %v943_v4 }
 0x41c   : > { %1882 = vrot.lane.b32.xlu0 %v4605_v18, %s2600_s11  ;;  %1812 = vrot.lane.b32.xlu2 %v4605_v18, %s2596_s20 }
 0x41d   : > { %1847 = vrot.lane.b32.xlu1 %v4605_v18, %s2598_s10 }
 0x41e   : > { %v1126_v15 = vpop.permute.xlu0 %1125  ;;  %v1227_v27 = vpop.permute.xlu2 %1226 }
 0x41f   : > { %v1091_v54 = vpop.permute.xlu1 %1090  ;;  %v1130_v11 = vsel %vm1129_vm6, %v1122_v5, %v1126_v15  ;;  %v1132_v4 = vsel %vm1129_vm6, %v1126_v15, %v1122_v5  ;;  %vm4654_vm6 = vcmp.lt.s32.totalorder %v2730_v28, 3 }
 0x420   : > { %v1095_v2 = vsel %vm1094_vm7, %v1087_v6, %v1091_v54  ;;  %v1097_v38 = vsel %vm1094_vm7, %v1091_v54, %v1087_v6  ;;  %v1148_v33 = vmul.f32 %v1140_v19, %v1132_v4  ;;  %v1149_v13 = vmul.f32 %v1141_v52, %v1130_v11  ;;  %vm4655_vm7 = vmmov %vm4654_vm6 }
 0x421   : > { %v1113_v26 = vmul.f32 %v1105_v1, %v1097_v38  ;;  %v1114_v34 = vmul.f32 %v1106_v49, %v1095_v2  ;;  %v1302_v1 = vperm.slane %v2331_v41, 0  ;;  %v1303_v49 = vperm.slane %v2331_v41, 1  ;;  %v2335_v2 = vld [vmem:[%s4465_s3 + $0x33] ss:$8 sm:$0x3] }
 0x422   : > { %v4115_v51 = vadd.f32 %v1148_v33, %v1012_v50  ;;  %v4117_v0 = vadd.f32 %v1149_v13, %v1013_v56  ;;  %v1211_v50 = vperm.slane %v2325_v17, 1  ;;  %v2333_v38 = vld [vmem:[%s4465_s3 + $0x32] ss:$8 sm:$0x3] }
 0x423   : > { %v1117_v21 = vadd.f32 %v1113_v26, %v977_v31  ;;  %v1118_v59 = vadd.f32 %v1114_v34, %v978_v23  ;;  %v1372_v26 = vperm.slane %v2335_v2, 0  ;;  %v1373_v34 = vperm.slane %v2335_v2, 1  ;;  %v2341_v41 = vld [vmem:[%s4465_s3 + $0x36] ss:$8 sm:$0x3] }
 0x424   : > { %1948 = vrot.lane.b32.xlu0 %v4601_v22, %s2601_s9  ;;  %1878 = vrot.lane.b32.xlu2 %v4601_v22, %s2600_s11  ;;  %v1337_v29 = vperm.slane %v2333_v38, 0 }
 0x425   : > { %1913 = vrot.lane.b32.xlu1 %v4601_v22, %s4653_s14 }
 0x426   : > { %v1192_v37 = vpop.permute.xlu0 %1191  ;;  %v1288_v5 = vpop.permute.xlu2 %1287 }
 0x427   : > { %v1157_v20 = vpop.permute.xlu1 %1156 }
 0x428   : > { %v1165_v3 = vsel %vm4654_vm6, %v1157_v20, %v1161_v43  ;;  %v1167_v31 = vsel %vm4655_vm7, %v1161_v43, %v1157_v20  ;;  %vm4669_vm6 = vmmov %vm4668_vm14  ;;  %vm4670_vm7 = vcmp.lt.s32.totalorder %v2730_v28, 113 }
 0x429   : > { %v1183_v23 = vmul.f32 %v1175_v62, %v1167_v31  ;;  %v1184_v39 = vmul.f32 %v1176_v24, %v1165_v3 }
 0x42b   : > { %v1187_v48 = vadd.f32 %v1183_v23, %v1047_v12  ;;  %v1188_v36 = vadd.f32 %v1184_v39, %v1048_v10  ;;  %v2329_v39 = vld [vmem:[%s4465_s3 + $0x30] ss:$8 sm:$0x3] }
 0x42c   : > { %1987 = vrot.lane.b32.xlu0 %v4605_v18, %s2603_s7  ;;  %1917 = vrot.lane.b32.xlu2 %v4605_v18, %s4653_s14  ;;  %s2194_s14 = scalar_lea.sflag [#allocation3], %s188_s29 }
 0x42d   : > { %1952 = vrot.lane.b32.xlu1 %v4605_v18, %s2601_s9  ;;  %s2514_s9 = scalar_lea.hbm %s4466_s4, 64 }
 0x42e   : > { %v1231_v56 = vpop.permute.xlu0 %1230  ;;  %v1354_v16 = vpop.permute.xlu2 %1353 }
 0x42f   : > { %v1196_v32 = vpop.permute.xlu1 %1195  ;;  %v1235_v12 = vsel %vm4656_vm15, %v1227_v27, %v1231_v56  ;;  %v1237_v10 = vsel %vm4657_vm0, %v1231_v56, %v1227_v27  ;;  %v1268_v56 = vperm.slane %v2329_v39, 1  ;;  %vm4671_vm15 = vmmov %vm4670_vm7  ;;  %vm4672_vm0 = vcmp.lt.s32.totalorder %v2730_v28, 114 }
 0x430   : > { %v1200_v6 = vsel %vm4658_vm1, %v1192_v37, %v1196_v32  ;;  %v1202_v43 = vsel %vm4659_vm2, %v1196_v32, %v1192_v37  ;;  %v1253_v58 = vmul.f32 %v1245_v14, %v1237_v10  ;;  %v1254_v40 = vmul.f32 %v1246_v35, %v1235_v12  ;;  %v2337_v14 = vld [vmem:[%s4465_s3 + $0x34] ss:$8 sm:$0x3]  ;;  %vm4673_vm1 = vmmov %vm4672_vm0 }
 0x431   : > { %v1218_v53 = vmul.f32 %v1210_v30, %v1202_v43  ;;  %v1219_v44 = vmul.f32 %v1211_v50, %v1200_v6  ;;  %v1267_v50 = vperm.slane %v2329_v39, 0  ;;  %v1408_v32 = vperm.slane %v2337_v14, 1 }
 0x432   : > { %v1257_v25 = vadd.f32 %v1253_v58, %v1117_v21  ;;  %v1258_v7 = vadd.f32 %v1254_v40, %v1118_v59  ;;  %v1338_v21 = vperm.slane %v2333_v38, 1  ;;  %v1276_v6 = vmul.f32 %v1268_v56, %v4605_v18 }
 0x433   : > { %v1222_v19 = vadd.f32 %v1218_v53, %v1082_v60  ;;  %v1223_v52 = vadd.f32 %v1219_v44, %v1083_v55  ;;  %v1275_v58 = vmul.f32 %v1267_v50, %v4601_v22  ;;  %vm4674_vm2 = vcmp.lt.s32.totalorder %v2730_v28, 112 }
 0x434   : > { %2053 = vrot.lane.b32.xlu0 %v4601_v22, %s4660_s22  ;;  %1983 = vrot.lane.b32.xlu2 %v4601_v22, %s2603_s7  ;;  %s2387_s7 = sshll.u32 %s2654_s19, 5  ;;  %s190_s19 = scalar_lea.vmem [#allocation2], %s2275_s23 }
 0x435   : > { %2018 = vrot.lane.b32.xlu1 %v4601_v22, %s4661_s27  ;;  %v1279_v44 = vadd.f32 %v1275_v58, %v4115_v51  ;;  %s2205_s8 = scalar_lea.hbm %s4466_s4, %s2387_s7  ;;  %s2206_s20 = sshll.u32 %s190_s19, 4  ;;  %s2207_s20 = int_to_ptr.vmem [resolvable:$true] %s2206_s20 }
 0x436   : > { %v1319_v15 = vpop.permute.xlu0 %1318  ;;  %v1393_v27 = vpop.permute.xlu2 %1392  ;;  %s2208_s10 = sshll.u32 %s2205_s8, 4  ;;  %s2209_s10 = int_to_ptr.hbm [resolvable:$true] %s2208_s10 }
 0x437   : > { %v1284_v54 = vpop.permute.xlu1 %1283  ;;  %s2508_s28 = sshra.s32 %s2209_s10, 4  ;;  %s2509_s28 = int_to_ptr.hbm [resolvable:$true] %s2508_s28 }
 0x438   : > { %v1292_v11 = vsel %vm4662_vm4, %v1284_v54, %v1288_v5  ;;  %v1294_v60 = vsel %vm4663_vm10, %v1288_v5, %v1284_v54  ;;  %vm4675_vm4 = vmmov %vm4674_vm2  ;;  %vm4676_vm10 = vcmp.lt.s32.totalorder %v2730_v28, 110  ;;  %s2510_s30 = scalar_lea.hbm %s2509_s28, 32  ;;  %p2515_p0 = scmp.lt.s32.totalorder %s2509_s28, %s4466_s4 }
 0x439   : > { %v1310_v55 = vmul.f32 %v1302_v1, %v1292_v11  ;;  %v1311_v4 = vmul.f32 %v1303_v49, %v1294_v60  ;;  %v1478_v1 = vperm.slane %v2341_v41, 1  ;;  %p2511_p11 = scmp.ne.s32.totalorder %s2509_s28, %s2510_s30  ;;  %p2516_p1 = scmp.lt.s32.totalorder %s2514_s9, %s2510_s30 }
 0x43b   : > { %v4171_v33 = vadd.f32 %v1310_v55, %v1187_v48  ;;  %v4173_v13 = vadd.f32 %v1311_v4, %v1188_v36  ;;  %p2512_p12 = pnand %p2511_p11, %p2671_p5  ;;  %p2517_p2 = por %p2516_p1, %p2515_p0 }
 0x43c   : > { %2092 = vrot.lane.b32.xlu0 %v4605_v18, %s2605_s13  ;;  %2022 = vrot.lane.b32.xlu2 %v4605_v18, %s4661_s27 }
 0x43d   : > { %2057 = vrot.lane.b32.xlu1 %v4605_v18, %s4660_s22  ;;  %p2513_p13 = pneg %p2512_p12 }
 0x43e   : > { %v1358_v59 = vpop.permute.xlu0 %1357  ;;  %v1459_v62 = vpop.permute.xlu2 %1458 }
 0x43f   : > { %v1323_v24 = vpop.permute.xlu1 %1322  ;;  %v1362_v37 = vsel %vm4664_vm11, %v1354_v16, %v1358_v59  ;;  %v1364_v5 = vsel %vm4665_vm8, %v1358_v59, %v1354_v16  ;;  %v1407_v16 = vperm.slane %v2337_v14, 0  ;;  %vm4677_vm11 = vmmov %vm4676_vm10  ;;  %vm4678_vm8 = vcmp.lt.s32.totalorder %v2730_v28, 111  ;;  %p2518_p3 = pnand %p2517_p2, %p2513_p13 }
 0x440   : > { %v1327_v20 = vsel %vm4666_vm13, %v1319_v15, %v1323_v24  ;;  %v1329_v3 = vsel %vm4667_vm9, %v1323_v24, %v1319_v15  ;;  %v1380_v31 = vmul.f32 %v1372_v26, %v1362_v37  ;;  %v1381_v23 = vmul.f32 %v1373_v34, %v1364_v5  ;;  %vm4679_vm13 = vmmov %vm4678_vm8 }
 0x441   : > { %v1345_v42 = vmul.f32 %v1337_v29, %v1327_v20  ;;  %v1346_v17 = vmul.f32 %v1338_v21, %v1329_v3  ;;  %v2343_v29 = vld [vmem:[%s4465_s3 + $0x37] ss:$8 sm:$0x3]  ;;  %vm4680_vm9 = vcmp.lt.s32.totalorder %v2730_v28, 109 }
 0x442   : > { %v1384_v48 = vadd.f32 %v1380_v31, %v1257_v25  ;;  %v1385_v36 = vadd.f32 %v1381_v23, %v1258_v7  ;;  %v1280_v25 = vadd.f32 %v1276_v6, %v4117_v0  ;;  %v1513_v24 = vperm.slane %v2343_v29, 1 }
 0x443   : > { %v1349_v35 = vadd.f32 %v1345_v42, %v1222_v19  ;;  %v1350_v30 = vadd.f32 %v1346_v17, %v1223_v52  ;;  %v1477_v52 = vperm.slane %v2341_v41, 0  ;;  %v2347_v42 = vld [vmem:[%s4465_s3 + $0x41] ss:$8 sm:$0x3] }
 0x444   : > { %2088 = vrot.lane.b32.xlu2 %v4601_v22, %s2605_s13  ;;  %v2339_v22 = vld [vmem:[%s4465_s3 + $0x35] ss:$8 sm:$0x3]  ;;  %v1582_v14 = vperm.slane %v2347_v42, 0 }
 0x445   : > { %2090 = vrot.lane.b32.xlu1 %v2772_v45, %s2605_s13  ;;  %v1442_v51 = vperm.slane %v2339_v22, 0  ;;  %v1443_v49 = vperm.slane %v2339_v22, 1 }
 0x446   : > { %v1424_v12 = vpop.permute.xlu0 %1423  ;;  %v1498_v10 = vpop.permute.xlu2 %1497 }
 0x447   : > { %v1389_v43 = vpop.permute.xlu1 %1388 }
 0x448   : > { %v1397_v40 = vsel %vm4668_vm14, %v1389_v43, %v1393_v27  ;;  %v1399_v53 = vsel %vm4669_vm6, %v1393_v27, %v1389_v43  ;;  %vm4681_vm14 = vmmov %vm4680_vm9  ;;  %vm4682_vm6 = vcmp.lt.s32.totalorder %v2730_v28, 98 }
 0x449   : > { %v1415_v45 = vmul.f32 %v1407_v16, %v1397_v40  ;;  %v1416_v7 = vmul.f32 %v1408_v32, %v1399_v53 }
 0x44b   : > { %v1419_v18 = vadd.f32 %v1415_v45, %v1279_v44  ;;  %v1420_v19 = vadd.f32 %v1416_v7, %v1280_v25  ;;  %v2349_v25 = vld [vmem:[%s4465_s3 + $0x42] ss:$8 sm:$0x3] }
 0x44c   : > { %2094 = vrot.lane.b32.xlu2 %v2774_v46, %s2605_s13  ;;  %v1617_v41 = vperm.slane %v2349_v25, 0  ;;  %v1618_v22 = vperm.slane %v2349_v25, 1  ;;  %v2361_v25 = vld [vmem:[%s4465_s3 + $0x50] ss:$8 sm:$0x3] }
 0x44e   : > { %v1463_v0 = vpop.permute.xlu0 %1462  ;;  %v1564_v15 = vpop.permute.xlu2 %1563 }
 0x44f   : > { %v1428_v27 = vpop.permute.xlu1 %1427  ;;  %v1467_v54 = vsel %vm4670_vm7, %v1459_v62, %v1463_v0  ;;  %v1469_v11 = vsel %vm4671_vm15, %v1463_v0, %v1459_v62  ;;  %v1512_v62 = vperm.slane %v2343_v29, 0  ;;  %vm4683_vm7 = vmmov %vm4682_vm6  ;;  %vm4684_vm15 = vcmp.lt.s32.totalorder %v2730_v28, 99 }
 0x450   : > { %v1432_v60 = vsel %vm4672_vm0, %v1424_v12, %v1428_v27  ;;  %v1434_v55 = vsel %vm4673_vm1, %v1428_v27, %v1424_v12  ;;  %v1485_v46 = vmul.f32 %v1477_v52, %v1467_v54  ;;  %v1486_v4 = vmul.f32 %v1478_v1, %v1469_v11  ;;  %v2353_v54 = vld [vmem:[%s4465_s3 + $0x44] ss:$8 sm:$0x3]  ;;  %vm4685_vm0 = vmmov %vm4684_vm15 }
 0x451   : > { %v1450_v2 = vmul.f32 %v1442_v51, %v1432_v60  ;;  %v1451_v38 = vmul.f32 %v1443_v49, %v1434_v55  ;;  %v1687_v60 = vperm.slane %v2353_v54, 0  ;;  %v1688_v55 = vperm.slane %v2353_v54, 1 }
 0x452   : > { %v1489_v26 = vadd.f32 %v1485_v46, %v1349_v35  ;;  %v1490_v34 = vadd.f32 %v1486_v4, %v1350_v30  ;;  %v1583_v35 = vperm.slane %v2347_v42, 1  ;;  %vm4686_vm1 = vcmp.lt.s32.totalorder %v2730_v28, 97 }
 0x453   : > { %v1454_v21 = vadd.f32 %v1450_v2, %v4171_v33  ;;  %v1455_v59 = vadd.f32 %v1451_v38, %v4173_v13  ;;  %v2345_v33 = vld [vmem:[%s4465_s3 + $0x40] ss:$8 sm:$0x3]  ;;  %v1827_v54 = vperm.slane %v2361_v25, 0 }
 0x454   : > { %v1547_v30 = vperm.slane %v2345_v33, 0  ;;  %v1548_v50 = vperm.slane %v2345_v33, 1 }
 0x456   : > { %v1529_v37 = vpop.permute.xlu0 %1528  ;;  %v1603_v5 = vpop.permute.xlu2 %1602 }
 0x457   : > { %v1494_v20 = vpop.permute.xlu1 %1493 }
 0x458   : > { %v1502_v3 = vsel %vm4674_vm2, %v1494_v20, %v1498_v10  ;;  %v1504_v31 = vsel %vm4675_vm4, %v1498_v10, %v1494_v20  ;;  %vm4687_vm2 = vmmov %vm4686_vm1  ;;  %vm4688_vm4 = vcmp.lt.s32.totalorder %v2730_v28, 95 }
 0x459   : > { %v1520_v23 = vmul.f32 %v1512_v62, %v1502_v3  ;;  %v1521_v39 = vmul.f32 %v1513_v24, %v1504_v31 }
 0x45b   : > { %v1524_v13 = vadd.f32 %v1520_v23, %v1384_v48  ;;  %v1525_v17 = vadd.f32 %v1521_v39, %v1385_v36 }
 0x45e   : > { %v1568_v56 = vpop.permute.xlu0 %1567  ;;  %v1669_v16 = vpop.permute.xlu2 %1668 }
 0x45f   : > { %v1533_v32 = vpop.permute.xlu1 %1532  ;;  %v1572_v12 = vsel %vm4676_vm10, %v1564_v15, %v1568_v56  ;;  %v1574_v10 = vsel %vm4677_vm11, %v1568_v56, %v1564_v15  ;;  %vm4689_vm10 = vcmp.lt.s32.totalorder %v2730_v28, 96  ;;  %vm4690_vm11 = vmmov %vm4688_vm4 }
 0x460   : > { %v1537_v6 = vsel %vm4678_vm8, %v1529_v37, %v1533_v32  ;;  %v1539_v48 = vsel %vm4679_vm13, %v1533_v32, %v1529_v37  ;;  %v1590_v36 = vmul.f32 %v1582_v14, %v1572_v12  ;;  %v1591_v43 = vmul.f32 %v1583_v35, %v1574_v10  ;;  %vm4691_vm8 = vmmov %vm4689_vm10 }
 0x461   : > { %v1555_v58 = vmul.f32 %v1547_v30, %v1537_v6  ;;  %v1556_v40 = vmul.f32 %v1548_v50, %v1539_v48  ;;  %v2359_v6 = vld [vmem:[%s4465_s3 + $0x47] ss:$8 sm:$0x3]  ;;  %vm4692_vm13 = vcmp.lt.s32.totalorder %v2730_v28, 94 }
 0x462   : > { %v4246_v53 = vadd.f32 %v1590_v36, %v1454_v21  ;;  %v4248_v44 = vadd.f32 %v1591_v43, %v1455_v59  ;;  %v2357_v43 = vld [vmem:[%s4465_s3 + $0x46] ss:$8 sm:$0x3] }
 0x463   : > { %v1559_v45 = vadd.f32 %v1555_v58, %v1419_v18  ;;  %v1560_v7 = vadd.f32 %v1556_v40, %v1420_v19  ;;  %v2351_v18 = vld [vmem:[%s4465_s3 + $0x43] ss:$8 sm:$0x3] }
 0x464   : > { %v1652_v46 = vperm.slane %v2351_v18, 0  ;;  %v1653_v4 = vperm.slane %v2351_v18, 1 }
 0x466   : > { %v1634_v52 = vpop.permute.xlu0 %1633  ;;  %v1708_v51 = vpop.permute.xlu2 %1707 }
 0x467   : > { %v1599_v1 = vpop.permute.xlu1 %1598 }
 0x468   : > { %v1607_v49 = vsel %vm4680_vm9, %v1599_v1, %v1603_v5  ;;  %v1609_v0 = vsel %vm4681_vm14, %v1603_v5, %v1599_v1  ;;  %v1793_v1 = vperm.slane %v2359_v6, 1  ;;  %vm4693_vm9 = vmmov %vm4692_vm13  ;;  %vm4694_vm14 = vcmp.lt.s32.totalorder %v2730_v28, 93 }
 0x469   : > { %v1625_v15 = vmul.f32 %v1617_v41, %v1607_v49  ;;  %v1626_v27 = vmul.f32 %v1618_v22, %v1609_v0  ;;  %v4312_v41 = vld [vmem:[%s4465_s3 + $0x51] ss:$8 sm:$0x3]  ;;  %v1757_v22 = vperm.slane %v2357_v43, 0 }
 0x46a   : > { %v2365_v0 = vld [vmem:[%s4465_s3 + $0x52] ss:$8 sm:$0x3] }
 0x46b   : > { %v4263_v19 = vadd.f32 %v1625_v15, %v1489_v26  ;;  %v4265_v11 = vadd.f32 %v1626_v27, %v1490_v34 }
 0x46e   : > { %v1673_v2 = vpop.permute.xlu0 %1672  ;;  %v1774_v5 = vpop.permute.xlu2 %1773 }
 0x46f   : > { %v1638_v38 = vpop.permute.xlu1 %1637  ;;  %v1677_v29 = vsel %vm4682_vm6, %v1669_v16, %v1673_v2  ;;  %v1679_v21 = vsel %vm4683_vm7, %v1673_v2, %v1669_v16  ;;  %v4329_v2 = vld [vmem:[%s4465_s3 + $0x53] ss:$8 sm:$0x3]  ;;  %vm4695_vm6 = vmmov %vm4694_vm14 }
 0x470   : > { %v1642_v59 = vsel %vm4684_vm15, %v1634_v52, %v1638_v38  ;;  %v1644_v26 = vsel %vm4685_vm0, %v1638_v38, %v1634_v52  ;;  %v1695_v34 = vmul.f32 %v1687_v60, %v1677_v29  ;;  %v1696_v62 = vmul.f32 %v1688_v55, %v1679_v21 }
 0x471   : > { %v1660_v24 = vmul.f32 %v1652_v46, %v1642_v59  ;;  %v1661_v37 = vmul.f32 %v1653_v4, %v1644_v26  ;;  %v1758_v52 = vperm.slane %v2357_v43, 1  ;;  %v1828_v46 = vperm.slane %v2361_v25, 1 }
 0x472   : > { %v4275_v20 = vadd.f32 %v1695_v34, %v1559_v45  ;;  %v4277_v3 = vadd.f32 %v1696_v62, %v1560_v7  ;;  %v1792_v7 = vperm.slane %v2359_v6, 0  ;;  %v1862_v4 = vperm.slane %v4312_v41, 0  ;;  %v2369_v34 = vld [vmem:[%s4465_s3 + $0x54] ss:$8 sm:$0x3] }
 0x473   : > { %v1664_v31 = vadd.f32 %v1660_v24, %v1524_v13  ;;  %v4279_v23 = vadd.f32 %v1661_v37, %v1525_v17  ;;  %v2355_v13 = vld [vmem:[%s4465_s3 + $0x45] ss:$8 sm:$0x3]  ;;  %v1863_v59 = vperm.slane %v4312_v41, 1  ;;  %v1897_v26 = vperm.slane %v2365_v0, 0 }
 0x474   : > { %v1722_v36 = vperm.slane %v2355_v13, 0  ;;  %v1723_v58 = vperm.slane %v2355_v13, 1  ;;  %v1933_v13 = vperm.slane %v4329_v2, 1  ;;  %vm2096_vm15 = vcmp.lt.s32.totalorder %v2730_v28, 77 }
 0x475   : > { %vm4698_vm0 = vcmp.lt.s32.totalorder %v2730_v28, 82 }
 0x476   : > { %v1739_v39 = vpop.permute.xlu0 %1738  ;;  %v1813_v33 = vpop.permute.xlu2 %1812 }
 0x477   : > { %v1704_v42 = vpop.permute.xlu1 %1703 }
 0x478   : > { %v1712_v40 = vsel %vm4686_vm1, %v1704_v42, %v1708_v51  ;;  %v1714_v45 = vsel %vm4687_vm2, %v1708_v51, %v1704_v42  ;;  %vm4699_vm1 = vmmov %vm4698_vm0 }
 0x479   : > { %v1730_v15 = vmul.f32 %v1722_v36, %v1712_v40  ;;  %v1731_v60 = vmul.f32 %v1723_v58, %v1714_v45  ;;  %v1967_v58 = vperm.slane %v2369_v34, 0  ;;  %v1968_v40 = vperm.slane %v2369_v34, 1 }
 0x47b   : > { %v1734_v42 = vadd.f32 %v1730_v15, %v4246_v53  ;;  %v1735_v6 = vadd.f32 %v1731_v60, %v4248_v44 }
 0x47e   : > { %v1778_v14 = vpop.permute.xlu0 %1777  ;;  %v4281_v30 = vpop.permute.xlu2 %1878 }
 0x47f   : > { %v1743_v35 = vpop.permute.xlu1 %1742  ;;  %v1782_v49 = vsel %vm4688_vm4, %v1774_v5, %v1778_v14  ;;  %v1784_v27 = vsel %vm4690_vm11, %v1778_v14, %v1774_v5  ;;  %v1898_v5 = vperm.slane %v2365_v0, 1 }
 0x480   : > { %v1747_v51 = vsel %vm4689_vm10, %v1739_v39, %v1743_v35  ;;  %v1749_v55 = vsel %vm4691_vm8, %v1743_v35, %v1739_v39  ;;  %v1800_v29 = vmul.f32 %v1792_v7, %v1782_v49  ;;  %v1801_v24 = vmul.f32 %v1793_v1, %v1784_v27  ;;  %v2371_v39 = vld [vmem:[%s4465_s3 + $0x55] ss:$8 sm:$0x3] }
 0x481   : > { %v1765_v62 = vmul.f32 %v1757_v22, %v1747_v51  ;;  %v1766_v14 = vmul.f32 %v1758_v52, %v1749_v55  ;;  %v1932_v35 = vperm.slane %v4329_v2, 0  ;;  %v2002_v45 = vperm.slane %v2371_v39, 0  ;;  %v2375_v52 = vld [vmem:[%s4465_s3 + $0x57] ss:$8 sm:$0x3] }
 0x482   : > { %v2003_v7 = vperm.slane %v2371_v39, 1  ;;  %v1805_v41 = vadd.f32 %v1801_v24, %v4279_v23  ;;  %v2072_v60 = vperm.slane %v2375_v52, 0  ;;  %v2073_v55 = vperm.slane %v2375_v52, 1 }
 0x483   : > { %v1769_v53 = vadd.f32 %v1765_v62, %v4263_v19 }
 0x486   : > { %v4283_v50 = vpop.permute.xlu0 %1843  ;;  %v4285_v32 = vpop.permute.xlu2 %1917 }
 0x487   : > { %v1809_v56 = vpop.permute.xlu1 %1808 }
 0x488   : > { %v1817_v21 = vsel %vm4692_vm13, %v1809_v56, %v1813_v33  ;;  %v1819_v37 = vsel %vm4693_vm9, %v1813_v33, %v1809_v56  ;;  %v2373_v33 = vld [vmem:[%s4465_s3 + $0x56] ss:$8 sm:$0x3]  ;;  %v1804_v56 = vadd.f32 %v1800_v29, %v1664_v31  ;;  %v1770_v31 = vadd.f32 %v1766_v14, %v4265_v11 }
 0x489   : > { %v1835_v36 = vmul.f32 %v1827_v54, %v1817_v21  ;;  %v1836_v25 = vmul.f32 %v1828_v46, %v1819_v37  ;;  %v2037_v1 = vperm.slane %v2373_v33, 0 }
 0x48b   : > { %v1839_v0 = vadd.f32 %v1835_v36, %v4275_v20  ;;  %v1840_v51 = vadd.f32 %v1836_v25, %v4277_v3 }
 0x48e   : > { %v1883_v16 = vpop.permute.xlu0 %1882  ;;  %v4297_v48 = vpop.permute.xlu2 %1983 }
 0x48f   : > { %v1848_v12 = vpop.permute.xlu1 %1847  ;;  %v1887_v44 = vsel %vm1886_vm3, %v4281_v30, %v1883_v16  ;;  %v1889_v22 = vsel %vm1886_vm3, %v1883_v16, %v4281_v30  ;;  %vm4696_vm3 = vcmp.lt.s32.totalorder %v2730_v28, 81  ;;  %v2038_v16 = vperm.slane %v2373_v33, 1 }
 0x490   : > { %v1852_v19 = vsel %vm4694_vm14, %v4283_v50, %v1848_v12  ;;  %v1854_v23 = vsel %vm4695_vm6, %v1848_v12, %v4283_v50  ;;  %vm4697_vm7 = vmmov %vm4696_vm3  ;;  %v1905_v27 = vmul.f32 %v1897_v26, %v1887_v44  ;;  %v1906_v54 = vmul.f32 %v1898_v5, %v1889_v22  ;;  %v2377_v50 = vld [vmem:[%s4465_s3 + $0x60] ss:$8 sm:$0x3] }
 0x491   : > { %v1870_v20 = vmul.f32 %v1862_v4, %v1852_v19  ;;  %v1871_v12 = vmul.f32 %v1863_v59, %v1854_v23  ;;  %v2107_v29 = vperm.slane %v2377_v50, 0  ;;  %v2108_v21 = vperm.slane %v2377_v50, 1  ;;  %v2378_v23 = vld [vmem:[%s4465_s3 + $0xd0] ss:$8 sm:$0x3] }
 0x492   : > { %v1909_v59 = vadd.f32 %v1905_v27, %v1769_v53  ;;  %v1910_v26 = vadd.f32 %v1906_v54, %v1770_v31 }
 0x493   : > { %v1875_v62 = vadd.f32 %v1871_v12, %v1735_v6 }
 0x496   : > { %v4287_v10 = vpop.permute.xlu0 %1948  ;;  %v2023_v43 = vpop.permute.xlu2 %2022 }
 0x497   : > { %v4292_v17 = vpop.permute.xlu1 %1913 }
 0x498   : > { %v1924_v3 = vsel %vm4699_vm1, %v4285_v32, %v4292_v17 }
 0x499   : > { %v1941_v37 = vmul.f32 %v1933_v13, %v1924_v3 }
 0x49e   : > { %v1988_v18 = vpop.permute.xlu0 %1987  ;;  %v2089_v5 = vpop.permute.xlu2 %2088 }
 0x49f   : > { %v1953_v38 = vpop.permute.xlu1 %1952  ;;  %v1992_v4 = vsel %vm1991_vm5, %v4297_v48, %v1988_v18 }
 0x4a0   : > { %v1957_v30 = vsel %vm4696_vm3, %v4287_v10, %v1953_v38  ;;  %v1959_v11 = vsel %vm4697_vm7, %v1953_v38, %v4287_v10  ;;  %v1922_v10 = vsel %vm4698_vm0, %v4292_v17, %v4285_v32  ;;  %v1994_v38 = vsel %vm1991_vm5, %v1988_v18, %v4297_v48 }
 0x4a1   : > { %v1975_v46 = vmul.f32 %v1967_v58, %v1957_v30  ;;  %v1976_v2 = vmul.f32 %v1968_v40, %v1959_v11  ;;  %v1874_v17 = vadd.f32 %v1870_v20, %v1734_v42  ;;  %v1940_v24 = vmul.f32 %v1932_v35, %v1922_v10 }
 0x4a2   : > { %v2010_v36 = vmul.f32 %v2002_v45, %v1992_v4  ;;  %v2011_v58 = vmul.f32 %v2003_v7, %v1994_v38  ;;  %vm4700_vm5 = vcmp.lt.s32.totalorder %v2730_v28, 78  ;;  %v1945_v45 = vadd.f32 %v1941_v37, %v1805_v41 }
 0x4a3   : > { %v1979_v39 = vadd.f32 %v1975_v46, %v1839_v0  ;;  %v1980_v14 = vadd.f32 %v1976_v2, %v1840_v51  ;;  %v2110_v41 = vperm.slane %v2378_v23, 1 }
 0x4a4   : > { %v2014_v22 = vadd.f32 %v2010_v36, %v1874_v17  ;;  %v2015_v52 = vadd.f32 %v2011_v58, %v1875_v62 }
 0x4a6   : > { %v2054_v49 = vpop.permute.xlu0 %2053  ;;  %v2095_v27 = vpop.permute.xlu2 %2094 }
 0x4a7   : > { %v2019_v15 = vpop.permute.xlu1 %2018 }
 0x4a8   : > { %v2027_v34 = vsel %vm2026_vm12, %v2019_v15, %v2023_v43  ;;  %v2029_v32 = vsel %vm2026_vm12, %v2023_v43, %v2019_v15  ;;  %vm4701_vm12 = vmmov %vm4700_vm5  ;;  %v1944_v43 = vadd.f32 %v1940_v24, %v1804_v56  ;;  %v2109_v56 = vperm.slane %v2378_v23, 0 }
 0x4a9   : > { %v2045_v18 = vmul.f32 %v2037_v1, %v2027_v34  ;;  %v2046_v40 = vmul.f32 %v2038_v16, %v2029_v32 }
 0x4ab   : > { %v2049_v1 = vadd.f32 %v2045_v18, %v1909_v59  ;;  %v2050_v0 = vadd.f32 %v2046_v40, %v1910_v26 }
 0x4ae   : > { %v2093_v48 = vpop.permute.xlu0 %2092 }
 0x4af   : > { %v2058_v33 = vpop.permute.xlu1 %2057  ;;  %v2097_v25 = vsel %vm2096_vm15, %v2089_v5, %v2093_v48  ;;  %v2099_v53 = vsel %vm2096_vm15, %v2093_v48, %v2089_v5 }
 0x4b0   : > { %v2062_v42 = vsel %vm4700_vm5, %v2054_v49, %v2058_v33  ;;  %v2064_v35 = vsel %vm4701_vm12, %v2058_v33, %v2054_v49  ;;  %v2115_v13 = vmul.f32 %v2107_v29, %v2097_v25  ;;  %v2116_v6 = vmul.f32 %v2108_v21, %v2099_v53 }
 0x4b1   : > { %v2080_v7 = vmul.f32 %v2072_v60, %v2062_v42  ;;  %v2081_v44 = vmul.f32 %v2073_v55, %v2064_v35 }
 0x4b2   : > { %v2119_v31 = vadd.f32 %v2115_v13, %v1979_v39  ;;  %v2120_v19 = vadd.f32 %v2116_v6, %v1980_v14  ;;  %v4702_v6 = vld [vmem:[#allocation5_spill] sm:$0xff] }
 0x4b3   : > { %v2084_v30 = vadd.f32 %v2080_v7, %v1944_v43  ;;  %v2085_v11 = vadd.f32 %v2081_v44, %v1945_v45  ;;  %v4703_v45 = vld [vmem:[#allocation9_spill] sm:$0xff]  ;;  %v4704_v44 = vld [vmem:[#allocation7_spill] sm:$0xff] }
 0x4b4   : > { %v2123_v16 = vadd.f32 %v2119_v31, %v2014_v22  ;;  %v2124_v49 = vadd.f32 %v2120_v19, %v2015_v52  ;;  %v4705_v52 = vld [vmem:[#allocation11_spill] sm:$0xff]  ;;  %v4706_v19 = vld [vmem:[#allocation6_spill] sm:$0xff] }
 0x4b5   : > { %v2127_v15 = vadd.f32 %v2084_v30, %v2049_v1  ;;  %v2128_v51 = vadd.f32 %v2085_v11, %v2050_v0  ;;  %v4707_v1 = vld [vmem:[#allocation10_spill] sm:$0xff]  ;;  %v4708_v30 = vld [vmem:[#allocation8_spill] sm:$0xff] }
 0x4b7   : > { %v2131_v54 = vadd.f32 %v2127_v15, %v2123_v16  ;;  %v2132_v60 = vadd.f32 %v2128_v51, %v2124_v49  ;;  %v2091_v50 = vpop.permute.xlu1 %2090  ;;  %v4709_v16 = vld [vmem:[#allocation12_spill] sm:$0xff] }
 0x4b8   : > { %v2098_v20 = vsel %vm2096_vm15, %v2091_v50, %v2095_v27  ;;  %v2100_v12 = vsel %vm2096_vm15, %v2095_v27, %v2091_v50 }
 0x4b9   : > { %v2117_v55 = vmul.f32 %v2109_v56, %v2098_v20  ;;  %v2118_v10 = vmul.f32 %v2110_v41, %v2100_v12 }
 0x4bb   : > { %v2121_v3 = vadd.f32 %v2117_v55, %v3796_v63  ;;  %v2122_v46 = vadd.f32 %v2118_v10, %v3798_v47 }
 0x4bd   : > { %v2125_v2 = vadd.f32 %v2121_v3, %v3854_v9  ;;  %v2126_v4 = vadd.f32 %v2122_v46, %v3857_v8 }
 0x4bf   : > { %v2133_v38 = vadd.f32 %v3874_v57, %v2125_v2  ;;  %v2134_v29 = vadd.f32 %v3876_v61, %v2126_v4 }
 0x4c1   : > { %v2135_v21 = vadd.f32 %v2133_v38, %v2131_v54  ;;  %v2136_v59 = vadd.f32 %v2134_v29, %v2132_v60 }
 0x4c3   : > { %v2379_v26 = vmul.f32 -1.442695, %v2135_v21  ;;  %v2380_v34 = vmul.f32 -1.442695, %v2136_v59 }
 0x4c5   : > { %2486 = vpow2.f32 %v2379_v26 }
 0x4c6   : > { %2488 = vpow2.f32 %v2380_v34 }
 0x4cb   : > { %v2487_v28 = vpop.eup %2486 }
 0x4cc   : > { %v2489_v32 = vpop.eup %2488  ;;  %v2143_v17 = vadd.f32 1.0, %v2487_v28 }
 0x4cd   : > { %v2144_v63 = vadd.f32 1.0, %v2489_v32 }
 0x4ce   : > { %2490 = vrcp.f32 %v2143_v17  ;;  %v2156_v24 = vand.u32 2147483648, %v2143_v17  ;;  %v2154_v5 = vand.u32 2147483647, %v2143_v17  ;;  %vm2150_vm10 = vweird.f32 %v2143_v17 }
 0x4cf   : > { %2492 = vrcp.f32 %v2144_v63  ;;  %v2171_v39 = vand.u32 2147483648, %v2144_v63  ;;  %v2169_v36 = vand.u32 2147483647, %v2144_v63  ;;  %vm2165_vm8 = vweird.f32 %v2144_v63 }
 0x4d0   : > { %v2157_v48 = vor.u32 1.1754944e-38, %v2156_v24  ;;  %vm2155_vm13 = vcmp.eq.f32.partialorder %v2154_v5, 8.507059e+37 }
 0x4d1   : > { %v2172_v33 = vor.u32 1.1754944e-38, %v2171_v39  ;;  %vm2170_vm14 = vcmp.eq.f32.partialorder %v2169_v36, 8.507059e+37 }
 0x4d4   : > { %v2491_v47 = vpop.eup %2490 }
 0x4d5   : > { %v2493_v9 = vpop.eup %2492  ;;  %v2146_v8 = vmul.f32 %v2491_v47, %v2143_v17  ;;  %vm2151_vm2 = vweird.f32 %v2491_v47 }
 0x4d6   : > { %v2161_v62 = vmul.f32 %v2493_v9, %v2144_v63  ;;  %vm2166_vm4 = vweird.f32 %v2493_v9  ;;  %vm2152_vm11 = vmor %vm2150_vm10, %vm2151_vm2 }
 0x4d7   : > { %v2147_v57 = vsub.f32 1.0, %v2146_v8  ;;  %vm2167_vm9 = vmor %vm2165_vm8, %vm2166_vm4 }
 0x4d8   : > { %v2162_v61 = vsub.f32 1.0, %v2161_v62 }
 0x4d9   : > { %v2148_v37 = vmul.f32 %v2491_v47, %v2147_v57 }
 0x4da   : > { %v2163_v14 = vmul.f32 %v2493_v9, %v2162_v61 }
 0x4db   : > { %v2149_v58 = vadd.f32 %v2491_v47, %v2148_v37 }
 0x4dc   : > { %v2164_v18 = vadd.f32 %v2493_v9, %v2163_v14 }
 0x4dd   : > { %v2153_v40 = vsel %vm2152_vm11, %v2491_v47, %v2149_v58 }
 0x4de   : > { %v2158_v25 = vsel %vm2155_vm13, %v2157_v48, %v2153_v40  ;;  %v2168_v53 = vsel %vm2167_vm9, %v2493_v9, %v2164_v18 }
 0x4df   : > { %v2173_v42 = vsel %vm2170_vm14, %v2172_v33, %v2168_v53  ;;  %v2175_v35 = vperm.slane %v2158_v25, 0 }
 0x4e0   : > { %v2176_v13 = vperm.slane %v2173_v42, 0 }
 0x4e1   : > { %v2177_v43 = vmul.f32 %v2175_v35, %v4702_v6  ;;  %v2179_v7 = vmul.f32 %v2175_v35, %v4703_v45  ;;  %v2181_v22 = vmul.f32 %v2175_v35, %v4704_v44  ;;  %v2183_v31 = vmul.f32 %v2175_v35, %v4705_v52 }
 0x4e2   : > { %v2178_v23 = vmul.f32 %v2176_v13, %v4706_v19  ;;  %v2180_v0 = vmul.f32 %v2176_v13, %v4707_v1  ;;  %v2182_v11 = vmul.f32 %v2176_v13, %v4708_v30  ;;  %v2184_v49 = vmul.f32 %v2176_v13, %v4709_v16 }
 0x4e4   : > { %v2185_v15 = vpack.c.bf16 %v2178_v23, %v2177_v43  ;;  %v2186_v51 = vpack.c.bf16 %v2180_v0, %v2179_v7  ;;  %v2187_v56 = vpack.c.bf16 %v2182_v11, %v2181_v22  ;;  %v2188_v41 = vpack.c.bf16 %v2184_v49, %v2183_v31 }
 0x4e6   : > { %2189 = vst [vmem:[%s190_s19] sm:$0xff] %v2185_v15 }
 0x4e7   : > { %2190 = vst [vmem:[%s190_s19 + $0x8] sm:$0xff] %v2186_v51 }
 0x4e8   : > { %2191 = vst [vmem:[%s190_s19 + $0x10] sm:$0xff] %v2187_v56 }
 0x4e9   : > { %2192 = vst [vmem:[%s190_s19 + $0x18] sm:$0xff] %v2188_v41 }
 0x4ea   : > { %2521 = shalt.err (!%p2518_p3)
}
 0x4eb   : > { %s2606_s27 = smov 128   ;;  %s2607_s29 = smov 8  }
 0x4ec   : > { %2388 = dma.vmem_to_hbm [thread:$0]  (%p2671_p5), %s2207_s20, 512, %s2209_s10, %s2194_s14, %s2606_s27, %s2606_s27, %s2607_s29  }
 0x4ed PF: > { %p2394_p4 = scmp.ge.s32.totalorder %s2556_s18, 2  ;;  %s2223_s23 = sand.u32 1, %s2544_s15  }
 0x4ee   : > { %s2224_s7 = scalar_lea.sflag [#allocation3], %s2223_s23 }
 0x4ef   : > { %p2391_p7 = pnand %p2394_p4, %p2675_p6 }
 0x4f1   : > { %p2392_p8 = pneg %p2391_p7 }
 0x4f3   : > { %2539 = dma.done.wait (%p2392_p8), %s2224_s7, 512  }
 0x4f4   : > { %2541 = vsyncadd (%p2392_p8), %s2224_s7, 4294966784  ;;  %p14_p9 = scmp.ge.s32.totalorder %s2658_s21, 4   ;;  %s4710_s15 = smov %s2548_s16 }
 0x4f5   : > { %s4711_s16 = smov %s2552_s17  ;;  %s4712_s17 = smov %s2669_s24 }
 0x4f6   : > { %s4713_s18 = smov %s2658_s21  ;;  %16 = sbr.rel (!%p14_p9) target bundleno = 3 (0x3), region = 168 }
 0x4fb   :  { %2230 = vsyncpa [#allocation3], 1 }
 0x4fc   :  { %2232 = vsyncpa [#allocation3 + $0x1], 1 }

</bundles_post_ra>
